<compile_context>
chip_gen: v7x
topology: tpu7x:2x2x1
jax: 0.10.0
libtpu: 0.0.40
codegen_flags: <defaults>
</compile_context>

<pallas_src>
import functools

import jax
import jax.numpy as jnp
import numpy as np
from jax.experimental import pallas as pl
from jax.experimental.pallas import tpu as pltpu

_LANE = 128   # channel padding target (lane width)
_COL0 = 8     # sublane-aligned column offset of the conv2 intermediate's interior


def _round_up(x, m):
    return (x + m - 1) // m * m


def _pick_row_tile(ho, wo, target_rows=256):
    """Largest divisor of ho whose row-tile has ~target_rows output pixels."""
    if ho * wo <= target_rows:
        return ho
    best = 1
    for d in range(1, ho + 1):
        if ho % d == 0 and d * wo <= target_rows:
            best = d
    return best


def _resblock_down_kernel(x_ref, w1_ref, s1_ref, b1_ref, w2_ref, s2_ref, b2_ref,
                          ws_ref, ss_ref, bs_ref, o_ref, hpad_ref, *, th):
    """One grid step = b_tile batch elements.

    x_ref : (b_tile, 4*Hp, Wp, Cp_in) bf16 -- 4 stride-2 phase planes (ee, eo, oe, oo) of the
            zero-padded input, stacked along rows (phase p lives in rows [p*Hp, (p+1)*Hp)).
    w1_ref: (3, 3*Cp_in, Cp_out) bf16  -- conv1 taps, kw fused along K (K index = kw*Cp_in + c).
    w2_ref: (3, 3*Cp_out, Cp_out) bf16 -- conv2 taps, kw fused along K.
    ws_ref: (Cp_in, Cp_out) bf16       -- 1x1 stride-2 shortcut conv.
    s*/b* : (1, Cp_out) f32            -- folded BatchNorm scale / bias (conv bias included).
    o_ref : (b_tile, Ho, Wo, Cp_out) bf16.
    hpad_ref: VMEM scratch (b_tile, Ho+2, Wbuf, Cp_out) bf16 -- re-padded conv2 input.
    """
    b_tile, ho, wo, cout = o_ref.shape
    hp = x_ref.shape[1] // 4
    cin = x_ref.shape[-1]
    wbuf = hpad_ref.shape[2]
    n_tiles = ho // th

    # ---- minimal halo init: only the 2 rows + 2 columns conv2's boundary taps read.
    # Every grid step (cheap), not first-step-only: each megacore TC has its own scratch.
    zrow = jnp.zeros((b_tile, 1, wbuf, cout), hpad_ref.dtype)
    hpad_ref[:, 0:1, :, :] = zrow
    hpad_ref[:, ho + 1:ho + 2, :, :] = zrow
    zcol = jnp.zeros((b_tile, ho, 1, cout), hpad_ref.dtype)
    hpad_ref[:, 1:ho + 1, _COL0 - 1:_COL0, :] = zcol
    hpad_ref[:, 1:ho + 1, _COL0 + wo:_COL0 + wo + 1, :] = zcol

    s1 = s1_ref[...]; b1 = b1_ref[...]
    s2 = s2_ref[...]; b2 = b2_ref[...]
    ss = ss_ref[...]; bs = bs_ref[...]

    # ---- conv1: 3x3 stride-2 via phase planes, kw-fused (K = 3*cin), row-tiled, batch-merged M
    for t in range(n_tiles):
        r = t * th
        acc = jnp.zeros((b_tile * th * wo, cout), jnp.float32)
        for kh in range(3):
            pe = (kh % 2) * 2          # even-column phase plane (row parity kh%2)
            po = pe + 1                # odd-column phase plane
            parts = []
            for b in range(b_tile):
                re0 = pe * hp + kh // 2 + r
                ro0 = po * hp + kh // 2 + r
                slab_e = x_ref[b, re0:re0 + th, :, :]      # one aligned full-width load
                slab_o = x_ref[b, ro0:ro0 + th, :, :]
                parts.append(jnp.concatenate(
                    [slab_e[:, 0:wo, :],                   # kw = 0
                     slab_o[:, 0:wo, :],                   # kw = 1
                     slab_e[:, 1:wo + 1, :]],              # kw = 2
                    axis=-1).reshape(th * wo, 3 * cin))
            patch = jnp.concatenate(parts, axis=0)
            acc = acc + jnp.dot(patch, w1_ref[kh], preferred_element_type=jnp.float32)
        h1 = jnp.maximum(acc * s1 + b1, 0.0)               # BN1 + ReLU (f32)
        for b in range(b_tile):
            hpad_ref[b, 1 + r:1 + r + th, _COL0:_COL0 + wo, :] = (
                h1[b * th * wo:(b + 1) * th * wo]
                .reshape(th, wo, cout).astype(hpad_ref.dtype))

    # ---- conv2: 3x3 stride-1 on the re-padded scratch, kw-fused; shortcut computed last
    # (short live range); residual add + final ReLU, stored per row tile.
    for t in range(n_tiles):
        r = t * th
        acc = jnp.zeros((b_tile * th * wo, cout), jnp.float32)
        for kh in range(3):
            parts = []
            for b in range(b_tile):
                slab = hpad_ref[b, r + kh:r + kh + th, :, :]   # aligned full-width load
                parts.append(jnp.concatenate(
                    [slab[:, _COL0 - 1:_COL0 - 1 + wo, :],
                     slab[:, _COL0:_COL0 + wo, :],
                     slab[:, _COL0 + 1:_COL0 + 1 + wo, :]],
                    axis=-1).reshape(th * wo, 3 * cout))
            patch = jnp.concatenate(parts, axis=0)
            acc = acc + jnp.dot(patch, w2_ref[kh], preferred_element_type=jnp.float32)
        main = acc * s2 + b2                                # BN2

        # shortcut: 1x1 stride-2 conv == matmul on the odd-odd phase plane
        xc = jnp.concatenate(
            [x_ref[b, 3 * hp + r:3 * hp + r + th, 0:wo, :].reshape(th * wo, cin)
             for b in range(b_tile)], axis=0)
        sc = jnp.dot(xc, ws_ref[...], preferred_element_type=jnp.float32) * ss + bs

        out = jnp.maximum(main + sc, 0.0)                   # residual add + final ReLU
        for b in range(b_tile):
            o_ref[b, r:r + th, :, :] = (
                out[b * th * wo:(b + 1) * th * wo]
                .reshape(th, wo, cout).astype(o_ref.dtype))


def _fold_bn(gamma, beta, mean, var, conv_bias, c_pad, eps=1e-5):
    scale = gamma / jnp.sqrt(var + eps)
    bias = beta + (conv_bias - mean) * scale
    scale = jnp.pad(scale, (0, c_pad - scale.shape[0]))
    bias = jnp.pad(bias, (0, c_pad - bias.shape[0]))
    return (scale.reshape(1, c_pad).astype(jnp.float32),
            bias.reshape(1, c_pad).astype(jnp.float32))


@jax.jit
def resblock_down_forward(x_nchw, params):
    """ResBlockDown forward.  x_nchw: (N, Cin, H, W) f32 -> (N, Cout, ceil(H/2), ceil(W/2)) bf16."""
    N, Cin, H, W = x_nchw.shape
    Cout = params["w1"].shape[0]
    Ho = (H - 1) // 2 + 1
    Wo = (W - 1) // 2 + 1
    cin_p = _round_up(Cin, _LANE)
    cout_p = _round_up(Cout, _LANE)
    Hp = Ho + 1
    Wp = _round_up(Wo + 1, 8)
    wbuf = _round_up(_COL0 + Wo + 1, 8)

    # Batch tile: at small spatial sizes, merge several batch elements into one grid step
    # (and into the matmul M dimension).  Row tile: bound accumulators at large spatial sizes.
    b_tile = 1
    while b_tile * Ho * Wo < 256 and b_tile * 2 <= N and N % (b_tile * 2) == 0:
        b_tile *= 2
    th = _pick_row_tile(Ho, Wo)

    # NCHW -> NHWC, lane-dense channel pad, bf16 for the MXU.
    x = jnp.transpose(x_nchw, (0, 2, 3, 1)).astype(jnp.bfloat16)
    x = jnp.pad(x, ((0, 0), (0, 0), (0, 0), (0, cin_p - Cin)))
    # spatial zero-pad: 1 on the low side (conv padding=1), enough on the high side that
    # every stride-2 phase plane is exactly (Ho+1, Wo+1).
    x = jnp.pad(x, ((0, 0), (1, 2 * Ho + 1 - H), (1, 2 * Wo + 1 - W), (0, 0)))
    phases = [x[:, 0::2, 0::2, :], x[:, 0::2, 1::2, :],
              x[:, 1::2, 0::2, :], x[:, 1::2, 1::2, :]]
    xs = jnp.stack(phases, axis=1)                                # (N, 4, Hp, Wo+1, cin_p)
    xs = jnp.pad(xs, ((0, 0), (0, 0), (0, 0), (0, Wp - (Wo + 1)), (0, 0)))
    xs = xs.reshape(N, 4 * Hp, Wp, cin_p)

    # conv weights: PyTorch (Cout, Cin, kh, kw) -> (kh, kw, Cin, Cout), channel-pad, then
    # fuse kw into K: (3, 3*Cp_in, Cp_out).  K index = kw*Cp_in + c (matches the kernel concat).
    w1 = jnp.transpose(params["w1"], (2, 3, 1, 0))
    w1 = jnp.pad(w1, ((0, 0), (0, 0), (0, cin_p - Cin), (0, cout_p - Cout)))
    w1 = w1.reshape(3, 3 * cin_p, cout_p).astype(jnp.bfloat16)
    w2 = jnp.transpose(params["w2"], (2, 3, 1, 0))
    w2 = jnp.pad(w2, ((0, 0), (0, 0), (0, cout_p - Cout), (0, cout_p - Cout)))
    w2 = w2.reshape(3, 3 * cout_p, cout_p).astype(jnp.bfloat16)
    ws = jnp.transpose(params["ws"][:, :, 0, 0], (1, 0))
    ws = jnp.pad(ws, ((0, cin_p - Cin), (0, cout_p - Cout))).astype(jnp.bfloat16)

    # folded BN (+ conv bias) scale / bias, f32 epilogue
    s1, b1 = _fold_bn(params["g1"], params["be1"], params["m1"], params["v1"],
                      params["cb1"], cout_p)
    s2, b2 = _fold_bn(params["g2"], params["be2"], params["m2"], params["v2"],
                      params["cb2"], cout_p)
    ss, bs = _fold_bn(params["gs"], params["bes"], params["ms"], params["vs"],
                      params["cbs"], cout_p)

    # VMEM budget computed from the actual buffers (double-buffered x/out blocks, resident
    # weights/scales, scratch), with headroom; capped at 48 MiB for v7x's 64 MiB VMEM.
    x_blk = b_tile * 4 * Hp * Wp * cin_p * 2
    o_blk = b_tile * Ho * Wo * cout_p * 2
    w_bytes = (3 * 3 * cin_p * cout_p + 3 * 3 * cout_p * cout_p + cin_p * cout_p) * 2 \
        + 6 * cout_p * 4
    scratch_bytes = b_tile * (Ho + 2) * wbuf * cout_p * 2
    vmem_bytes = 2 * (x_blk + o_blk) + w_bytes + scratch_bytes
    vmem_limit = int(min(max(2 * vmem_bytes, 16 * 1024 * 1024), 48 * 1024 * 1024))

    flops = 2 * N * Ho * Wo * (9 * cin_p * cout_p + cin_p * cout_p + 9 * cout_p * cout_p)
    bytes_accessed = N * 4 * Hp * Wp * cin_p * 2 + w_bytes + N * Ho * Wo * cout_p * 2

    const_spec = pl.BlockSpec(memory_space=pltpu.MemorySpace.VMEM)   # untiled, single copy
    kernel = functools.partial(_resblock_down_kernel, th=th)
    out = pl.pallas_call(
        kernel,
        out_shape=jax.ShapeDtypeStruct((N, Ho, Wo, cout_p), jnp.bfloat16),
        grid_spec=pltpu.PrefetchScalarGridSpec(
            num_scalar_prefetch=0,
            grid=(N // b_tile,),
            in_specs=[pl.BlockSpec((b_tile, 4 * Hp, Wp, cin_p), lambda n: (n, 0, 0, 0))]
                     + [const_spec] * 9,
            out_specs=pl.BlockSpec((b_tile, Ho, Wo, cout_p), lambda n: (n, 0, 0, 0)),
            scratch_shapes=[pltpu.VMEM((b_tile, Ho + 2, wbuf, cout_p), jnp.bfloat16)],
        ),
        compiler_params=pltpu.CompilerParams(
            dimension_semantics=("parallel",),
            vmem_limit_bytes=vmem_limit,
        ),
        cost_estimate=pl.CostEstimate(flops=flops, transcendentals=0,
                                      bytes_accessed=bytes_accessed),
    )(xs, w1, s1, b1, w2, s2, b2, ws, ss, bs)

    # drop channel padding, NHWC -> NCHW to match the PyTorch module's output layout
    return jnp.transpose(out[..., :Cout], (0, 3, 1, 2))


# ------------------------- pure-JAX reference (for sanity) -------------------------
def resblock_down_reference(x_nchw, params):
    x = jnp.transpose(x_nchw, (0, 2, 3, 1)).astype(jnp.float32)

    def conv(h, w_oihw, stride, pad):
        w = jnp.transpose(w_oihw, (2, 3, 1, 0))
        return jax.lax.conv_general_dilated(
            h, w, (stride, stride), [(pad, pad), (pad, pad)],
            dimension_numbers=("NHWC", "HWIO", "NHWC"))

    def bn(h, g, be, m, v, eps=1e-5):
        return (h - m) / jnp.sqrt(v + eps) * g + be

    h = conv(x, params["w1"], 2, 1) + params["cb1"]
    h = jnp.maximum(bn(h, params["g1"], params["be1"], params["m1"], params["v1"]), 0.0)
    h = conv(h, params["w2"], 1, 1) + params["cb2"]
    h = bn(h, params["g2"], params["be2"], params["m2"], params["v2"])
    sc = conv(x, params["ws"], 2, 0) + params["cbs"]
    sc = bn(sc, params["gs"], params["bes"], params["ms"], params["vs"])
    out = jnp.maximum(h + sc, 0.0)
    return jnp.transpose(out, (0, 3, 1, 2))


def make_params(key, in_channels, out_channels):
    ks = jax.random.split(key, 8)
    return {
        # main branch: conv1 (3x3, stride 2) / conv2 (3x3, stride 1), PyTorch layout + biases
        "w1": 0.1 * jax.random.normal(ks[0], (out_channels, in_channels, 3, 3), jnp.float32),
        "cb1": 0.05 * jax.random.normal(ks[1], (out_channels,), jnp.float32),
        "w2": 0.1 * jax.random.normal(ks[2], (out_channels, out_channels, 3, 3), jnp.float32),
        "cb2": 0.05 * jax.random.normal(ks[3], (out_channels,), jnp.float32),
        # BN1 / BN2 (inference-mode running stats)
        "g1": 1.0 + 0.1 * jax.random.normal(ks[4], (out_channels,), jnp.float32),
        "be1": 0.1 * jax.random.normal(ks[5], (out_channels,), jnp.float32),
        "m1": 0.05 * jnp.arange(out_channels, dtype=jnp.float32),
        "v1": 1.0 + 0.02 * jnp.arange(out_channels, dtype=jnp.float32),
        "g2": jnp.ones((out_channels,), jnp.float32) * 0.9,
        "be2": jnp.full((out_channels,), 0.02, jnp.float32),
        "m2": -0.03 * jnp.arange(out_channels, dtype=jnp.float32),
        "v2": 1.0 + 0.01 * jnp.arange(out_channels, dtype=jnp.float32),
        # shortcut: ResBlockDown ALWAYS projects (1x1 stride-2 conv + BN)
        "ws": 0.1 * jax.random.normal(ks[6], (out_channels, in_channels, 1, 1), jnp.float32),
        "cbs": 0.05 * jax.random.normal(ks[7], (out_channels,), jnp.float32),
        "gs": jnp.ones((out_channels,), jnp.float32) * 1.1,
        "bes": jnp.full((out_channels,), -0.01, jnp.float32),
        "ms": 0.02 * jnp.arange(out_channels, dtype=jnp.float32),
        "vs": 1.0 + 0.03 * jnp.arange(out_channels, dtype=jnp.float32),
    }


if __name__ == "__main__":
    key = jax.random.PRNGKey(0)
    kx, kp = jax.random.split(key)

    N, Cin, H, W = 2, 4, 16, 16
    Cout = 8
    x = jax.random.normal(kx, (N, Cin, H, W), jnp.float32)
    params = make_params(kp, Cin, Cout)

    out = jax.block_until_ready(resblock_down_forward(x, params))
    ref = jax.block_until_ready(resblock_down_reference(x, params))

    Ho, Wo = (H - 1) // 2 + 1, (W - 1) // 2 + 1
    assert out.shape == (N, Cout, Ho, Wo), out.shape
    # bf16 matmul inputs + bf16 output (f32 accumulation) -> compare against f32 ref loosely
    out_f32 = np.asarray(out).astype(np.float32)
    np.testing.assert_allclose(out_f32, np.asarray(ref), rtol=4e-2, atol=4e-2)

    print("KERNEL_OK")
</pallas_src>

<mosaic_0001>
module attributes {stable_mosaic.version = 11 : i64} {
  func.func @_resblock_down_kernel(%arg0: i32, %arg1: memref<2x36x16x128xbf16, #tpu.memory_space<vmem>>, %arg2: memref<3x384x128xbf16, #tpu.memory_space<vmem>>, %arg3: memref<1x128xf32, #tpu.memory_space<vmem>>, %arg4: memref<1x128xf32, #tpu.memory_space<vmem>>, %arg5: memref<3x384x128xbf16, #tpu.memory_space<vmem>>, %arg6: memref<1x128xf32, #tpu.memory_space<vmem>>, %arg7: memref<1x128xf32, #tpu.memory_space<vmem>>, %arg8: memref<128x128xbf16, #tpu.memory_space<vmem>>, %arg9: memref<1x128xf32, #tpu.memory_space<vmem>>, %arg10: memref<1x128xf32, #tpu.memory_space<vmem>>, %arg11: memref<2x8x8x128xbf16, #tpu.memory_space<vmem>>, %arg12: memref<2x10x24x128xbf16, #tpu.memory_space<vmem>>) attributes {dimension_semantics = [#tpu.dimension_semantics<parallel>], iteration_bounds = array<i64: 1>, scalar_prefetch = 0 : i64, scratch_operands = 1 : i64, tpu.core_type = #tpu.core_type<tc>, window_params = [{transform_indices = @transform_0, window_bounds = array<i64: 2, 36, 16, 128>}, {pipeline_mode = #tpu.pipeline_mode<synchronous>, transform_indices = @transform_1, window_bounds = array<i64: 3, 384, 128>}, {pipeline_mode = #tpu.pipeline_mode<synchronous>, transform_indices = @transform_2, window_bounds = array<i64: 1, 128>}, {pipeline_mode = #tpu.pipeline_mode<synchronous>, transform_indices = @transform_3, window_bounds = array<i64: 1, 128>}, {pipeline_mode = #tpu.pipeline_mode<synchronous>, transform_indices = @transform_4, window_bounds = array<i64: 3, 384, 128>}, {pipeline_mode = #tpu.pipeline_mode<synchronous>, transform_indices = @transform_5, window_bounds = array<i64: 1, 128>}, {pipeline_mode = #tpu.pipeline_mode<synchronous>, transform_indices = @transform_6, window_bounds = array<i64: 1, 128>}, {pipeline_mode = #tpu.pipeline_mode<synchronous>, transform_indices = @transform_7, window_bounds = array<i64: 128, 128>}, {pipeline_mode = #tpu.pipeline_mode<synchronous>, transform_indices = @transform_8, window_bounds = array<i64: 1, 128>}, {pipeline_mode = #tpu.pipeline_mode<synchronous>, transform_indices = @transform_9, window_bounds = array<i64: 1, 128>}, {transform_indices = @transform_10, window_bounds = array<i64: 2, 8, 8, 128>}]} {
    %cst = arith.constant 0.000000e+00 : bf16
    %0 = vector.broadcast %cst : bf16 to vector<2x1x24x128xbf16>
    %c0 = arith.constant 0 : index
    %c0_0 = arith.constant 0 : index
    %c0_1 = arith.constant 0 : index
    %c0_2 = arith.constant 0 : index
    %1 = vector.load %arg12[%c0, %c0_0, %c0_1, %c0_2] : memref<2x10x24x128xbf16, #tpu.memory_space<vmem>>, vector<2x1x24x128xbf16>
    tpu.vector_store %arg12[%c0, %c0_0, %c0_1, %c0_2], %0 {strides = array<i32>} : memref<2x10x24x128xbf16, #tpu.memory_space<vmem>>, vector<2x1x24x128xbf16>,
    %c0_3 = arith.constant 0 : index
    %c9 = arith.constant 9 : index
    %c0_4 = arith.constant 0 : index
    %c0_5 = arith.constant 0 : index
    %2 = vector.load %arg12[%c0_3, %c9, %c0_4, %c0_5] : memref<2x10x24x128xbf16, #tpu.memory_space<vmem>>, vector<2x1x24x128xbf16>
    tpu.vector_store %arg12[%c0_3, %c9, %c0_4, %c0_5], %0 {strides = array<i32>} : memref<2x10x24x128xbf16, #tpu.memory_space<vmem>>, vector<2x1x24x128xbf16>,
    %cst_6 = arith.constant 0.000000e+00 : bf16
    %3 = vector.broadcast %cst_6 : bf16 to vector<2x8x1x128xbf16>
    %c0_7 = arith.constant 0 : index
    %c1 = arith.constant 1 : index
    %c7 = arith.constant 7 : index
    %c0_8 = arith.constant 0 : index
    %4 = vector.load %arg12[%c0_7, %c1, %c7, %c0_8] : memref<2x10x24x128xbf16, #tpu.memory_space<vmem>>, vector<2x8x1x128xbf16>
    tpu.vector_store %arg12[%c0_7, %c1, %c7, %c0_8], %3 {strides = array<i32>} : memref<2x10x24x128xbf16, #tpu.memory_space<vmem>>, vector<2x8x1x128xbf16>,
    %c0_9 = arith.constant 0 : index
    %c1_10 = arith.constant 1 : index
    %c16 = arith.constant 16 : index
    %c0_11 = arith.constant 0 : index
    %5 = vector.load %arg12[%c0_9, %c1_10, %c16, %c0_11] : memref<2x10x24x128xbf16, #tpu.memory_space<vmem>>, vector<2x8x1x128xbf16>
    tpu.vector_store %arg12[%c0_9, %c1_10, %c16, %c0_11], %3 {strides = array<i32>} : memref<2x10x24x128xbf16, #tpu.memory_space<vmem>>, vector<2x8x1x128xbf16>,
    %c0_12 = arith.constant 0 : index
    %c0_13 = arith.constant 0 : index
    %6 = vector.load %arg3[%c0_12, %c0_13] : memref<1x128xf32, #tpu.memory_space<vmem>>, vector<1x128xf32>
    %c0_14 = arith.constant 0 : index
    %c0_15 = arith.constant 0 : index
    %7 = vector.load %arg4[%c0_14, %c0_15] : memref<1x128xf32, #tpu.memory_space<vmem>>, vector<1x128xf32>
    %c0_16 = arith.constant 0 : index
    %c0_17 = arith.constant 0 : index
    %8 = vector.load %arg6[%c0_16, %c0_17] : memref<1x128xf32, #tpu.memory_space<vmem>>, vector<1x128xf32>
    %c0_18 = arith.constant 0 : index
    %c0_19 = arith.constant 0 : index
    %9 = vector.load %arg7[%c0_18, %c0_19] : memref<1x128xf32, #tpu.memory_space<vmem>>, vector<1x128xf32>
    %c0_20 = arith.constant 0 : index
    %c0_21 = arith.constant 0 : index
    %10 = vector.load %arg9[%c0_20, %c0_21] : memref<1x128xf32, #tpu.memory_space<vmem>>, vector<1x128xf32>
    %c0_22 = arith.constant 0 : index
    %c0_23 = arith.constant 0 : index
    %11 = vector.load %arg10[%c0_22, %c0_23] : memref<1x128xf32, #tpu.memory_space<vmem>>, vector<1x128xf32>
    %cst_24 = arith.constant 0.000000e+00 : f32
    %12 = vector.broadcast %cst_24 : f32 to vector<128x128xf32>
    %c0_25 = arith.constant 0 : index
    %c0_26 = arith.constant 0 : index
    %c0_27 = arith.constant 0 : index
    %c0_28 = arith.constant 0 : index
    %13 = vector.load %arg1[%c0_25, %c0_26, %c0_27, %c0_28] : memref<2x36x16x128xbf16, #tpu.memory_space<vmem>>, vector<1x8x16x128xbf16>
    %14 = vector.shape_cast %13 : vector<1x8x16x128xbf16> to vector<8x16x128xbf16>
    %c0_29 = arith.constant 0 : index
    %c9_30 = arith.constant 9 : index
    %c0_31 = arith.constant 0 : index
    %c0_32 = arith.constant 0 : index
    %15 = vector.load %arg1[%c0_29, %c9_30, %c0_31, %c0_32] : memref<2x36x16x128xbf16, #tpu.memory_space<vmem>>, vector<1x8x16x128xbf16>
    %16 = vector.shape_cast %15 : vector<1x8x16x128xbf16> to vector<8x16x128xbf16>
    %17 = vector.extract_strided_slice %14 {offsets = [0, 0, 0], sizes = [8, 8, 128], strides = [1, 1, 1]} : vector<8x16x128xbf16> to vector<8x8x128xbf16>
    %18 = vector.extract_strided_slice %16 {offsets = [0, 0, 0], sizes = [8, 8, 128], strides = [1, 1, 1]} : vector<8x16x128xbf16> to vector<8x8x128xbf16>
    %19 = vector.extract_strided_slice %14 {offsets = [0, 1, 0], sizes = [8, 8, 128], strides = [1, 1, 1]} : vector<8x16x128xbf16> to vector<8x8x128xbf16>
    %20 = tpu.concatenate %17, %18, %19 in 2 : vector<8x8x128xbf16>, vector<8x8x128xbf16>, vector<8x8x128xbf16> -> vector<8x8x384xbf16>
    %21 = vector.shape_cast %20 : vector<8x8x384xbf16> to vector<64x384xbf16>
    %c1_33 = arith.constant 1 : index
    %c0_34 = arith.constant 0 : index
    %c0_35 = arith.constant 0 : index
    %c0_36 = arith.constant 0 : index
    %22 = vector.load %arg1[%c1_33, %c0_34, %c0_35, %c0_36] : memref<2x36x16x128xbf16, #tpu.memory_space<vmem>>, vector<1x8x16x128xbf16>
    %23 = vector.shape_cast %22 : vector<1x8x16x128xbf16> to vector<8x16x128xbf16>
    %c1_37 = arith.constant 1 : index
    %c9_38 = arith.constant 9 : index
    %c0_39 = arith.constant 0 : index
    %c0_40 = arith.constant 0 : index
    %24 = vector.load %arg1[%c1_37, %c9_38, %c0_39, %c0_40] : memref<2x36x16x128xbf16, #tpu.memory_space<vmem>>, vector<1x8x16x128xbf16>
    %25 = vector.shape_cast %24 : vector<1x8x16x128xbf16> to vector<8x16x128xbf16>
    %26 = vector.extract_strided_slice %23 {offsets = [0, 0, 0], sizes = [8, 8, 128], strides = [1, 1, 1]} : vector<8x16x128xbf16> to vector<8x8x128xbf16>
    %27 = vector.extract_strided_slice %25 {offsets = [0, 0, 0], sizes = [8, 8, 128], strides = [1, 1, 1]} : vector<8x16x128xbf16> to vector<8x8x128xbf16>
    %28 = vector.extract_strided_slice %23 {offsets = [0, 1, 0], sizes = [8, 8, 128], strides = [1, 1, 1]} : vector<8x16x128xbf16> to vector<8x8x128xbf16>
    %29 = tpu.concatenate %26, %27, %28 in 2 : vector<8x8x128xbf16>, vector<8x8x128xbf16>, vector<8x8x128xbf16> -> vector<8x8x384xbf16>
    %30 = vector.shape_cast %29 : vector<8x8x384xbf16> to vector<64x384xbf16>
    %31 = tpu.concatenate %21, %30 in 0 : vector<64x384xbf16>, vector<64x384xbf16> -> vector<128x384xbf16>
    %c0_41 = arith.constant 0 : index
    %c0_42 = arith.constant 0 : index
    %c0_43 = arith.constant 0 : index
    %32 = vector.load %arg2[%c0_41, %c0_42, %c0_43] : memref<3x384x128xbf16, #tpu.memory_space<vmem>>, vector<1x384x128xbf16>
    %33 = vector.shape_cast %32 : vector<1x384x128xbf16> to vector<384x128xbf16>
    %cst_44 = arith.constant dense<0.000000e+00> : vector<128x128xf32>
    %34 = tpu.matmul %31, %33, %cst_44 {dimension_numbers = #tpu.dot_dimension_numbers<[1], [0], [0], [1], [0, 0, 1, 1], [], []>} : vector<128x384xbf16>, vector<384x128xbf16>, vector<128x128xf32> -> vector<128x128xf32>
    %35 = arith.addf %12, %34 : vector<128x128xf32>
    %c0_45 = arith.constant 0 : index
    %c18 = arith.constant 18 : index
    %c0_46 = arith.constant 0 : index
    %c0_47 = arith.constant 0 : index
    %36 = vector.load %arg1[%c0_45, %c18, %c0_46, %c0_47] : memref<2x36x16x128xbf16, #tpu.memory_space<vmem>>, vector<1x8x16x128xbf16>
    %37 = vector.shape_cast %36 : vector<1x8x16x128xbf16> to vector<8x16x128xbf16>
    %c0_48 = arith.constant 0 : index
    %c27 = arith.constant 27 : index
    %c0_49 = arith.constant 0 : index
    %c0_50 = arith.constant 0 : index
    %38 = vector.load %arg1[%c0_48, %c27, %c0_49, %c0_50] : memref<2x36x16x128xbf16, #tpu.memory_space<vmem>>, vector<1x8x16x128xbf16>
    %39 = vector.shape_cast %38 : vector<1x8x16x128xbf16> to vector<8x16x128xbf16>
    %40 = vector.extract_strided_slice %37 {offsets = [0, 0, 0], sizes = [8, 8, 128], strides = [1, 1, 1]} : vector<8x16x128xbf16> to vector<8x8x128xbf16>
    %41 = vector.extract_strided_slice %39 {offsets = [0, 0, 0], sizes = [8, 8, 128], strides = [1, 1, 1]} : vector<8x16x128xbf16> to vector<8x8x128xbf16>
    %42 = vector.extract_strided_slice %37 {offsets = [0, 1, 0], sizes = [8, 8, 128], strides = [1, 1, 1]} : vector<8x16x128xbf16> to vector<8x8x128xbf16>
    %43 = tpu.concatenate %40, %41, %42 in 2 : vector<8x8x128xbf16>, vector<8x8x128xbf16>, vector<8x8x128xbf16> -> vector<8x8x384xbf16>
    %44 = vector.shape_cast %43 : vector<8x8x384xbf16> to vector<64x384xbf16>
    %c1_51 = arith.constant 1 : index
    %c18_52 = arith.constant 18 : index
    %c0_53 = arith.constant 0 : index
    %c0_54 = arith.constant 0 : index
    %45 = vector.load %arg1[%c1_51, %c18_52, %c0_53, %c0_54] : memref<2x36x16x128xbf16, #tpu.memory_space<vmem>>, vector<1x8x16x128xbf16>
    %46 = vector.shape_cast %45 : vector<1x8x16x128xbf16> to vector<8x16x128xbf16>
    %c1_55 = arith.constant 1 : index
    %c27_56 = arith.constant 27 : index
    %c0_57 = arith.constant 0 : index
    %c0_58 = arith.constant 0 : index
    %47 = vector.load %arg1[%c1_55, %c27_56, %c0_57, %c0_58] : memref<2x36x16x128xbf16, #tpu.memory_space<vmem>>, vector<1x8x16x128xbf16>
    %48 = vector.shape_cast %47 : vector<1x8x16x128xbf16> to vector<8x16x128xbf16>
    %49 = vector.extract_strided_slice %46 {offsets = [0, 0, 0], sizes = [8, 8, 128], strides = [1, 1, 1]} : vector<8x16x128xbf16> to vector<8x8x128xbf16>
    %50 = vector.extract_strided_slice %48 {offsets = [0, 0, 0], sizes = [8, 8, 128], strides = [1, 1, 1]} : vector<8x16x128xbf16> to vector<8x8x128xbf16>
    %51 = vector.extract_strided_slice %46 {offsets = [0, 1, 0], sizes = [8, 8, 128], strides = [1, 1, 1]} : vector<8x16x128xbf16> to vector<8x8x128xbf16>
    %52 = tpu.concatenate %49, %50, %51 in 2 : vector<8x8x128xbf16>, vector<8x8x128xbf16>, vector<8x8x128xbf16> -> vector<8x8x384xbf16>
    %53 = vector.shape_cast %52 : vector<8x8x384xbf16> to vector<64x384xbf16>
    %54 = tpu.concatenate %44, %53 in 0 : vector<64x384xbf16>, vector<64x384xbf16> -> vector<128x384xbf16>
    %c1_59 = arith.constant 1 : index
    %c0_60 = arith.constant 0 : index
    %c0_61 = arith.constant 0 : index
    %55 = vector.load %arg2[%c1_59, %c0_60, %c0_61] : memref<3x384x128xbf16, #tpu.memory_space<vmem>>, vector<1x384x128xbf16>
    %56 = vector.shape_cast %55 : vector<1x384x128xbf16> to vector<384x128xbf16>
    %cst_62 = arith.constant dense<0.000000e+00> : vector<128x128xf32>
    %57 = tpu.matmul %54, %56, %cst_62 {dimension_numbers = #tpu.dot_dimension_numbers<[1], [0], [0], [1], [0, 0, 1, 1], [], []>} : vector<128x384xbf16>, vector<384x128xbf16>, vector<128x128xf32> -> vector<128x128xf32>
    %58 = arith.addf %35, %57 : vector<128x128xf32>
    %c0_63 = arith.constant 0 : index
    %c1_64 = arith.constant 1 : index
    %c0_65 = arith.constant 0 : index
    %c0_66 = arith.constant 0 : index
    %59 = vector.load %arg1[%c0_63, %c1_64, %c0_65, %c0_66] : memref<2x36x16x128xbf16, #tpu.memory_space<vmem>>, vector<1x8x16x128xbf16>
    %60 = vector.shape_cast %59 : vector<1x8x16x128xbf16> to vector<8x16x128xbf16>
    %c0_67 = arith.constant 0 : index
    %c10 = arith.constant 10 : index
    %c0_68 = arith.constant 0 : index
    %c0_69 = arith.constant 0 : index
    %61 = vector.load %arg1[%c0_67, %c10, %c0_68, %c0_69] : memref<2x36x16x128xbf16, #tpu.memory_space<vmem>>, vector<1x8x16x128xbf16>
    %62 = vector.shape_cast %61 : vector<1x8x16x128xbf16> to vector<8x16x128xbf16>
    %63 = vector.extract_strided_slice %60 {offsets = [0, 0, 0], sizes = [8, 8, 128], strides = [1, 1, 1]} : vector<8x16x128xbf16> to vector<8x8x128xbf16>
    %64 = vector.extract_strided_slice %62 {offsets = [0, 0, 0], sizes = [8, 8, 128], strides = [1, 1, 1]} : vector<8x16x128xbf16> to vector<8x8x128xbf16>
    %65 = vector.extract_strided_slice %60 {offsets = [0, 1, 0], sizes = [8, 8, 128], strides = [1, 1, 1]} : vector<8x16x128xbf16> to vector<8x8x128xbf16>
    %66 = tpu.concatenate %63, %64, %65 in 2 : vector<8x8x128xbf16>, vector<8x8x128xbf16>, vector<8x8x128xbf16> -> vector<8x8x384xbf16>
    %67 = vector.shape_cast %66 : vector<8x8x384xbf16> to vector<64x384xbf16>
    %c1_70 = arith.constant 1 : index
    %c1_71 = arith.constant 1 : index
    %c0_72 = arith.constant 0 : index
    %c0_73 = arith.constant 0 : index
    %68 = vector.load %arg1[%c1_70, %c1_71, %c0_72, %c0_73] : memref<2x36x16x128xbf16, #tpu.memory_space<vmem>>, vector<1x8x16x128xbf16>
    %69 = vector.shape_cast %68 : vector<1x8x16x128xbf16> to vector<8x16x128xbf16>
    %c1_74 = arith.constant 1 : index
    %c10_75 = arith.constant 10 : index
    %c0_76 = arith.constant 0 : index
    %c0_77 = arith.constant 0 : index
    %70 = vector.load %arg1[%c1_74, %c10_75, %c0_76, %c0_77] : memref<2x36x16x128xbf16, #tpu.memory_space<vmem>>, vector<1x8x16x128xbf16>
    %71 = vector.shape_cast %70 : vector<1x8x16x128xbf16> to vector<8x16x128xbf16>
    %72 = vector.extract_strided_slice %69 {offsets = [0, 0, 0], sizes = [8, 8, 128], strides = [1, 1, 1]} : vector<8x16x128xbf16> to vector<8x8x128xbf16>
    %73 = vector.extract_strided_slice %71 {offsets = [0, 0, 0], sizes = [8, 8, 128], strides = [1, 1, 1]} : vector<8x16x128xbf16> to vector<8x8x128xbf16>
    %74 = vector.extract_strided_slice %69 {offsets = [0, 1, 0], sizes = [8, 8, 128], strides = [1, 1, 1]} : vector<8x16x128xbf16> to vector<8x8x128xbf16>
    %75 = tpu.concatenate %72, %73, %74 in 2 : vector<8x8x128xbf16>, vector<8x8x128xbf16>, vector<8x8x128xbf16> -> vector<8x8x384xbf16>
    %76 = vector.shape_cast %75 : vector<8x8x384xbf16> to vector<64x384xbf16>
    %77 = tpu.concatenate %67, %76 in 0 : vector<64x384xbf16>, vector<64x384xbf16> -> vector<128x384xbf16>
    %c2 = arith.constant 2 : index
    %c0_78 = arith.constant 0 : index
    %c0_79 = arith.constant 0 : index
    %78 = vector.load %arg2[%c2, %c0_78, %c0_79] : memref<3x384x128xbf16, #tpu.memory_space<vmem>>, vector<1x384x128xbf16>
    %79 = vector.shape_cast %78 : vector<1x384x128xbf16> to vector<384x128xbf16>
    %cst_80 = arith.constant dense<0.000000e+00> : vector<128x128xf32>
    %80 = tpu.matmul %77, %79, %cst_80 {dimension_numbers = #tpu.dot_dimension_numbers<[1], [0], [0], [1], [0, 0, 1, 1], [], []>} : vector<128x384xbf16>, vector<384x128xbf16>, vector<128x128xf32> -> vector<128x128xf32>
    %81 = arith.addf %58, %80 : vector<128x128xf32>
    %82 = vector.broadcast %6 : vector<1x128xf32> to vector<128x128xf32>
    %83 = arith.mulf %81, %82 : vector<128x128xf32>
    %84 = vector.broadcast %7 : vector<1x128xf32> to vector<128x128xf32>
    %85 = arith.addf %83, %84 : vector<128x128xf32>
    %cst_81 = arith.constant 0.000000e+00 : f32
    %86 = vector.broadcast %cst_81 : f32 to vector<128x128xf32>
    %87 = arith.maximumf %85, %86 : vector<128x128xf32>
    %88 = vector.extract_strided_slice %87 {offsets = [0, 0], sizes = [64, 128], strides = [1, 1]} : vector<128x128xf32> to vector<64x128xf32>
    %89 = vector.shape_cast %88 : vector<64x128xf32> to vector<8x8x128xf32>
    %90 = arith.truncf %89 : vector<8x8x128xf32> to vector<8x8x128xbf16>
    %c0_82 = arith.constant 0 : index
    %c1_83 = arith.constant 1 : index
    %c8 = arith.constant 8 : index
    %c0_84 = arith.constant 0 : index
    %91 = vector.load %arg12[%c0_82, %c1_83, %c8, %c0_84] : memref<2x10x24x128xbf16, #tpu.memory_space<vmem>>, vector<1x8x8x128xbf16>
    %92 = vector.shape_cast %91 : vector<1x8x8x128xbf16> to vector<8x8x128xbf16>
    %93 = vector.shape_cast %90 : vector<8x8x128xbf16> to vector<1x8x8x128xbf16>
    tpu.vector_store %arg12[%c0_82, %c1_83, %c8, %c0_84], %93 {strides = array<i32>} : memref<2x10x24x128xbf16, #tpu.memory_space<vmem>>, vector<1x8x8x128xbf16>,
    %94 = vector.extract_strided_slice %87 {offsets = [64, 0], sizes = [64, 128], strides = [1, 1]} : vector<128x128xf32> to vector<64x128xf32>
    %95 = vector.shape_cast %94 : vector<64x128xf32> to vector<8x8x128xf32>
    %96 = arith.truncf %95 : vector<8x8x128xf32> to vector<8x8x128xbf16>
    %c1_85 = arith.constant 1 : index
    %c1_86 = arith.constant 1 : index
    %c8_87 = arith.constant 8 : index
    %c0_88 = arith.constant 0 : index
    %97 = vector.load %arg12[%c1_85, %c1_86, %c8_87, %c0_88] : memref<2x10x24x128xbf16, #tpu.memory_space<vmem>>, vector<1x8x8x128xbf16>
    %98 = vector.shape_cast %97 : vector<1x8x8x128xbf16> to vector<8x8x128xbf16>
    %99 = vector.shape_cast %96 : vector<8x8x128xbf16> to vector<1x8x8x128xbf16>
    tpu.vector_store %arg12[%c1_85, %c1_86, %c8_87, %c0_88], %99 {strides = array<i32>} : memref<2x10x24x128xbf16, #tpu.memory_space<vmem>>, vector<1x8x8x128xbf16>,
    %cst_89 = arith.constant 0.000000e+00 : f32
    %100 = vector.broadcast %cst_89 : f32 to vector<128x128xf32>
    %c0_90 = arith.constant 0 : index
    %c0_91 = arith.constant 0 : index
    %c0_92 = arith.constant 0 : index
    %c0_93 = arith.constant 0 : index
    %101 = vector.load %arg12[%c0_90, %c0_91, %c0_92, %c0_93] : memref<2x10x24x128xbf16, #tpu.memory_space<vmem>>, vector<1x8x24x128xbf16>
    %102 = vector.shape_cast %101 : vector<1x8x24x128xbf16> to vector<8x24x128xbf16>
    %103 = vector.extract_strided_slice %102 {offsets = [0, 7, 0], sizes = [8, 8, 128], strides = [1, 1, 1]} : vector<8x24x128xbf16> to vector<8x8x128xbf16>
    %104 = vector.extract_strided_slice %102 {offsets = [0, 8, 0], sizes = [8, 8, 128], strides = [1, 1, 1]} : vector<8x24x128xbf16> to vector<8x8x128xbf16>
    %105 = vector.extract_strided_slice %102 {offsets = [0, 9, 0], sizes = [8, 8, 128], strides = [1, 1, 1]} : vector<8x24x128xbf16> to vector<8x8x128xbf16>
    %106 = tpu.concatenate %103, %104, %105 in 2 : vector<8x8x128xbf16>, vector<8x8x128xbf16>, vector<8x8x128xbf16> -> vector<8x8x384xbf16>
    %107 = vector.shape_cast %106 : vector<8x8x384xbf16> to vector<64x384xbf16>
    %c1_94 = arith.constant 1 : index
    %c0_95 = arith.constant 0 : index
    %c0_96 = arith.constant 0 : index
    %c0_97 = arith.constant 0 : index
    %108 = vector.load %arg12[%c1_94, %c0_95, %c0_96, %c0_97] : memref<2x10x24x128xbf16, #tpu.memory_space<vmem>>, vector<1x8x24x128xbf16>
    %109 = vector.shape_cast %108 : vector<1x8x24x128xbf16> to vector<8x24x128xbf16>
    %110 = vector.extract_strided_slice %109 {offsets = [0, 7, 0], sizes = [8, 8, 128], strides = [1, 1, 1]} : vector<8x24x128xbf16> to vector<8x8x128xbf16>
    %111 = vector.extract_strided_slice %109 {offsets = [0, 8, 0], sizes = [8, 8, 128], strides = [1, 1, 1]} : vector<8x24x128xbf16> to vector<8x8x128xbf16>
    %112 = vector.extract_strided_slice %109 {offsets = [0, 9, 0], sizes = [8, 8, 128], strides = [1, 1, 1]} : vector<8x24x128xbf16> to vector<8x8x128xbf16>
    %113 = tpu.concatenate %110, %111, %112 in 2 : vector<8x8x128xbf16>, vector<8x8x128xbf16>, vector<8x8x128xbf16> -> vector<8x8x384xbf16>
    %114 = vector.shape_cast %113 : vector<8x8x384xbf16> to vector<64x384xbf16>
    %115 = tpu.concatenate %107, %114 in 0 : vector<64x384xbf16>, vector<64x384xbf16> -> vector<128x384xbf16>
    %c0_98 = arith.constant 0 : index
    %c0_99 = arith.constant 0 : index
    %c0_100 = arith.constant 0 : index
    %116 = vector.load %arg5[%c0_98, %c0_99, %c0_100] : memref<3x384x128xbf16, #tpu.memory_space<vmem>>, vector<1x384x128xbf16>
    %117 = vector.shape_cast %116 : vector<1x384x128xbf16> to vector<384x128xbf16>
    %cst_101 = arith.constant dense<0.000000e+00> : vector<128x128xf32>
    %118 = tpu.matmul %115, %117, %cst_101 {dimension_numbers = #tpu.dot_dimension_numbers<[1], [0], [0], [1], [0, 0, 1, 1], [], []>} : vector<128x384xbf16>, vector<384x128xbf16>, vector<128x128xf32> -> vector<128x128xf32>
    %119 = arith.addf %100, %118 : vector<128x128xf32>
    %c0_102 = arith.constant 0 : index
    %c1_103 = arith.constant 1 : index
    %c0_104 = arith.constant 0 : index
    %c0_105 = arith.constant 0 : index
    %120 = vector.load %arg12[%c0_102, %c1_103, %c0_104, %c0_105] : memref<2x10x24x128xbf16, #tpu.memory_space<vmem>>, vector<1x8x24x128xbf16>
    %121 = vector.shape_cast %120 : vector<1x8x24x128xbf16> to vector<8x24x128xbf16>
    %122 = vector.extract_strided_slice %121 {offsets = [0, 7, 0], sizes = [8, 8, 128], strides = [1, 1, 1]} : vector<8x24x128xbf16> to vector<8x8x128xbf16>
    %123 = vector.extract_strided_slice %121 {offsets = [0, 8, 0], sizes = [8, 8, 128], strides = [1, 1, 1]} : vector<8x24x128xbf16> to vector<8x8x128xbf16>
    %124 = vector.extract_strided_slice %121 {offsets = [0, 9, 0], sizes = [8, 8, 128], strides = [1, 1, 1]} : vector<8x24x128xbf16> to vector<8x8x128xbf16>
    %125 = tpu.concatenate %122, %123, %124 in 2 : vector<8x8x128xbf16>, vector<8x8x128xbf16>, vector<8x8x128xbf16> -> vector<8x8x384xbf16>
    %126 = vector.shape_cast %125 : vector<8x8x384xbf16> to vector<64x384xbf16>
    %c1_106 = arith.constant 1 : index
    %c1_107 = arith.constant 1 : index
    %c0_108 = arith.constant 0 : index
    %c0_109 = arith.constant 0 : index
    %127 = vector.load %arg12[%c1_106, %c1_107, %c0_108, %c0_109] : memref<2x10x24x128xbf16, #tpu.memory_space<vmem>>, vector<1x8x24x128xbf16>
    %128 = vector.shape_cast %127 : vector<1x8x24x128xbf16> to vector<8x24x128xbf16>
    %129 = vector.extract_strided_slice %128 {offsets = [0, 7, 0], sizes = [8, 8, 128], strides = [1, 1, 1]} : vector<8x24x128xbf16> to vector<8x8x128xbf16>
    %130 = vector.extract_strided_slice %128 {offsets = [0, 8, 0], sizes = [8, 8, 128], strides = [1, 1, 1]} : vector<8x24x128xbf16> to vector<8x8x128xbf16>
    %131 = vector.extract_strided_slice %128 {offsets = [0, 9, 0], sizes = [8, 8, 128], strides = [1, 1, 1]} : vector<8x24x128xbf16> to vector<8x8x128xbf16>
    %132 = tpu.concatenate %129, %130, %131 in 2 : vector<8x8x128xbf16>, vector<8x8x128xbf16>, vector<8x8x128xbf16> -> vector<8x8x384xbf16>
    %133 = vector.shape_cast %132 : vector<8x8x384xbf16> to vector<64x384xbf16>
    %134 = tpu.concatenate %126, %133 in 0 : vector<64x384xbf16>, vector<64x384xbf16> -> vector<128x384xbf16>
    %c1_110 = arith.constant 1 : index
    %c0_111 = arith.constant 0 : index
    %c0_112 = arith.constant 0 : index
    %135 = vector.load %arg5[%c1_110, %c0_111, %c0_112] : memref<3x384x128xbf16, #tpu.memory_space<vmem>>, vector<1x384x128xbf16>
    %136 = vector.shape_cast %135 : vector<1x384x128xbf16> to vector<384x128xbf16>
    %cst_113 = arith.constant dense<0.000000e+00> : vector<128x128xf32>
    %137 = tpu.matmul %134, %136, %cst_113 {dimension_numbers = #tpu.dot_dimension_numbers<[1], [0], [0], [1], [0, 0, 1, 1], [], []>} : vector<128x384xbf16>, vector<384x128xbf16>, vector<128x128xf32> -> vector<128x128xf32>
    %138 = arith.addf %119, %137 : vector<128x128xf32>
    %c0_114 = arith.constant 0 : index
    %c2_115 = arith.constant 2 : index
    %c0_116 = arith.constant 0 : index
    %c0_117 = arith.constant 0 : index
    %139 = vector.load %arg12[%c0_114, %c2_115, %c0_116, %c0_117] : memref<2x10x24x128xbf16, #tpu.memory_space<vmem>>, vector<1x8x24x128xbf16>
    %140 = vector.shape_cast %139 : vector<1x8x24x128xbf16> to vector<8x24x128xbf16>
    %141 = vector.extract_strided_slice %140 {offsets = [0, 7, 0], sizes = [8, 8, 128], strides = [1, 1, 1]} : vector<8x24x128xbf16> to vector<8x8x128xbf16>
    %142 = vector.extract_strided_slice %140 {offsets = [0, 8, 0], sizes = [8, 8, 128], strides = [1, 1, 1]} : vector<8x24x128xbf16> to vector<8x8x128xbf16>
    %143 = vector.extract_strided_slice %140 {offsets = [0, 9, 0], sizes = [8, 8, 128], strides = [1, 1, 1]} : vector<8x24x128xbf16> to vector<8x8x128xbf16>
    %144 = tpu.concatenate %141, %142, %143 in 2 : vector<8x8x128xbf16>, vector<8x8x128xbf16>, vector<8x8x128xbf16> -> vector<8x8x384xbf16>
    %145 = vector.shape_cast %144 : vector<8x8x384xbf16> to vector<64x384xbf16>
    %c1_118 = arith.constant 1 : index
    %c2_119 = arith.constant 2 : index
    %c0_120 = arith.constant 0 : index
    %c0_121 = arith.constant 0 : index
    %146 = vector.load %arg12[%c1_118, %c2_119, %c0_120, %c0_121] : memref<2x10x24x128xbf16, #tpu.memory_space<vmem>>, vector<1x8x24x128xbf16>
    %147 = vector.shape_cast %146 : vector<1x8x24x128xbf16> to vector<8x24x128xbf16>
    %148 = vector.extract_strided_slice %147 {offsets = [0, 7, 0], sizes = [8, 8, 128], strides = [1, 1, 1]} : vector<8x24x128xbf16> to vector<8x8x128xbf16>
    %149 = vector.extract_strided_slice %147 {offsets = [0, 8, 0], sizes = [8, 8, 128], strides = [1, 1, 1]} : vector<8x24x128xbf16> to vector<8x8x128xbf16>
    %150 = vector.extract_strided_slice %147 {offsets = [0, 9, 0], sizes = [8, 8, 128], strides = [1, 1, 1]} : vector<8x24x128xbf16> to vector<8x8x128xbf16>
    %151 = tpu.concatenate %148, %149, %150 in 2 : vector<8x8x128xbf16>, vector<8x8x128xbf16>, vector<8x8x128xbf16> -> vector<8x8x384xbf16>
    %152 = vector.shape_cast %151 : vector<8x8x384xbf16> to vector<64x384xbf16>
    %153 = tpu.concatenate %145, %152 in 0 : vector<64x384xbf16>, vector<64x384xbf16> -> vector<128x384xbf16>
    %c2_122 = arith.constant 2 : index
    %c0_123 = arith.constant 0 : index
    %c0_124 = arith.constant 0 : index
    %154 = vector.load %arg5[%c2_122, %c0_123, %c0_124] : memref<3x384x128xbf16, #tpu.memory_space<vmem>>, vector<1x384x128xbf16>
    %155 = vector.shape_cast %154 : vector<1x384x128xbf16> to vector<384x128xbf16>
    %cst_125 = arith.constant dense<0.000000e+00> : vector<128x128xf32>
    %156 = tpu.matmul %153, %155, %cst_125 {dimension_numbers = #tpu.dot_dimension_numbers<[1], [0], [0], [1], [0, 0, 1, 1], [], []>} : vector<128x384xbf16>, vector<384x128xbf16>, vector<128x128xf32> -> vector<128x128xf32>
    %157 = arith.addf %138, %156 : vector<128x128xf32>
    %158 = vector.broadcast %8 : vector<1x128xf32> to vector<128x128xf32>
    %159 = arith.mulf %157, %158 : vector<128x128xf32>
    %160 = vector.broadcast %9 : vector<1x128xf32> to vector<128x128xf32>
    %161 = arith.addf %159, %160 : vector<128x128xf32>
    %c0_126 = arith.constant 0 : index
    %c27_127 = arith.constant 27 : index
    %c0_128 = arith.constant 0 : index
    %c0_129 = arith.constant 0 : index
    %162 = vector.load %arg1[%c0_126, %c27_127, %c0_128, %c0_129] : memref<2x36x16x128xbf16, #tpu.memory_space<vmem>>, vector<1x8x8x128xbf16>
    %163 = vector.shape_cast %162 : vector<1x8x8x128xbf16> to vector<8x8x128xbf16>
    %164 = vector.shape_cast %163 : vector<8x8x128xbf16> to vector<64x128xbf16>
    %c1_130 = arith.constant 1 : index
    %c27_131 = arith.constant 27 : index
    %c0_132 = arith.constant 0 : index
    %c0_133 = arith.constant 0 : index
    %165 = vector.load %arg1[%c1_130, %c27_131, %c0_132, %c0_133] : memref<2x36x16x128xbf16, #tpu.memory_space<vmem>>, vector<1x8x8x128xbf16>
    %166 = vector.shape_cast %165 : vector<1x8x8x128xbf16> to vector<8x8x128xbf16>
    %167 = vector.shape_cast %166 : vector<8x8x128xbf16> to vector<64x128xbf16>
    %168 = tpu.concatenate %164, %167 in 0 : vector<64x128xbf16>, vector<64x128xbf16> -> vector<128x128xbf16>
    %c0_134 = arith.constant 0 : index
    %c0_135 = arith.constant 0 : index
    %169 = vector.load %arg8[%c0_134, %c0_135] : memref<128x128xbf16, #tpu.memory_space<vmem>>, vector<128x128xbf16>
    %cst_136 = arith.constant dense<0.000000e+00> : vector<128x128xf32>
    %170 = tpu.matmul %168, %169, %cst_136 {dimension_numbers = #tpu.dot_dimension_numbers<[1], [0], [0], [1], [0, 0, 1, 1], [], []>} : vector<128x128xbf16>, vector<128x128xbf16>, vector<128x128xf32> -> vector<128x128xf32>
    %171 = vector.broadcast %10 : vector<1x128xf32> to vector<128x128xf32>
    %172 = arith.mulf %170, %171 : vector<128x128xf32>
    %173 = vector.broadcast %11 : vector<1x128xf32> to vector<128x128xf32>
    %174 = arith.addf %172, %173 : vector<128x128xf32>
    %175 = arith.addf %161, %174 : vector<128x128xf32>
    %cst_137 = arith.constant 0.000000e+00 : f32
    %176 = vector.broadcast %cst_137 : f32 to vector<128x128xf32>
    %177 = arith.maximumf %175, %176 : vector<128x128xf32>
    %178 = vector.extract_strided_slice %177 {offsets = [0, 0], sizes = [64, 128], strides = [1, 1]} : vector<128x128xf32> to vector<64x128xf32>
    %179 = vector.shape_cast %178 : vector<64x128xf32> to vector<8x8x128xf32>
    %180 = arith.truncf %179 : vector<8x8x128xf32> to vector<8x8x128xbf16>
    %c0_138 = arith.constant 0 : index
    %c0_139 = arith.constant 0 : index
    %c0_140 = arith.constant 0 : index
    %c0_141 = arith.constant 0 : index
    %181 = vector.load %arg11[%c0_138, %c0_139, %c0_140, %c0_141] : memref<2x8x8x128xbf16, #tpu.memory_space<vmem>>, vector<1x8x8x128xbf16>
    %182 = vector.shape_cast %181 : vector<1x8x8x128xbf16> to vector<8x8x128xbf16>
    %183 = vector.shape_cast %180 : vector<8x8x128xbf16> to vector<1x8x8x128xbf16>
    tpu.vector_store %arg11[%c0_138, %c0_139, %c0_140, %c0_141], %183 {strides = array<i32>} : memref<2x8x8x128xbf16, #tpu.memory_space<vmem>>, vector<1x8x8x128xbf16>,
    %184 = vector.extract_strided_slice %177 {offsets = [64, 0], sizes = [64, 128], strides = [1, 1]} : vector<128x128xf32> to vector<64x128xf32>
    %185 = vector.shape_cast %184 : vector<64x128xf32> to vector<8x8x128xf32>
    %186 = arith.truncf %185 : vector<8x8x128xf32> to vector<8x8x128xbf16>
    %c1_142 = arith.constant 1 : index
    %c0_143 = arith.constant 0 : index
    %c0_144 = arith.constant 0 : index
    %c0_145 = arith.constant 0 : index
    %187 = vector.load %arg11[%c1_142, %c0_143, %c0_144, %c0_145] : memref<2x8x8x128xbf16, #tpu.memory_space<vmem>>, vector<1x8x8x128xbf16>
    %188 = vector.shape_cast %187 : vector<1x8x8x128xbf16> to vector<8x8x128xbf16>
    %189 = vector.shape_cast %186 : vector<8x8x128xbf16> to vector<1x8x8x128xbf16>
    tpu.vector_store %arg11[%c1_142, %c0_143, %c0_144, %c0_145], %189 {strides = array<i32>} : memref<2x8x8x128xbf16, #tpu.memory_space<vmem>>, vector<1x8x8x128xbf16>,
    return
  }
  func.func @transform_0(%arg0: i32) -> (i32, i32, i32, i32) {
    %c0_i32 = arith.constant 0 : i32
    %c0_i32_0 = arith.constant 0 : i32
    %c0_i32_1 = arith.constant 0 : i32
    %c0_i32_2 = arith.constant 0 : i32
    return %arg0, %c0_i32, %c0_i32_0, %c0_i32_1 : i32, i32, i32, i32
  }
  func.func @transform_1(%arg0: i32) -> (i32, i32, i32) {
    %c0_i32 = arith.constant 0 : i32
    %c0_i32_0 = arith.constant 0 : i32
    %c0_i32_1 = arith.constant 0 : i32
    %c0_i32_2 = arith.constant 0 : i32
    return %c0_i32, %c0_i32_0, %c0_i32_1 : i32, i32, i32
  }
  func.func @transform_2(%arg0: i32) -> (i32, i32) {
    %c0_i32 = arith.constant 0 : i32
    %c0_i32_0 = arith.constant 0 : i32
    %c0_i32_1 = arith.constant 0 : i32
    return %c0_i32, %c0_i32_0 : i32, i32
  }
  func.func @transform_3(%arg0: i32) -> (i32, i32) {
    %c0_i32 = arith.constant 0 : i32
    %c0_i32_0 = arith.constant 0 : i32
    %c0_i32_1 = arith.constant 0 : i32
    return %c0_i32, %c0_i32_0 : i32, i32
  }
  func.func @transform_4(%arg0: i32) -> (i32, i32, i32) {
    %c0_i32 = arith.constant 0 : i32
    %c0_i32_0 = arith.constant 0 : i32
    %c0_i32_1 = arith.constant 0 : i32
    %c0_i32_2 = arith.constant 0 : i32
    return %c0_i32, %c0_i32_0, %c0_i32_1 : i32, i32, i32
  }
  func.func @transform_5(%arg0: i32) -> (i32, i32) {
    %c0_i32 = arith.constant 0 : i32
    %c0_i32_0 = arith.constant 0 : i32
    %c0_i32_1 = arith.constant 0 : i32
    return %c0_i32, %c0_i32_0 : i32, i32
  }
  func.func @transform_6(%arg0: i32) -> (i32, i32) {
    %c0_i32 = arith.constant 0 : i32
    %c0_i32_0 = arith.constant 0 : i32
    %c0_i32_1 = arith.constant 0 : i32
    return %c0_i32, %c0_i32_0 : i32, i32
  }
  func.func @transform_7(%arg0: i32) -> (i32, i32) {
    %c0_i32 = arith.constant 0 : i32
    %c0_i32_0 = arith.constant 0 : i32
    %c0_i32_1 = arith.constant 0 : i32
    return %c0_i32, %c0_i32_0 : i32, i32
  }
  func.func @transform_8(%arg0: i32) -> (i32, i32) {
    %c0_i32 = arith.constant 0 : i32
    %c0_i32_0 = arith.constant 0 : i32
    %c0_i32_1 = arith.constant 0 : i32
    return %c0_i32, %c0_i32_0 : i32, i32
  }
  func.func @transform_9(%arg0: i32) -> (i32, i32) {
    %c0_i32 = arith.constant 0 : i32
    %c0_i32_0 = arith.constant 0 : i32
    %c0_i32_1 = arith.constant 0 : i32
    return %c0_i32, %c0_i32_0 : i32, i32
  }
  func.func @transform_10(%arg0: i32) -> (i32, i32, i32, i32) {
    %c0_i32 = arith.constant 0 : i32
    %c0_i32_0 = arith.constant 0 : i32
    %c0_i32_1 = arith.constant 0 : i32
    %c0_i32_2 = arith.constant 0 : i32
    return %arg0, %c0_i32, %c0_i32_0, %c0_i32_1 : i32, i32, i32, i32
  }
}

</mosaic_0001>

<bundles_post_ra>
// kernel: resblock_down_forward.1
= control target key start
LH: loop header
LB: loop body
LE: loop exit
PB: predicated region body
PF: predicated region fallthrough
CT: control target
= control target key end

     0   :  { %vm101_vm0 = vcmask 1040384   ;;  %vm102_vm1 = vsmask.f32 256  ;;  %vm50_vm3 = vcmask 1043459   ;;  %vm51_vm4 = vsmask.f32 7950  ;;  %s11552_s1 = inlined_call_operand.vmem [shape: bf16[3,384,128], index: 1, kind: input, shape index: {}]   ;;  %s11553_s0 = inlined_call_operand.vmem [shape: bf16[2,36,16,128], index: 0, kind: input, shape index: {}]   ;;  %s11554_s4 = inlined_call_operand.vmem [shape: bf16[3,384,128], index: 4, kind: input, shape index: {}]   ;;  %s11555_s2 = inlined_call_operand.vmem [shape: f32[1,128], index: 2, kind: input, shape index: {}]   ;;  %s11556_s3 = inlined_call_operand.vmem [shape: f32[1,128], index: 3, kind: input, shape index: {}]   ;;  %s11557_s7 = inlined_call_operand.vmem [shape: bf16[128,128], index: 7, kind: input, shape index: {}]   ;;  %s11558_s8 = inlined_call_operand.vmem [shape: f32[1,128], index: 8, kind: input, shape index: {}]   ;;  %s11559_s5 = inlined_call_operand.vmem [shape: f32[1,128], index: 5, kind: input, shape index: {}]   ;;  %s11560_s9 = inlined_call_operand.vmem [shape: f32[1,128], index: 9, kind: input, shape index: {}]   ;;  %s11561_s6 = inlined_call_operand.vmem [shape: f32[1,128], index: 6, kind: input, shape index: {}]   ;;  %s11562_s10 = inlined_call_operand.vmem [shape: bf16[2,8,8,128], index: 10, kind: output, shape index: {}]  }
   0x1   :  { %v8951_v0 = vld [vmem:[%s11552_s1 + $0x100] sm:$0xff]   ;;  %v8954_v3 = vld [vmem:[%s11552_s1 + $0x108] sm:$0xff]   ;;  %v8957_v6 = vld [vmem:[%s11552_s1 + $0x110] sm:$0xff]   ;;  %vm2670_vm6 = vsmask.f32 4368  ;;  %vm7325_vm8 = vcmask 1043456 }
   0x2   :  { %v8952_v1 = vld [vmem:[%s11552_s1 + $0x140] sm:$0xff]   ;;  %8070 = vmatprep.subr.bf16.mxu0 %v8951_v0  ;;  %v8955_v4 = vld [vmem:[%s11552_s1 + $0x148] sm:$0xff]   ;;  %v8958_v7 = vld [vmem:[%s11552_s1 + $0x150] sm:$0xff]  }
   0x3   :  { %v8953_v2 = vld [vmem:[%s11552_s1 + $0xc0] sm:$0xff]   ;;  %8566 = vmatprep.subr.bf16.mxu1 %v8952_v1  ;;  %v8956_v5 = vld [vmem:[%s11552_s1 + $0xc8] sm:$0xff]   ;;  %v8959_v8 = vld [vmem:[%s11552_s1 + $0xd0] sm:$0xff]  }
   0x4   :  { %8071 = vmatpush3.bf16.msra.mxu0 %v8953_v2  ;;  %8567 = vmatpush3.bf16.msra.mxu1 %v8952_v1  ;;  %v8960_v9 = vld [vmem:[%s11552_s1 + $0x118] sm:$0xff]   ;;  %v8963_v12 = vld [vmem:[%s11552_s1 + $0x120] sm:$0xff]   ;;  %v8966_v15 = vld [vmem:[%s11552_s1 + $0x128] sm:$0xff]  }
   0x5   :  { %8072 = vmatprep.subr.bf16.mxu0 %v8954_v3  ;;  %8568 = vmatprep.subr.bf16.mxu1 %v8955_v4  ;;  %v8961_v10 = vld [vmem:[%s11552_s1 + $0x158] sm:$0xff]   ;;  %v8964_v13 = vld [vmem:[%s11552_s1 + $0x160] sm:$0xff]   ;;  %v8967_v16 = vld [vmem:[%s11552_s1 + $0x168] sm:$0xff]  }
   0x6   :  { %v8962_v11 = vld [vmem:[%s11552_s1 + $0xd8] sm:$0xff]   ;;  %v8965_v14 = vld [vmem:[%s11552_s1 + $0xe0] sm:$0xff]   ;;  %v8968_v17 = vld [vmem:[%s11552_s1 + $0xe8] sm:$0xff]  }
   0x7   :  { %v8969_v18 = vld [vmem:[%s11552_s1 + $0x130] sm:$0xff]   ;;  %v8972_v21 = vld [vmem:[%s11552_s1 + $0x138] sm:$0xff]   ;;  %v9458_v29 = vld [vmem:[%s11553_s0 + $0xa0] sm:$0xf] }
   0x8   :  { %8073 = vmatpush3.bf16.msra.mxu0 %v8956_v5  ;;  %8569 = vmatpush3.bf16.msra.mxu1 %v8955_v4  ;;  %v8970_v19 = vld [vmem:[%s11552_s1 + $0x170] sm:$0xff]   ;;  %v8973_v22 = vld [vmem:[%s11552_s1 + $0x178] sm:$0xff]   ;;  %v6966_v30 = vld [vmem:[%s11553_s0 + $0xa4] sm:$0xf] }
   0x9   :  { %8074 = vmatprep.subr.bf16.mxu0 %v8957_v6  ;;  %8570 = vmatprep.subr.bf16.mxu1 %v8958_v7  ;;  %v8971_v20 = vld [vmem:[%s11552_s1 + $0xf0] sm:$0xff]   ;;  %v8975_v23 = vld [vmem:[%s11553_s0 + $0xd8] ss:$8 sps:$4 sm:$0xff]   ;;  %v6964_v27 = vld [vmem:[%s11553_s0 + $0x9c] sm:$0xf]  ;;  %v6987_v34 = vcombine.low %v9458_v29, %v6966_v30 }
   0xa   :  { %v6961_v24 = vld [vmem:[%s11553_s0 + $0x90] sm:$0xf]  ;;  %v6962_v25 = vld [vmem:[%s11553_s0 + $0x94] sm:$0xf]  ;;  %v6963_v26 = vld [vmem:[%s11553_s0 + $0x98] sm:$0xf]  ;;  %1110 = vmatprep.mubr.bf16.mxu0 %v8975_v23 }
   0xb   :  { %v6985_v28 = vcombine.low %v6961_v24, %v6962_v25  ;;  %v6986_v31 = vcombine.low %v6963_v26, %v6964_v27  ;;  %v9466_v32 = vld [vmem:[%s11553_s0 + $0xa8] sm:$0xf]  ;;  %v6968_v33 = vld [vmem:[%s11553_s0 + $0xac] sm:$0xf]  ;;  %v8974_v35 = vld [vmem:[%s11552_s1 + $0xf8] sm:$0xff]   ;;  %v626_v42 = vshrl.u32 %v6987_v34, 16  ;;  %v7025_v48 = vcombine.low %v6961_v24, %v6963_v26 }
   0xc   :  { %8075 = vmatpush3.bf16.msra.mxu0 %v8959_v8  ;;  %8571 = vmatpush3.bf16.msra.mxu1 %v8958_v7  ;;  %v6988_v38 = vcombine.low %v9466_v32, %v6968_v33  ;;  %v8981_v39 = vld [vmem:[%s11552_s1 + $0x40] sm:$0xff]   ;;  %v628_v43 = vshll.u32 %v6987_v34, 16  ;;  %v8985_v55 = vld [vmem:[%s11553_s0 + $0xe8] ss:$8 sps:$4 sm:$0xff]   ;;  %v6970_v59 = vld [vmem:[%s11553_s0 + $0xb4] sm:$0xf] }
   0xd   :  { %8076 = vmatprep.subr.bf16.mxu0 %v8960_v9  ;;  %8572 = vmatprep.subr.bf16.mxu1 %v8961_v10  ;;  %v612_v36 = vshrl.u32 %v6985_v28, 16  ;;  %v614_v37 = vshll.u32 %v6985_v28, 16  ;;  %v619_v40 = vshrl.u32 %v6986_v31, 16  ;;  %v621_v41 = vshll.u32 %v6986_v31, 16  ;;  %v8982_v54 = vld [vmem:[%s11552_s1] sm:$0xff]   ;;  %v8983_v57 = vld [vmem:[%s11552_s1 + $0x48] sm:$0xff]   ;;  %vm10220_vm2 = vmand %vm101_vm0, %vm102_vm1 }
   0xe   :  { %v633_v45 = vshrl.u32 %v6988_v38, 16  ;;  %v635_v46 = vshll.u32 %v6988_v38, 16  ;;  %v630_v49 = vrot.slane %v628_v43, 1  ;;  %v9491_v58 = vld [vmem:[%s11553_s0 + $0xb0] sm:$0xf]  ;;  %v8984_v7 = vld [vmem:[%s11552_s1 + $0x8] sm:$0xff]   ;;  %vm10275_vm5 = vmand %vm50_vm3, %vm51_vm4 }
   0xf   :  { %v616_v44 = vrot.slane %v614_v37, 1  ;;  %v623_v47 = vrot.slane %v621_v41, 1  ;;  %v9499_v60 = vld [vmem:[%s11553_s0 + $0xb8] sm:$0xf]  ;;  %v6972_v62 = vld [vmem:[%s11553_s0 + $0xbc] sm:$0xf]  ;;  %v6989_v63 = vcombine.low %v9491_v58, %v6970_v59  ;;  %vm10476_vm7 = vmor %vm102_vm1, %vm2670_vm6 }
  0x10   :  { %8077 = vmatpush3.bf16.msra.mxu0 %v8962_v11  ;;  %8573 = vmatpush3.bf16.msra.mxu1 %v8961_v10  ;;  %v637_v51 = vrot.slane %v635_v46, 1  ;;  %v631_v53 = vor.u32 %v630_v49, %v626_v42  ;;  %v9508_v0 = vld [vmem:[%s11553_s0 + $0xc0] sm:$0xf]  ;;  %v6974_v1 = vld [vmem:[%s11553_s0 + $0xc4] sm:$0xf]  ;;  %v6990_v3 = vcombine.low %v9499_v60, %v6972_v62  ;;  %v8992_v26 = vld [vmem:[%s11552_s1 + $0x10] sm:$0xff]   ;;  %v7031_v46 = vcombine.low %v9491_v58, %v9499_v60 }
  0x11   :  { %8078 = vmatprep.subr.bf16.mxu0 %v8963_v12  ;;  %8574 = vmatprep.subr.bf16.mxu1 %v8964_v13  ;;  %v617_v50 = vor.u32 %v616_v44, %v612_v36  ;;  %v624_v52 = vor.u32 %v623_v47, %v619_v40  ;;  %v9517_v4 = vld [vmem:[%s11553_s0 + $0xc8] sm:$0xf]  ;;  %v6976_v5 = vld [vmem:[%s11553_s0 + $0xcc] sm:$0xf]  ;;  %v6991_v6 = vcombine.low %v9508_v0, %v6974_v1  ;;  %v640_v8 = vshrl.u32 %v6989_v63, 16  ;;  %v8994_v43 = vld [vmem:[%s11552_s1 + $0x18] sm:$0xff]  }
  0x12   :  { %v638_v56 = vor.u32 %v637_v51, %v633_v45  ;;  %v642_v9 = vshll.u32 %v6989_v63, 16  ;;  %v6992_v10 = vcombine.low %v9517_v4, %v6976_v5  ;;  %v647_v11 = vshrl.u32 %v6990_v3, 16  ;;  %v8995_v27 = vld [vmem:[%s11553_s0 + $0xf8] ss:$8 sps:$4 sm:$0xff]   ;;  %v9544_v30 = vld [vmem:[%s11553_s0 + $0x1b0] sm:$0xf] }
  0x13   :  { %v7027_v61 = vcombine.low %v617_v50, %v624_v52  ;;  %v649_v12 = vshll.u32 %v6990_v3, 16  ;;  %v6994_v31 = vld [vmem:[%s11553_s0 + $0x1b4] sm:$0xf]  ;;  %v6996_v34 = vld [vmem:[%s11553_s0 + $0x1bc] sm:$0xf]  ;;  %v9002_v62 = vld [vmem:[%s11552_s1 + $0x20] sm:$0xff]  }
  0x14   :  { %8079 = vmatpush3.bf16.msra.mxu0 %v8965_v14  ;;  %8575 = vmatpush3.bf16.msra.mxu1 %v8964_v13  ;;  %v7030_v2 = vcombine.low %v631_v53, %v638_v56  ;;  %v654_v13 = vshrl.u32 %v6991_v6, 16  ;;  %v656_v14 = vshll.u32 %v6991_v6, 16  ;;  %v9561_v36 = vld [vmem:[%s11553_s0 + $0x1c0] sm:$0xf]  ;;  %v6998_v37 = vld [vmem:[%s11553_s0 + $0x1c4] sm:$0xf] }
  0x15   :  { %8080 = vmatprep.subr.bf16.mxu0 %v8966_v15  ;;  %8576 = vmatprep.subr.bf16.mxu1 %v8967_v16  ;;  %v644_v15 = vrot.slane %v642_v9, 1  ;;  %v9570_v40 = vld [vmem:[%s11553_s0 + $0x1c8] sm:$0xf]  ;;  %v7000_v41 = vld [vmem:[%s11553_s0 + $0x1cc] sm:$0xf]  ;;  %v7019_v42 = vcombine.low %v9561_v36, %v6998_v37  ;;  %v9012_v37 = vld [vmem:[%s11552_s1 + $0x30] sm:$0xff]  }
  0x16   :  { %8582 = vmatprep.mubr.bf16.mxu1 %v7027_v61  ;;  %v7020_v47 = vcombine.low %v9570_v40, %v7000_v41  ;;  %v9005_v63 = vld [vmem:[%s11553_s0 + $0x108] ss:$8 sps:$4 sm:$0xff]   ;;  %v7002_v5 = vld [vmem:[%s11553_s0 + $0x1d4] sm:$0xf]  ;;  %v9605_v6 = vld [vmem:[%s11553_s0 + $0x1d8] sm:$0xf] }
  0x17   :  { %v772_v50 = vshrl.u32 %v7019_v42, 16  ;;  %v774_v51 = vshll.u32 %v7019_v42, 16  ;;  %v9597_v3 = vld [vmem:[%s11553_s0 + $0x1d0] sm:$0xf]  ;;  %v9013_v41 = vld [vmem:[%s11552_s1 + $0x78] sm:$0xff]  }
  0x18   :  { %8081 = vmatpush3.bf16.msra.mxu0 %v8968_v17  ;;  %8577 = vmatpush3.bf16.msra.mxu1 %v8967_v16  ;;  %v7028_v16 = vcombine.low %v9458_v29, %v9466_v32  ;;  %v661_v17 = vshrl.u32 %v6992_v10, 16  ;;  %v8993_v29 = vld [vmem:[%s11552_s1 + $0x58] sm:$0xff]   ;;  %v779_v53 = vshrl.u32 %v7020_v47, 16  ;;  %v7021_v9 = vcombine.low %v9597_v3, %v7002_v5  ;;  %v9041_v5 = vld [vmem:[%s11552_s1 + $0x90] sm:$0xff]  }
  0x19   :  { %8082 = vmatprep.subr.bf16.mxu0 %v8969_v18  ;;  %8578 = vmatprep.subr.bf16.mxu1 %v8970_v19  ;;  %v663_v18 = vshll.u32 %v6992_v10, 16  ;;  %v9552_v32 = vld [vmem:[%s11553_s0 + $0x1b8] sm:$0xf]  ;;  %v9614_v10 = vld [vmem:[%s11553_s0 + $0x1e0] sm:$0xf] }
  0x1a   :  { %v9016_v42 = vld [vmem:[%s11553_s0 + $0x1f8] ss:$8 sps:$4 sm:$0xff]  }
  0x1b   :  { %v665_v23 = vrot.slane %v663_v18, 1  ;;  %v786_v18 = vshrl.u32 %v7021_v9, 16 }
  0x1c   :  { %8083 = vmatpush3.bf16.msra.mxu0 %v8971_v20  ;;  %8579 = vmatpush3.bf16.msra.mxu1 %v8970_v19  ;;  %v8991_v19 = vld [vmem:[%s11552_s1 + $0x50] sm:$0xff]   ;;  %v651_v20 = vrot.slane %v649_v12, 1 }
  0x1d   :  { %8084 = vmatprep.subr.bf16.mxu0 %v8972_v21  ;;  %8580 = vmatprep.subr.bf16.mxu1 %v8973_v22  ;;  %v658_v21 = vrot.slane %v656_v14, 1  ;;  %v666_v28 = vor.u32 %v665_v23, %v661_v17  ;;  %v9623_v14 = vld [vmem:[%s11553_s0 + $0x1e8] sm:$0xf] }
  0x1e   :  { %v652_v24 = vor.u32 %v651_v20, %v647_v11  ;;  %v7006_v11 = vld [vmem:[%s11553_s0 + $0x1e4] sm:$0xf]  ;;  %v9004_v17 = vld [vmem:[%s11552_s1 + $0x28] sm:$0xff]   ;;  %v7034_v20 = vcombine.low %v9508_v0, %v9517_v4 }
  0x1f   :  { %v659_v25 = vor.u32 %v658_v21, %v654_v13 }
  0x20   :  { %8085 = vmatpush3.bf16.msra.mxu0 %v8974_v35  ;;  %8581 = vmatpush3.bf16.msra.mxu1 %v8973_v22  ;;  %v645_v22 = vor.u32 %v644_v15, %v640_v8  ;;  %v7017_v35 = vcombine.low %v9544_v30, %v6994_v31  ;;  %v7004_v8 = vld [vmem:[%s11553_s0 + $0x1dc] sm:$0xf]  ;;  %v7008_v15 = vld [vmem:[%s11553_s0 + $0x1ec] sm:$0xf] }
  0x21   :  { %8150 = vmatprep.subr.bf16.mxu1 %v8981_v39  ;;  %v7036_v38 = vcombine.low %v659_v25, %v666_v28  ;;  %v7018_v39 = vcombine.low %v9552_v32, %v6996_v34  ;;  %v7022_v13 = vcombine.low %v9605_v6, %v7004_v8  ;;  %v7024_v21 = vcombine.low %v9623_v14, %v7008_v15  ;;  %v9044_v8 = vld [vmem:[%s11552_s1 + $0x1e8] sm:$0xff]  }
  0x22   :  { %v7033_v33 = vcombine.low %v645_v22, %v652_v24  ;;  %v758_v44 = vshrl.u32 %v7017_v35, 16  ;;  %v760_v45 = vshll.u32 %v7017_v35, 16  ;;  %v7046_v15 = vcombine.low %v9614_v10, %v9623_v14  ;;  %v9054_v14 = vld [vmem:[%s11552_s1 + $0x1b0] sm:$0xff]  }
  0x23   :  { %1111 = vmatmul.mubr.bf16.vlgmr.msra.gmra.mrb[0].mxu0 %v7025_v48  ;;  %8583 = vmatmul.mubr.bf16.vlgmr.msra.gmra.mrb[0].mxu1 %v7030_v2  ;;  %v765_v48 = vshrl.u32 %v7018_v39, 16  ;;  %v767_v49 = vshll.u32 %v7018_v39, 16  ;;  %v9003_v2 = vld [vmem:[%s11552_s1 + $0x68] sm:$0xff]   ;;  %v793_v22 = vshrl.u32 %v7022_v13, 16  ;;  %v795_v23 = vshll.u32 %v7022_v13, 16 }
  0x24   :  { %1118 = vmatprep.mubr.bf16.mxu0 %v8985_v55  ;;  %8151 = vmatpush3.bf16.msra.mxu1 %v8982_v54  ;;  %v762_v52 = vrot.slane %v760_v45, 1  ;;  %v781_v54 = vshll.u32 %v7020_v47, 16  ;;  %v9001_v55 = vld [vmem:[%s11552_s1 + $0x60] sm:$0xff]   ;;  %v809_v28 = vshll.u32 %v7024_v21, 16  ;;  %v7037_v47 = vcombine.low %v9544_v30, %v9552_v32  ;;  %v9022_v32 = vld [vmem:[%s11552_s1 + $0x1c8] sm:$0xff]  }
  0x25   :  { %8152 = vmatprep.subr.bf16.mxu1 %v8983_v57  ;;  %8586 = vmatprep.mubr.bf16.mxu1 %v7033_v33  ;;  %v769_v56 = vrot.slane %v767_v49, 1  ;;  %v776_v57 = vrot.slane %v774_v51, 1  ;;  %v797_v31 = vrot.slane %v795_v23, 1  ;;  %v9664_v49 = vld [vmem:[%s11553_s0] sm:$0xf]  ;;  %v9023_v51 = vld [vmem:[%s11552_s1 + $0x188] sm:$0xff]  }
  0x26   :  { %v763_v59 = vor.u32 %v762_v52, %v758_v44  ;;  %v783_v58 = vrot.slane %v781_v54, 1  ;;  %v811_v0 = vrot.slane %v809_v28, 1  ;;  %v9017_v44 = vld [vmem:[%s11553_s0 + $0x48] ss:$8 sps:$4 sm:$0xff]   ;;  %v9021_v30 = vld [vmem:[%s11552_s1 + $0x80] sm:$0xff]  }
  0x27   :  { %v770_v60 = vor.u32 %v769_v56, %v765_v48  ;;  %v777_v61 = vor.u32 %v776_v57, %v772_v50  ;;  %v798_v4 = vor.u32 %v797_v31, %v793_v22  ;;  %v9014_v48 = vld [vmem:[%s11552_s1 + $0x38] sm:$0xff]   ;;  %v9669_v50 = vld [vmem:[%s11553_s0 + $0x8] sm:$0xf]  ;;  %v9031_v57 = vld [vmem:[%s11552_s1 + $0x1d0] sm:$0xff]  }
  0x28   :  { %8153 = vmatpush3.bf16.msra.mxu1 %v8984_v7  ;;  %v784_v1 = vor.u32 %v783_v58, %v779_v53  ;;  %v9024_v52 = vld [vmem:[%s11553_s0 + $0x208] ss:$8 sps:$4 sm:$0xff]   ;;  %v6937_v53 = vcombine.low %v9664_v49, %v9669_v50  ;;  %v9025_v54 = vld [vmem:[%s11553_s0 + $0x58] ss:$8 sps:$4 sm:$0xff]  }
  0x29   :  { %8154 = vmatprep.subr.bf16.mxu1 %v8991_v19  ;;  %v7039_v7 = vcombine.low %v763_v59, %v770_v60  ;;  %v788_v19 = vshll.u32 %v7021_v9, 16  ;;  %v9030_v56 = vld [vmem:[%s11552_s1 + $0x88] sm:$0xff]   ;;  %v9699_v59 = vld [vmem:[%s11553_s0 + $0x10] sm:$0xf]  ;;  %v9704_v58 = vld [vmem:[%s11553_s0 + $0x18] sm:$0xf] }
  0x2a   :  { %v7042_v12 = vcombine.low %v777_v61, %v784_v1  ;;  %v9034_v60 = vld [vmem:[%s11552_s1 + $0x198] sm:$0xff]   ;;  %v6940_v61 = vcombine.low %v9699_v59, %v9704_v58  ;;  %v7043_v1 = vcombine.low %v9597_v3, %v9605_v6  ;;  %v9739_v3 = vld [vmem:[%s11553_s0 + $0x28] sm:$0xf]  ;;  %v9043_v6 = vld [vmem:[%s11552_s1 + $0x1a0] sm:$0xff]  }
  0x2b   :  { %1119 = vmatmul.mubr.bf16.gmra.mrb[4].mxu0 %v7028_v16  ;;  %8587 = vmatmul.mubr.bf16.gmra.mrb[4].mxu1 %v7036_v38  ;;  %v7023_v16 = vcombine.low %v9614_v10, %v7006_v11  ;;  %v9015_v38 = vld [vmem:[%s11552_s1 + $0x1c0] sm:$0xff]   ;;  %v9045_v11 = vld [vmem:[%s11552_s1 + $0x1a8] sm:$0xff]   ;;  %v9053_v10 = vld [vmem:[%s11552_s1 + $0x1f0] sm:$0xff]  }
  0x2c   :  { %1126 = vmatprep.mubr.bf16.mxu0 %v8995_v27  ;;  %8155 = vmatpush3.bf16.msra.mxu1 %v8992_v26  ;;  %v790_v26 = vrot.slane %v788_v19, 1  ;;  %v807_v27 = vshrl.u32 %v7024_v21, 16  ;;  %v9047_v13 = vld [vmem:[%s11553_s0 + $0x78] ss:$8 sps:$4 sm:$0xff]   ;;  %v9057_v22 = vld [vmem:[%s11553_s0 + $0x168] ss:$8 sps:$4 sm:$0xff]  }
  0x2d   :  { %8156 = vmatprep.subr.bf16.mxu1 %v8993_v29  ;;  %8590 = vmatprep.mubr.bf16.mxu1 %v7039_v7  ;;  %v800_v24 = vshrl.u32 %v7023_v16, 16  ;;  %v802_v25 = vshll.u32 %v7023_v16, 16  ;;  %v9011_v29 = vld [vmem:[%s11552_s1 + $0x70] sm:$0xff]   ;;  %v9042_v7 = vld [vmem:[%s11552_s1 + $0x1e0] sm:$0xff]   ;;  %v9055_v19 = vld [vmem:[%s11552_s1 + $0x1f8] sm:$0xff]  }
  0x2e   :  { %v791_v34 = vor.u32 %v790_v26, %v786_v18  ;;  %v812_v39 = vor.u32 %v811_v0, %v807_v27  ;;  %8230 = vmatprep.subr.bf16.mxu0 %v9015_v38  ;;  %v9763_v16 = vld [vmem:[%s11553_s0 + $0x30] sm:$0xf]  ;;  %v9052_v18 = vld [vmem:[%s11552_s1 + $0x98] sm:$0xff]   ;;  %v9062_v26 = vld [vmem:[%s11552_s1 + $0xa0] sm:$0xff]  }
  0x2f   :  { %v804_v33 = vrot.slane %v802_v25, 1  ;;  %v9056_v21 = vld [vmem:[%s11552_s1 + $0x1b8] sm:$0xff]   ;;  %v9801_v25 = vld [vmem:[%s11553_s0 + $0x128] sm:$0xf]  ;;  %v9814_v28 = vld [vmem:[%s11553_s0 + $0x10] sm:$0xf] }
  0x30   :  { %8157 = vmatpush3.bf16.msra.mxu1 %v8994_v43  ;;  %v7045_v43 = vcombine.low %v791_v34, %v798_v4  ;;  %v9058_v23 = vld [vmem:[%s11553_s0 + $0x50] ss:$8 sps:$4 sm:$0xff]   ;;  %v9809_v27 = vld [vmem:[%s11553_s0 + $0x8] sm:$0xf] }
  0x31   :  { %8158 = vmatprep.subr.bf16.mxu1 %v9001_v55  ;;  %v805_v35 = vor.u32 %v804_v33, %v800_v24  ;;  %v7040_v55 = vcombine.low %v9561_v36, %v9570_v40  ;;  %v9032_v36 = vld [vmem:[%s11552_s1 + $0x190] sm:$0xff]   ;;  %v9033_v40 = vld [vmem:[%s11552_s1 + $0x1d8] sm:$0xff]   ;;  %v9796_v24 = vld [vmem:[%s11553_s0 + $0x120] sm:$0xf] }
  0x32   :  { %v9065_v31 = vld [vmem:[%s11553_s0 + $0x60] ss:$8 sps:$4 sm:$0xff]   ;;  %v6949_v33 = vcombine.low %v9796_v24, %v9801_v25  ;;  %v9832_v4 = vld [vmem:[%s11553_s0 + $0x18] sm:$0xf]  ;;  %v9078_v38 = vld [vmem:[%s11552_s1 + $0xb0] sm:$0xff]  }
  0x33   :  { %1127 = vmatmul.mubr.bf16.gmra.mrb[8].mxu0 %v7031_v46  ;;  %8591 = vmatmul.mubr.bf16.gmra.mrb[8].mxu1 %v7042_v12  ;;  %v7048_v45 = vcombine.low %v805_v35, %v812_v39  ;;  %v9018_v46 = vld [vmem:[%s11552_s1 + $0x180] sm:$0xff]   ;;  %v9046_v12 = vld [vmem:[%s11553_s0 + $0x228] ss:$8 sps:$4 sm:$0xff]   ;;  %v163_v35 = vld [vmem:[%s11553_s0 + $0x14] sm:$0xf] }
  0x34   :  { %1134 = vmatprep.mubr.bf16.mxu0 %v9005_v63  ;;  %8159 = vmatpush3.bf16.msra.mxu1 %v9002_v62  ;;  %v9035_v62 = vld [vmem:[%s11553_s0 + $0x218] ss:$8 sps:$4 sm:$0xff]   ;;  %v9036_v63 = vld [vmem:[%s11553_s0 + $0x68] ss:$8 sps:$4 sm:$0xff]   ;;  %v165_v39 = vld [vmem:[%s11553_s0 + $0x1c] sm:$0xf] }
  0x35   :  { %8160 = vmatprep.subr.bf16.mxu1 %v9003_v2  ;;  %8594 = vmatprep.mubr.bf16.mxu1 %v7045_v43  ;;  %v9728_v2 = vld [vmem:[%s11553_s0 + $0x20] sm:$0xf]  ;;  %v9069_v0 = vld [vmem:[%s11552_s1 + $0xa8] sm:$0xff]   ;;  %v9858_v43 = vld [vmem:[%s11553_s0 + $0x138] sm:$0xf] }
  0x36   :  { %8231 = vmatpush3.bf16.msra.mxu0 %v9018_v46  ;;  %v6943_v9 = vcombine.low %v9728_v2, %v9739_v3  ;;  %v9064_v34 = vld [vmem:[%s11553_s0 + $0x178] ss:$8 sps:$4 sm:$0xff]  }
  0x37   :  { %8232 = vmatprep.subr.bf16.mxu0 %v9022_v32  ;;  %v9087_v46 = vld [vmem:[%s11552_s1 + $0xb8] sm:$0xff]  }
  0x38   :  { %8161 = vmatpush3.bf16.msra.mxu1 %v9004_v17  ;;  %v9768_v17 = vld [vmem:[%s11553_s0 + $0x38] sm:$0xf] }
  0x39   :  { %8162 = vmatprep.subr.bf16.mxu1 %v9011_v29  ;;  %v7209_v29 = vcombine.low %v9809_v27, %v9814_v28 }
  0x3a   :  { %8233 = vmatpush3.bf16.msra.mxu0 %v9023_v51  ;;  %v9073_v51 = vld [vmem:[%s11553_s0 + $0x188] ss:$8 sps:$4 sm:$0xff]  }
  0x3b   :  { %1135 = vmatmul.mubr.bf16.gmra.mrb[12].mxu0 %v7034_v20  ;;  %8595 = vmatmul.mubr.bf16.gmra.mrb[12].mxu1 %v7048_v45  ;;  %v6946_v20 = vcombine.low %v9763_v16, %v9768_v17  ;;  %v9074_v45 = vld [vmem:[%s11553_s0 + $0x70] ss:$8 sps:$4 sm:$0xff]  }
  0x3c   :  { %1142 = vmatprep.mubr.bf16.mxu0 %v9016_v42  ;;  %8163 = vmatpush3.bf16.msra.mxu1 %v9012_v37  ;;  %v9840_v37 = vld [vmem:[%s11553_s0 + $0x20] sm:$0xf]  ;;  %v9853_v42 = vld [vmem:[%s11553_s0 + $0x130] sm:$0xf] }
  0x3d   :  { %1448 = vmatprep.mubr.bf16.mxu1 %v9017_v44  ;;  %8164 = vmatprep.subr.bf16.mxu1 %v9013_v41  ;;  %v7212_v41 = vcombine.low %v9832_v4, %v9840_v37  ;;  %v9861_v44 = vcombine.low %v9699_v59, %v163_v35  ;;  %v6952_v32 = vcombine.low %v9853_v42, %v9858_v43 }
  0x3e   :  { %8234 = vmatprep.subr.bf16.mxu0 %v9031_v57 }
  0x3f   :  { %8235 = vmatpush3.bf16.msra.mxu0 %v9032_v36 }
  0x40   :  { %8165 = vmatpush3.bf16.msra.mxu1 %v9014_v48  ;;  %8236 = vmatprep.subr.bf16.mxu0 %v9033_v40  ;;  %v167_v48 = vld [vmem:[%s11553_s0 + $0x24] sm:$0xf]  ;;  %v9916_v40 = vld [vmem:[%s11553_s0 + $0x148] sm:$0xf] }
  0x41   :  { %8598 = vmatprep.subr.bf16.mxu1 %v9021_v30  ;;  %v9901_v57 = vcombine.low %v9728_v2, %v167_v48 }
  0x43   :  { %1143 = vmatmul.mubr.bf16.gmra.mrb[16].mxu0 %v7037_v47  ;;  %1449 = vmatmul.mubr.bf16.vlgmr.msra.gmra.mrb[16].mxu1 %v6937_v53  ;;  %v9870_v47 = vcombine.low %v9704_v58, %v165_v39  ;;  %v240_v53 = vshll.u32 %v9861_v44, 16  ;;  %v9909_v58 = vld [vmem:[%s11553_s0 + $0x140] sm:$0xf]  ;;  %v254_v2 = vshll.u32 %v9901_v57, 16 }
  0x44   :  { %1150 = vmatprep.mubr.bf16.mxu0 %v9024_v52  ;;  %8599 = vmatpush3.bf16.msra.mxu1 %v9021_v30  ;;  %v169_v30 = vld [vmem:[%s11553_s0 + $0x2c] sm:$0xf]  ;;  %v9886_v52 = vld [vmem:[%s11553_s0 + $0x28] sm:$0xf] }
  0x45   :  { %1456 = vmatprep.mubr.bf16.mxu1 %v9025_v54  ;;  %8600 = vmatprep.subr.bf16.mxu1 %v9030_v56  ;;  %v9892_v54 = vld [vmem:[%s11553_s0 + $0x30] sm:$0xf]  ;;  %v9904_v59 = vcombine.low %v9739_v3, %v169_v30  ;;  %v173_v3 = vld [vmem:[%s11553_s0 + $0x3c] sm:$0xf] }
  0x46   :  { %8237 = vmatpush3.bf16.msra.mxu0 %v9034_v60  ;;  %v7215_v36 = vcombine.low %v9886_v52, %v9892_v54  ;;  %v9083_v60 = vld [vmem:[%s11553_s0 + $0x80] ss:$8 sps:$4 sm:$0xff]  }
  0x47   :  { %8238 = vmatprep.subr.bf16.mxu0 %v9042_v7  ;;  %v261_v7 = vshll.u32 %v9904_v59, 16 }
  0x48   :  { %8601 = vmatpush3.bf16.msra.mxu1 %v9030_v56  ;;  %v247_v56 = vshll.u32 %v9870_v47, 16 }
  0x49   :  { %8602 = vmatprep.subr.bf16.mxu1 %v9041_v5  ;;  %v263_v39 = vrot.slane %v261_v7, 1 }
  0x4a   :  { %8239 = vmatpush3.bf16.msra.mxu0 %v9043_v6  ;;  %v6955_v6 = vcombine.low %v9909_v58, %v9916_v40 }
  0x4b   :  { %1151 = vmatmul.mubr.bf16.gmra.mrb[20].mxu0 %v7040_v55  ;;  %1457 = vmatmul.mubr.bf16.gmra.mrb[20].mxu1 %v6940_v61  ;;  %v9897_v55 = vld [vmem:[%s11552_s1 + $0x200] sm:$0xff]   ;;  %v238_v61 = vshrl.u32 %v9861_v44, 16 }
  0x4c   :  { %1158 = vmatprep.mubr.bf16.mxu0 %v9035_v62  ;;  %1464 = vmatprep.mubr.bf16.mxu1 %v9036_v63  ;;  %v242_v62 = vrot.slane %v240_v53, 1  ;;  %v245_v63 = vshrl.u32 %v9870_v47, 16  ;;  %v6912_v53 = vld [vmem:[%s11553_s0 + $0x13c] sm:$0xf] }
  0x4d   :  { %8603 = vmatpush3.bf16.msra.mxu1 %v9041_v5  ;;  %8240 = vmatprep.subr.bf16.mxu0 %v9044_v8  ;;  %v171_v5 = vld [vmem:[%s11553_s0 + $0x34] sm:$0xf]  ;;  %v252_v8 = vshrl.u32 %v9901_v57, 16  ;;  %v6914_v57 = vld [vmem:[%s11553_s0 + $0x144] sm:$0xf] }
  0x4e   :  { %8241 = vmatpush3.bf16.msra.mxu0 %v9045_v11  ;;  %8604 = vmatprep.subr.bf16.mxu1 %v9052_v18  ;;  %v9941_v11 = vld [vmem:[%s11553_s0 + $0x38] sm:$0xf] }
  0x4f   :  { %8242 = vmatprep.subr.bf16.mxu0 %v9053_v10  ;;  %v161_v10 = vld [vmem:[%s11553_s0 + $0xc] sm:$0xf] }
  0x51   :  { %8605 = vmatpush3.bf16.msra.mxu1 %v9052_v18  ;;  %v159_v18 = vld [vmem:[%s11553_s0 + $0x4] sm:$0xf] }
  0x52   :  { %8243 = vmatpush3.bf16.msra.mxu0 %v9054_v14  ;;  %8606 = vmatprep.subr.bf16.mxu1 %v9062_v26  ;;  %v6908_v14 = vld [vmem:[%s11553_s0 + $0x12c] sm:$0xf] }
  0x53   :  { %1159 = vmatmul.mubr.bf16.gmra.mrb[24].mxu0 %v7043_v1  ;;  %1465 = vmatmul.mubr.bf16.gmra.mrb[24].mxu1 %v6943_v9  ;;  %v249_v1 = vrot.slane %v247_v56, 1  ;;  %v9082_v9 = vld [vmem:[%s11553_s0 + $0x198] ss:$8 sps:$4 sm:$0xff]   ;;  %v6930_v35 = vcombine.low %v9801_v25, %v6908_v14  ;;  %v10002_v25 = vld [vmem:[%s11553_s0 + $0x130] sm:$0xf] }
  0x54   :  { %1166 = vmatprep.mubr.bf16.mxu0 %v9046_v12  ;;  %1472 = vmatprep.mubr.bf16.mxu1 %v9047_v13  ;;  %v9946_v12 = vld [vmem:[%s11553_s0 + $0x40] sm:$0xf]  ;;  %v9949_v13 = vcombine.low %v9763_v16, %v171_v5  ;;  %v6898_v16 = vcombine.low %v9669_v50, %v161_v10  ;;  %v259_v50 = vshrl.u32 %v9904_v59, 16  ;;  %v6916_v59 = vld [vmem:[%s11553_s0 + $0x14c] sm:$0xf] }
  0x55   :  { %8244 = vmatprep.subr.bf16.mxu0 %v9055_v19  ;;  %8607 = vmatpush3.bf16.msra.mxu1 %v9062_v26  ;;  %v6897_v19 = vcombine.low %v9664_v49, %v159_v18  ;;  %v256_v49 = vrot.slane %v254_v2, 1  ;;  %v250_v2 = vor.u32 %v249_v1, %v245_v63  ;;  %v10030_v63 = vcombine.low %v9916_v40, %v6916_v59 }
  0x56   :  { %8245 = vmatpush3.bf16.msra.mxu0 %v9056_v21  ;;  %8608 = vmatprep.subr.bf16.mxu1 %v9069_v0  ;;  %v9971_v21 = vld [vmem:[%s11553_s0 + $0x150] sm:$0xf]  ;;  %v266_v47 = vshrl.u32 %v9949_v13, 16 }
  0x57   :  { %v226_v26 = vshll.u32 %v6897_v19, 16  ;;  %v257_v7 = vor.u32 %v256_v49, %v252_v8  ;;  %v407_v49 = vshll.u32 %v10030_v63, 16 }
  0x59   :  { %8609 = vmatpush3.bf16.msra.mxu1 %v9069_v0 }
  0x5a   :  { %8610 = vmatprep.subr.bf16.mxu1 %v9078_v38 }
  0x5b   :  { %1167 = vmatmul.mubr.bf16.gmra.mrb[28].mxu0 %v7046_v15  ;;  %1473 = vmatmul.mubr.bf16.gmra.mrb[28].mxu1 %v6946_v20  ;;  %v6906_v15 = vld [vmem:[%s11553_s0 + $0x124] sm:$0xf]  ;;  %v9966_v20 = vcombine.low %v9768_v17, %v173_v3  ;;  %v224_v17 = vshrl.u32 %v6897_v19, 16  ;;  %v10019_v3 = vcombine.low %v9858_v43, %v6912_v53  ;;  %v10035_v19 = vld [vmem:[%s11553_s0 + $0x138] sm:$0xf]  ;;  %v405_v53 = vshrl.u32 %v10030_v63, 16 }
  0x5c   :  { %1480 = vmatprep.mubr.bf16.mxu1 %v9057_v22  ;;  %2175 = vmatprep.mubr.bf16.mxu0 %v9058_v23  ;;  %v9976_v22 = vld [vmem:[%s11553_s0 + $0x158] sm:$0xf]  ;;  %v7218_v23 = vcombine.low %v9941_v11, %v9946_v12  ;;  %v6929_v0 = vcombine.low %v9796_v24, %v6906_v15  ;;  %v9997_v24 = vld [vmem:[%s11553_s0 + $0x128] sm:$0xf]  ;;  %v377_v15 = vshrl.u32 %v6930_v35, 16 }
  0x5d   :  { %8611 = vmatpush3.bf16.msra.mxu1 %v9078_v38  ;;  %v6910_v38 = vld [vmem:[%s11553_s0 + $0x134] sm:$0xf]  ;;  %v7221_v5 = vcombine.low %v9997_v24, %v10002_v25  ;;  %v393_v40 = vshll.u32 %v10019_v3, 16 }
  0x5e   :  { %8612 = vmatprep.subr.bf16.mxu1 %v9087_v46  ;;  %v10008_v56 = vcombine.low %v9853_v42, %v6910_v38  ;;  %v264_v42 = vor.u32 %v263_v39, %v259_v50  ;;  %v370_v43 = vshrl.u32 %v6929_v0, 16  ;;  %v6918_v50 = vld [vmem:[%s11553_s0 + $0x154] sm:$0xf]  ;;  %v9105_v38 = vld [vmem:[%s11553_s0 + $0x190] ss:$8 sps:$4 sm:$0xff]  }
  0x5f   :  { %v10065_v39 = vcombine.low %v9971_v21, %v6918_v50 }
  0x60   :  { %v6945_v14 = vcombine.low %v257_v7, %v264_v42 }
  0x61   :  { %8613 = vmatpush3.bf16.msra.mxu1 %v9087_v46  ;;  %v6958_v46 = vcombine.low %v9971_v21, %v9976_v22  ;;  %v7148_v21 = vld [vmem:[%s11553_s0 + $0x14] sm:$0xf] }
  0x62   :  { %8630 = vmatprep.subr.bf16.mxu1 %v9897_v55  ;;  %v7170_v59 = vcombine.low %v9814_v28, %v7148_v21 }
  0x63   :  { %2176 = vmatmul.mubr.bf16.vlgmr.msra.gmra.mrb[32].mxu0 %v7209_v29  ;;  %1481 = vmatmul.mubr.bf16.gmra.mrb[32].mxu1 %v6949_v33  ;;  %v231_v29 = vshrl.u32 %v6898_v16, 16  ;;  %v9093_v33 = vld [vmem:[%s11553_s0 + $0x170] ss:$8 sps:$4 sm:$0xff]  }
  0x64   :  { %2183 = vmatprep.mubr.bf16.mxu0 %v9065_v31  ;;  %1488 = vmatprep.mubr.bf16.mxu1 %v9064_v34  ;;  %v233_v31 = vshll.u32 %v6898_v16, 16  ;;  %v268_v34 = vshll.u32 %v9949_v13, 16  ;;  %v273_v13 = vshrl.u32 %v9966_v20, 16  ;;  %v9098_v16 = vld [vmem:[%s11552_s1 + $0x208] sm:$0xff]   ;;  %v1686_v63 = vshll.u32 %v7170_v59, 16 }
  0x66   :  { %v235_v44 = vrot.slane %v233_v31, 1 }
  0x68   :  { %v236_v30 = vor.u32 %v235_v44, %v231_v29  ;;  %v6920_v29 = vld [vmem:[%s11553_s0 + $0x15c] sm:$0xf] }
  0x69   :  { %v10071_v44 = vcombine.low %v9976_v22, %v6920_v29  ;;  %v7150_v22 = vld [vmem:[%s11553_s0 + $0x1c] sm:$0xf] }
  0x6b   :  { %2184 = vmatmul.mubr.bf16.gmra.mrb[36].mxu0 %v7212_v41  ;;  %1489 = vmatmul.mubr.bf16.gmra.mrb[36].mxu1 %v6952_v32  ;;  %v228_v41 = vrot.slane %v226_v26, 1  ;;  %v372_v32 = vshll.u32 %v6929_v0, 16  ;;  %v384_v0 = vshrl.u32 %v10008_v56, 16  ;;  %v421_v7 = vshll.u32 %v10071_v44, 16 }
  0x6c   :  { %2191 = vmatprep.mubr.bf16.mxu0 %v9074_v45  ;;  %1496 = vmatprep.mubr.bf16.mxu1 %v9073_v51  ;;  %v275_v45 = vshll.u32 %v9966_v20, 16  ;;  %v379_v51 = vshll.u32 %v6930_v35, 16 }
  0x6d   :  { %v229_v48 = vor.u32 %v228_v41, %v224_v17  ;;  %v374_v8 = vrot.slane %v372_v32, 1  ;;  %v7146_v41 = vld [vmem:[%s11553_s0 + $0xc] sm:$0xf] }
  0x6e   :  { %v277_v1 = vrot.slane %v275_v45, 1  ;;  %v381_v18 = vrot.slane %v379_v51, 1  ;;  %v391_v45 = vshrl.u32 %v10019_v3, 16  ;;  %v10089_v51 = vld [vmem:[%s11553_s0 + $0x150] sm:$0xf] }
  0x6f   :  { %v375_v26 = vor.u32 %v374_v8, %v370_v43  ;;  %v412_v8 = vshrl.u32 %v10065_v39, 16 }
  0x70   :  { %v278_v17 = vor.u32 %v277_v1, %v273_v13  ;;  %v7171_v1 = vcombine.low %v9832_v4, %v7150_v22 }
  0x73   :  { %2192 = vmatmul.mubr.bf16.gmra.mrb[40].mxu0 %v7215_v36  ;;  %1497 = vmatmul.mubr.bf16.gmra.mrb[40].mxu1 %v6955_v6  ;;  %v6939_v36 = vcombine.low %v229_v48, %v236_v30  ;;  %v9099_v6 = vld [vmem:[%s11553_s0 + $0x180] ss:$8 sps:$4 sm:$0xff]  }
  0x74   :  { %2199 = vmatprep.mubr.bf16.mxu0 %v9083_v60  ;;  %1504 = vmatprep.mubr.bf16.mxu1 %v9082_v9  ;;  %v243_v60 = vor.u32 %v242_v62, %v238_v61  ;;  %v270_v9 = vrot.slane %v268_v34, 1  ;;  %v386_v61 = vshll.u32 %v10008_v56, 16  ;;  %v10027_v62 = vcombine.low %v9909_v58, %v6914_v57  ;;  %v10040_v58 = vld [vmem:[%s11553_s0 + $0x140] sm:$0xf] }
  0x75   :  { %v7224_v31 = vcombine.low %v10035_v19, %v10040_v58  ;;  %v382_v34 = vor.u32 %v381_v18, %v377_v15  ;;  %v409_v56 = vrot.slane %v407_v49, 1  ;;  %v7169_v57 = vcombine.low %v9809_v27, %v7146_v41  ;;  %v7156_v27 = vld [vmem:[%s11553_s0 + $0x34] sm:$0xf] }
  0x76   :  { %v6942_v10 = vcombine.low %v243_v60, %v250_v2  ;;  %v271_v20 = vor.u32 %v270_v9, %v266_v47  ;;  %v388_v35 = vrot.slane %v386_v61, 1  ;;  %v398_v30 = vshrl.u32 %v10027_v62, 16  ;;  %v9104_v2 = vld [vmem:[%s11552_s1 + $0x218] sm:$0xff]   ;;  %v9111_v9 = vld [vmem:[%s11553_s0 + $0x1a0] ss:$8 sps:$4 sm:$0xff]  }
  0x77   :  { %v6951_v48 = vcombine.low %v375_v26, %v382_v34  ;;  %v414_v60 = vshll.u32 %v10065_v39, 16  ;;  %v410_v61 = vor.u32 %v409_v56, %v405_v53  ;;  %v419_v18 = vshrl.u32 %v10071_v44, 16  ;;  %v7178_v39 = vld [vmem:[%s11553_s0 + $0x12c] sm:$0xf]  ;;  %v7180_v41 = vld [vmem:[%s11553_s0 + $0x134] sm:$0xf] }
  0x78   :  { %v6948_v47 = vcombine.low %v271_v20, %v278_v17  ;;  %v389_v28 = vor.u32 %v388_v35, %v384_v0  ;;  %v1684_v20 = vshrl.u32 %v7170_v59, 16  ;;  %v1688_v17 = vrot.slane %v1686_v63, 1 }
  0x79   :  { %v416_v15 = vrot.slane %v414_v60, 1  ;;  %v1693_v26 = vshll.u32 %v7171_v1, 16  ;;  %v7201_v53 = vcombine.low %v9997_v24, %v7178_v39  ;;  %v7202_v56 = vcombine.low %v10002_v25, %v7180_v41  ;;  %v7182_v25 = vld [vmem:[%s11553_s0 + $0x13c] sm:$0xf] }
  0x7b   :  { %2200 = vmatmul.mubr.bf16.gmra.mrb[44].mxu0 %v7218_v23  ;;  %1505 = vmatmul.mubr.bf16.gmra.mrb[44].mxu1 %v6958_v46  ;;  %v400_v23 = vshll.u32 %v10027_v62, 16  ;;  %v395_v46 = vrot.slane %v393_v40, 1  ;;  %v1679_v62 = vshll.u32 %v7169_v57, 16  ;;  %v10128_v40 = vld [vmem:[%s11553_s0 + $0x160] sm:$0xf]  ;;  %v1695_v21 = vrot.slane %v1693_v26, 1 }
  0x7c   :  { %2207 = vmatprep.mubr.bf16.mxu0 %v9093_v33  ;;  %8614 = vmatprep.mubr.bf16.mxu1 %v6939_v36  ;;  %v9103_v33 = vld [vmem:[%s11552_s1 + $0x210] sm:$0xff]   ;;  %v7152_v36 = vld [vmem:[%s11553_s0 + $0x24] sm:$0xf] }
  0x7d   :  { %v402_v32 = vrot.slane %v400_v23, 1  ;;  %v396_v3 = vor.u32 %v395_v46, %v391_v45  ;;  %v7172_v43 = vcombine.low %v9840_v37, %v7152_v36  ;;  %v7174_v23 = vcombine.low %v9892_v54, %v7156_v27  ;;  %v7160_v54 = vld [vmem:[%s11553_s0 + $0x44] sm:$0xf] }
  0x7e   :  { %v1681_v50 = vrot.slane %v1679_v62, 1  ;;  %v1689_v45 = vor.u32 %v1688_v17, %v1684_v20  ;;  %v1691_v46 = vshrl.u32 %v7171_v1, 16  ;;  %v7176_v22 = vcombine.low %v9946_v12, %v7160_v54 }
  0x7f   :  { %v403_v13 = vor.u32 %v402_v32, %v398_v30  ;;  %v6954_v37 = vcombine.low %v389_v28, %v396_v3  ;;  %v1700_v29 = vshll.u32 %v7172_v43, 16  ;;  %v9115_v30 = vld [vmem:[%s11552_s1 + $0x230] sm:$0xff]   ;;  %v1825_v28 = vshll.u32 %v7201_v53, 16 }
  0x80   :  { %v1728_v24 = vshll.u32 %v7176_v22, 16  ;;  %v1832_v3 = vshll.u32 %v7202_v56, 16  ;;  %v7203_v62 = vcombine.low %v10035_v19, %v7182_v25  ;;  %v9124_v25 = vld [vmem:[%s11554_s4 + $0xd0] sm:$0xff]  }
  0x81   :  { %v6957_v49 = vcombine.low %v403_v13, %v410_v61  ;;  %v1827_v20 = vrot.slane %v1825_v28, 1 }
  0x82   :  { %v1839_v17 = vshll.u32 %v7203_v62, 16 }
  0x83   :  { %2208 = vmatmul.mubr.bf16.gmra.mrb[48].mxu0 %v7221_v5  ;;  %8615 = vmatmul.mubr.bf16.vlgmr.msra.gmra.mrb[0].mxu1 %v6942_v10  ;;  %v7154_v5 = vld [vmem:[%s11553_s0 + $0x2c] sm:$0xf]  ;;  %v423_v10 = vrot.slane %v421_v7, 1  ;;  %v1696_v7 = vor.u32 %v1695_v21, %v1691_v46 }
  0x84   :  { %2215 = vmatprep.mubr.bf16.mxu0 %v9099_v6  ;;  %8631 = vmatpush3.bf16.msra.mxu1 %v9897_v55  ;;  %v10077_v55 = vld [vmem:[%s11553_s0 + $0x148] sm:$0xf]  ;;  %v9109_v6 = vld [vmem:[%s11552_s1 + $0x220] sm:$0xff]   ;;  %v10131_v4 = vcombine.low %v9886_v52, %v7154_v5  ;;  %v7158_v52 = vld [vmem:[%s11553_s0 + $0x3c] sm:$0xf] }
  0x85   :  { %8618 = vmatprep.mubr.bf16.mxu1 %v6945_v14  ;;  %8632 = vmatprep.subr.bf16.mxu1 %v9098_v16  ;;  %v7227_v42 = vcombine.low %v10077_v55, %v10089_v51  ;;  %v10123_v14 = vld [vmem:[%s11553_s0 + $0x158] sm:$0xf]  ;;  %v424_v34 = vor.u32 %v423_v10, %v419_v18  ;;  %v7175_v32 = vcombine.low %v9941_v11, %v7158_v52 }
  0x86   :  { %v7230_v0 = vcombine.low %v10123_v14, %v10128_v40  ;;  %v1707_v35 = vshll.u32 %v10131_v4, 16  ;;  %v1705_v59 = vshrl.u32 %v10131_v4, 16  ;;  %v9116_v11 = vld [vmem:[%s11552_s1 + $0x238] sm:$0xff]  }
  0x87   :  { %v1721_v12 = vshll.u32 %v7175_v32, 16  ;;  %v1719_v1 = vshrl.u32 %v7175_v32, 16 }
  0x88   :  { %8633 = vmatpush3.bf16.msra.mxu1 %v9098_v16  ;;  %v1677_v16 = vshrl.u32 %v7169_v57, 16  ;;  %v1709_v60 = vrot.slane %v1707_v35, 1  ;;  %v1841_v35 = vrot.slane %v1839_v17, 1  ;;  %v107_v17 = vld [vmem:[#allocation2 + $0x20] sm:$0x1] }
  0x89   :  { %8634 = vmatprep.subr.bf16.mxu1 %v9103_v33 }
  0x8a   :  { %v1682_v44 = vor.u32 %v1681_v50, %v1677_v16  ;;  %v1710_v13 = vor.u32 %v1709_v60, %v1705_v59 }
  0x8b   :  { %2216 = vmatmul.mubr.bf16.gmra.mrb[52].mxu0 %v7224_v31  ;;  %8619 = vmatmul.mubr.bf16.gmra.mrb[4].mxu1 %v6948_v47  ;;  %v9110_v31 = vld [vmem:[%s11552_s1 + $0x228] sm:$0xff]   ;;  %v1698_v47 = vshrl.u32 %v7172_v43, 16  ;;  %v1723_v43 = vrot.slane %v1721_v12, 1 }
  0x8c   :  { %2223 = vmatprep.mubr.bf16.mxu0 %v9105_v38  ;;  %8635 = vmatpush3.bf16.msra.mxu1 %v9103_v33  ;;  %v417_v33 = vor.u32 %v416_v15, %v412_v8  ;;  %v1714_v38 = vshll.u32 %v7174_v23, 16  ;;  %v7211_v36 = vcombine.low %v1682_v44, %v1689_v45  ;;  %v1726_v8 = vshrl.u32 %v7176_v22, 16  ;;  %v9122_v12 = vld [vmem:[%s11554_s4 + $0xc8] sm:$0xff]  }
  0x8d   :  { %8622 = vmatprep.mubr.bf16.mxu1 %v6951_v48  ;;  %8636 = vmatprep.subr.bf16.mxu1 %v9104_v2  ;;  %v1702_v48 = vrot.slane %v1700_v29, 1  ;;  %v1730_v15 = vrot.slane %v1728_v24, 1  ;;  %v1724_v50 = vor.u32 %v1723_v43, %v1719_v1  ;;  %v7190_v29 = vld [vmem:[%s11553_s0 + $0x15c] sm:$0xf]  ;;  %v9123_v24 = vld [vmem:[%s11554_s4 + $0x110] sm:$0xff]   ;;  %v9127_v43 = vld [vmem:[%s11554_s4 + $0x140] sm:$0xff]  }
  0x8e   :  { %v6960_v57 = vcombine.low %v417_v33, %v424_v34  ;;  %v1716_v5 = vrot.slane %v1714_v38, 1  ;;  %v7207_v54 = vcombine.low %v10123_v14, %v7190_v29  ;;  %v9126_v29 = vld [vmem:[%s11554_s4 + $0xd8] sm:$0xff]  }
  0x8f   :  { %v1703_v27 = vor.u32 %v1702_v48, %v1698_v47  ;;  %v1731_v19 = vor.u32 %v1730_v15, %v1726_v8 }
  0x90   :  { %8637 = vmatpush3.bf16.msra.mxu1 %v9104_v2  ;;  %v1712_v2 = vshrl.u32 %v7174_v23, 16  ;;  %v1830_v23 = vshrl.u32 %v7202_v56, 16  ;;  %v1867_v47 = vshll.u32 %v7207_v54, 16 }
  0x91   :  { %8638 = vmatprep.subr.bf16.mxu1 %v9109_v6  ;;  %v7214_v63 = vcombine.low %v1696_v7, %v1703_v27  ;;  %v7220_v34 = vcombine.low %v1724_v50, %v1731_v19  ;;  %v9119_v7 = vld [vmem:[%s11554_s4 + $0x100] sm:$0xff]   ;;  %v9125_v50 = vld [vmem:[%s11554_s4 + $0x118] sm:$0xff]   ;;  %v9131_v19 = vld [vmem:[%s11554_s4 + $0x150] sm:$0xff]  }
  0x92   :  { %v1717_v61 = vor.u32 %v1716_v5, %v1712_v2  ;;  %v1869_v56 = vrot.slane %v1867_v47, 1  ;;  %v9120_v27 = vld [vmem:[%s11554_s4 + $0xc0] sm:$0xff]   ;;  %8310 = vmatprep.subr.bf16.mxu0 %v9119_v7  ;;  %v9137_v7 = vld [vmem:[%s11554_s4 + $0xf0] sm:$0xff]  }
  0x93   :  { %2224 = vmatmul.mubr.bf16.gmra.mrb[56].mxu0 %v7227_v42  ;;  %8623 = vmatmul.mubr.bf16.gmra.mrb[8].mxu1 %v6954_v37  ;;  %v7184_v42 = vld [vmem:[%s11553_s0 + $0x144] sm:$0xf]  ;;  %v1823_v37 = vshrl.u32 %v7201_v53, 16  ;;  %v1865_v53 = vshrl.u32 %v7207_v54, 16  ;;  %v9134_v54 = vld [vmem:[%s11554_s4 + $0x158] sm:$0xff]  }
  0x94   :  { %2231 = vmatprep.mubr.bf16.mxu0 %v9111_v9  ;;  %8639 = vmatpush3.bf16.msra.mxu1 %v9109_v6  ;;  %v7186_v6 = vld [vmem:[%s11553_s0 + $0x14c] sm:$0xf]  ;;  %v7188_v9 = vld [vmem:[%s11553_s0 + $0x154] sm:$0xf]  ;;  %v7204_v18 = vcombine.low %v10040_v58, %v7184_v42  ;;  %v7217_v16 = vcombine.low %v1710_v13, %v1717_v61  ;;  %v7192_v58 = vld [vmem:[%s11553_s0 + $0x164] sm:$0xf] }
  0x95   :  { %8626 = vmatprep.mubr.bf16.mxu1 %v6957_v49  ;;  %8640 = vmatprep.subr.bf16.mxu1 %v9110_v31  ;;  %v7205_v10 = vcombine.low %v10077_v55, %v7186_v6  ;;  %v7206_v4 = vcombine.low %v10089_v51, %v7188_v9  ;;  %v1834_v49 = vrot.slane %v1832_v3, 1  ;;  %v7208_v33 = vcombine.low %v10128_v40, %v7192_v58 }
  0x96   :  { %v1846_v26 = vshll.u32 %v7204_v18, 16  ;;  %v1844_v38 = vshrl.u32 %v7204_v18, 16  ;;  %v1870_v60 = vor.u32 %v1869_v56, %v1865_v53  ;;  %8311 = vmatpush3.bf16.msra.mxu0 %v9120_v27  ;;  %v9130_v18 = vld [vmem:[%s11554_s4 + $0x148] sm:$0xff]   ;;  %v108_v58 = vsel %vm10220_vm2, 0, %v107_v17  ;;  %v9139_v53 = vld [vmem:[%s11554_s4 + $0x170] sm:$0xff]   ;;  %v9142_v27 = vld [vmem:[%s11554_s4 + $0x178] sm:$0xff]  }
  0x97   :  { %v1853_v55 = vshll.u32 %v7205_v10, 16  ;;  %v1860_v51 = vshll.u32 %v7206_v4, 16  ;;  %v1835_v52 = vor.u32 %v1834_v49, %v1830_v23  ;;  %v1851_v41 = vshrl.u32 %v7205_v10, 16  ;;  %109 = vst [vmem:[#allocation2 + $0x20] sm:$0x1] %v108_v58 }
  0x98   :  { %8641 = vmatpush3.bf16.msra.mxu1 %v9110_v31  ;;  %v1828_v31 = vor.u32 %v1827_v20, %v1823_v37  ;;  %v1848_v39 = vrot.slane %v1846_v26, 1  ;;  %v1858_v46 = vshrl.u32 %v7206_v4, 16  ;;  %v1874_v48 = vshll.u32 %v7208_v33, 16  ;;  %v104_v37 = vld [vmem:[#allocation2 + $0x14] sm:$0x1] }
  0x99   :  { %8642 = vmatprep.subr.bf16.mxu1 %v9115_v30  ;;  %v1855_v45 = vrot.slane %v1853_v55, 1  ;;  %v1862_v21 = vrot.slane %v1860_v51, 1  ;;  %v105_v20 = vsel %vm10220_vm2, 0, %v104_v37  ;;  %v110_v55 = vld [vmem:[#allocation2 + $0x2c] sm:$0x1] }
  0x9a   :  { %v7223_v44 = vcombine.low %v1828_v31, %v1835_v52  ;;  %v1849_v32 = vor.u32 %v1848_v39, %v1844_v38  ;;  %v1876_v59 = vrot.slane %v1874_v48, 1  ;;  %106 = vst [vmem:[#allocation2 + $0x14] sm:$0x1] %v105_v20  ;;  %v111_v31 = vsel %vm10220_vm2, 0, %v110_v55  ;;  %v113_v52 = vld [vmem:[#allocation2 + $0x38] sm:$0x1] }
  0x9b   :  { %2232 = vmatmul.mubr.bf16.gmra.mrb[60].mxu0 %v7230_v0  ;;  %8627 = vmatmul.mubr.bf16.gmra.mrb[12].mxu1 %v6960_v57  ;;  %v1837_v0 = vshrl.u32 %v7203_v62, 16  ;;  %v1856_v22 = vor.u32 %v1855_v45, %v1851_v41  ;;  %v1863_v14 = vor.u32 %v1862_v21, %v1858_v46  ;;  %v1872_v57 = vshrl.u32 %v7208_v33, 16  ;;  %112 = vst [vmem:[#allocation2 + $0x2c] sm:$0x1] %v111_v31  ;;  %v9128_v39 = vld [vmem:[%s11554_s4 + $0x120] sm:$0xff]   ;;  %v9138_v21 = vld [vmem:[%s11554_s4 + $0x168] sm:$0xff]  }
  0x9c   :  { %8643 = vmatpush3.bf16.msra.mxu1 %v9115_v30  ;;  %8646 = vmatprep.mubr.bf16.mxu1 %v7211_v36  ;;  %v114_v33 = vsel %vm10220_vm2, 0, %v113_v52  ;;  %v9135_v41 = vld [vmem:[%s11554_s4 + $0x160] sm:$0xff]  }
  0x9d   :  { %8644 = vmatprep.subr.bf16.mxu1 %v9116_v11  ;;  %v1842_v30 = vor.u32 %v1841_v35, %v1837_v0  ;;  %v7229_v36 = vcombine.low %v1856_v22, %v1863_v14  ;;  %v1877_v2 = vor.u32 %v1876_v59, %v1872_v57  ;;  %115 = vst [vmem:[#allocation2 + $0x38] sm:$0x1] %v114_v33  ;;  %v9129_v45 = vld [vmem:[%s11554_s4 + $0xe0] sm:$0xff]   ;;  %v9133_v14 = vld [vmem:[%s11554_s4 + $0xe8] sm:$0xff]   ;;  %v119_v33 = vld [vmem:[#allocation2 + $0x50] sm:$0x1] }
  0x9e   :  { %v53_v57 = vld [vmem:[#allocation2 + $0xc] sm:$0x8]  ;;  %v116_v17 = vld [vmem:[#allocation2 + $0x44] sm:$0x1] }
  0x9f   :  { %v7226_v40 = vcombine.low %v1842_v30, %v1849_v32  ;;  %v7232_v5 = vcombine.low %v1870_v60, %v1877_v2  ;;  %v9132_v30 = vld [vmem:[%s11554_s4 + $0x128] sm:$0xff]   ;;  %v9136_v60 = vld [vmem:[%s11554_s4 + $0x130] sm:$0xff]   ;;  %v56_v2 = vld [vmem:[#allocation2 + $0x18] sm:$0x8]  ;;  %v117_v31 = vsel %vm10220_vm2, 0, %v116_v17 }
  0xa0   :  { %8645 = vmatpush3.bf16.msra.mxu1 %v9116_v11  ;;  %v9121_v11 = vld [vmem:[%s11554_s4 + $0x108] sm:$0xff]   ;;  %118 = vst [vmem:[#allocation2 + $0x44] sm:$0x1] %v117_v31  ;;  %v137_v31 = vld [vmem:[#allocation2 + $0xb0] sm:$0x1] }
  0xa1   :  { %8312 = vmatprep.subr.bf16.mxu0 %v9121_v11  ;;  %8662 = vmatprep.subr.bf16.mxu1 %v9127_v43  ;;  %v57_v11 = vsel %vm10275_vm5, 0, %v56_v2  ;;  %v128_v17 = vld [vmem:[#allocation2 + $0x8c] sm:$0x1] }
  0xa2   :  { %8313 = vmatpush3.bf16.msra.mxu0 %v9122_v12  ;;  %58 = vst [vmem:[#allocation2 + $0x18] sm:$0x8] %v57_v11 }
  0xa3   :  { %8647 = vmatmul.mubr.bf16.vlgmr.msra.gmra.mrb[0].mxu1 %v7214_v63  ;;  %8314 = vmatprep.subr.bf16.mxu0 %v9123_v24 }
  0xa4   :  { %8650 = vmatprep.mubr.bf16.mxu1 %v7217_v16  ;;  %8663 = vmatpush3.bf16.msra.mxu1 %v9127_v43 }
  0xa5   :  { %8664 = vmatprep.subr.bf16.mxu1 %v9130_v18 }
  0xa6   :  { %8315 = vmatpush3.bf16.msra.mxu0 %v9124_v25 }
  0xa7   :  { %8316 = vmatprep.subr.bf16.mxu0 %v9125_v50 }
  0xa8   :  { %8665 = vmatpush3.bf16.msra.mxu1 %v9130_v18  ;;  %v9141_v18 = vld [vmem:[%s11554_s4 + $0xf8] sm:$0xff]  }
  0xa9   :  { %8666 = vmatprep.subr.bf16.mxu1 %v9131_v19 }
  0xaa   :  { %8317 = vmatpush3.bf16.msra.mxu0 %v9126_v29 }
  0xab   :  { %8651 = vmatmul.mubr.bf16.gmra.mrb[4].mxu1 %v7220_v34  ;;  %8318 = vmatprep.subr.bf16.mxu0 %v9128_v39 }
  0xac   :  { %8654 = vmatprep.mubr.bf16.mxu1 %v7223_v44  ;;  %8667 = vmatpush3.bf16.msra.mxu1 %v9131_v19 }
  0xad   :  { %8668 = vmatprep.subr.bf16.mxu1 %v9134_v54 }
  0xae   :  { %8319 = vmatpush3.bf16.msra.mxu0 %v9129_v45 }
  0xaf   :  { %8320 = vmatprep.subr.bf16.mxu0 %v9132_v30 }
  0xb0   :  { %8669 = vmatpush3.bf16.msra.mxu1 %v9134_v54 }
  0xb1   :  { %8670 = vmatprep.subr.bf16.mxu1 %v9135_v41 }
  0xb2   :  { %8321 = vmatpush3.bf16.msra.mxu0 %v9133_v14 }
  0xb3   :  { %8655 = vmatmul.mubr.bf16.gmra.mrb[8].mxu1 %v7226_v40  ;;  %8322 = vmatprep.subr.bf16.mxu0 %v9136_v60 }
  0xb4   :  { %8658 = vmatprep.mubr.bf16.mxu1 %v7229_v36  ;;  %8671 = vmatpush3.bf16.msra.mxu1 %v9135_v41  ;;  %v54_v36 = vsel %vm10275_vm5, 0, %v53_v57 }
  0xb5   :  { %8672 = vmatprep.subr.bf16.mxu1 %v9138_v21  ;;  %55 = vst [vmem:[#allocation2 + $0xc] sm:$0x8] %v54_v36 }
  0xb6   :  { %8323 = vmatpush3.bf16.msra.mxu0 %v9137_v7 }
  0xb8   :  { %8673 = vmatpush3.bf16.msra.mxu1 %v9138_v21 }
  0xb9   :  { %8674 = vmatprep.subr.bf16.mxu1 %v9139_v53 }
  0xbb   :  { %8659 = vmatmul.mubr.bf16.gmra.mrb[12].mxu1 %v7232_v5 }
  0xbc   :  { %8675 = vmatpush3.bf16.msra.mxu1 %v9139_v53 }
  0xbd   :  { %8676 = vmatprep.subr.bf16.mxu1 %v9142_v27 }
  0xc0   :  { %8677 = vmatpush3.bf16.msra.mxu1 %v9142_v27 }
  0xf6   :  { %v8086_v28 = vpop.f32.mrb[0].mxu0 }
  0xf7   :  { %v8087_v3 = vpop.f32.mrb[1].mxu0 }
  0xf8   :  { %v10205_v42 = vadd.f32 %v8087_v3, %v8086_v28  ;;  %v8089_v6 = vpop.f32.mrb[2].mxu0 }
  0xf9   :  { %v8090_v9 = vpop.f32.mrb[3].mxu0 }
  0xfa   :  { %v10207_v13 = vadd.f32 %v8090_v9, %v8089_v6  ;;  %v9140_v9 = vld [vmem:[%s11554_s4 + $0x138] sm:$0xff]  }
  0xfb   :  { %8324 = vmatprep.subr.bf16.mxu0 %v9140_v9 }
  0xfc   :  { %8325 = vmatpush3.bf16.msra.mxu0 %v9141_v18 }
  0xfe   :  { %v8092_v61 = vpop.f32.mrb[4].mxu0 }
  0xff   :  { %v8093_v62 = vpop.f32.mrb[5].mxu0 }
 0x100   :  { %v10209_v63 = vadd.f32 %v8093_v62, %v8092_v61  ;;  %v8095_v1 = vpop.f32.mrb[6].mxu0  ;;  %v59_v61 = vld [vmem:[#allocation2 + $0x24] sm:$0x8] }
 0x101   :  { %v8096_v8 = vpop.f32.mrb[7].mxu0 }
 0x102   :  { %v10214_v15 = vadd.f32 %v8096_v8, %v8095_v1 }
 0x106   :  { %v8098_v4 = vpop.f32.mrb[8].mxu0 }
 0x107   :  { %v8099_v16 = vpop.f32.mrb[9].mxu0 }
 0x108   :  { %v10226_v23 = vadd.f32 %v8099_v16, %v8098_v4  ;;  %v8101_v49 = vpop.f32.mrb[10].mxu0  ;;  %v60_v4 = vsel %vm10275_vm5, 0, %v59_v61  ;;  %v62_v16 = vld [vmem:[#allocation2 + $0x30] sm:$0x8]  ;;  %v68_v61 = vld [vmem:[#allocation2 + $0x48] sm:$0x8] }
 0x109   :  { %v8102_v26 = vpop.f32.mrb[11].mxu0  ;;  %61 = vst [vmem:[#allocation2 + $0x24] sm:$0x8] %v60_v4  ;;  %v69_v18 = vsel %vm10275_vm5, 0, %v68_v61 }
 0x10a   :  { %v10239_v51 = vadd.f32 %v8102_v26, %v8101_v49  ;;  %v63_v49 = vsel %vm10275_vm5, 0, %v62_v16  ;;  %v122_v26 = vld [vmem:[#allocation2 + $0x5c] sm:$0x1]  ;;  %70 = vst [vmem:[#allocation2 + $0x48] sm:$0x8] %v69_v18 }
 0x10b   :  { %64 = vst [vmem:[#allocation2 + $0x30] sm:$0x8] %v63_v49 }
 0x10e   :  { %v8104_v34 = vpop.f32.mrb[12].mxu0 }
 0x10f   :  { %v8105_v0 = vpop.f32.mrb[13].mxu0 }
 0x110   :  { %v10248_v35 = vadd.f32 %v8105_v0, %v8104_v34  ;;  %v8107_v38 = vpop.f32.mrb[14].mxu0  ;;  %v125_v34 = vld [vmem:[#allocation2 + $0x68] sm:$0x1] }
 0x111   :  { %v8108_v44 = vpop.f32.mrb[15].mxu0  ;;  %v126_v21 = vsel %vm10220_vm2, 0, %v125_v34 }
 0x112   :  { %v10259_v46 = vadd.f32 %v8108_v44, %v8107_v38  ;;  %v120_v44 = vsel %vm10220_vm2, 0, %v119_v33  ;;  %127 = vst [vmem:[#allocation2 + $0x68] sm:$0x1] %v126_v21  ;;  %v71_v21 = vld [vmem:[#allocation2 + $0x54] sm:$0x8] }
 0x113   :  { %121 = vst [vmem:[#allocation2 + $0x50] sm:$0x1] %v120_v44 }
 0x116   :  { %v8110_v47 = vpop.f32.mrb[16].mxu0  ;;  %v8166_v5 = vpop.f32.mrb[16].mxu1 }
 0x117   :  { %v8111_v48 = vpop.f32.mrb[17].mxu0  ;;  %v8167_v12 = vpop.f32.mrb[17].mxu1 }
 0x118   :  { %v10267_v32 = vadd.f32 %v8111_v48, %v8110_v47  ;;  %v8113_v22 = vpop.f32.mrb[18].mxu0  ;;  %v8168_v24 = vadd.f32 %v8167_v12, %v8166_v5  ;;  %v8169_v25 = vpop.f32.mrb[18].mxu1 }
 0x119   :  { %v8114_v56 = vpop.f32.mrb[19].mxu0  ;;  %v8170_v3 = vpop.f32.mrb[19].mxu1 }
 0x11a   :  { %v10279_v59 = vadd.f32 %v8114_v56, %v8113_v22  ;;  %v10298_v62 = vadd.f32 %v8168_v24, %v10205_v42  ;;  %v8171_v1 = vadd.f32 %v8170_v3, %v8169_v25  ;;  %v65_v25 = vld [vmem:[#allocation2 + $0x3c] sm:$0x8] }
 0x11c   :  { %v10308_v20 = vadd.f32 %v8171_v1, %v10207_v13  ;;  %v123_v13 = vsel %vm10220_vm2, 0, %v122_v26 }
 0x11d   :  { %124 = vst [vmem:[#allocation2 + $0x5c] sm:$0x1] %v123_v13  ;;  %v131_v13 = vld [vmem:[#allocation2 + $0x98] sm:$0x1] }
 0x11e   :  { %v8116_v28 = vpop.f32.mrb[20].mxu0  ;;  %v8172_v50 = vpop.f32.mrb[20].mxu1 }
 0x11f   :  { %v8117_v6 = vpop.f32.mrb[21].mxu0  ;;  %v8173_v19 = vpop.f32.mrb[21].mxu1 }
 0x120   :  { %v10300_v43 = vadd.f32 %v8117_v6, %v8116_v28  ;;  %v8119_v8 = vpop.f32.mrb[22].mxu0  ;;  %v8174_v29 = vadd.f32 %v8173_v19, %v8172_v50  ;;  %v8175_v58 = vpop.f32.mrb[22].mxu1  ;;  %v66_v6 = vsel %vm10275_vm5, 0, %v65_v25  ;;  %v134_v50 = vld [vmem:[#allocation2 + $0xa4] sm:$0x1] }
 0x121   :  { %v8120_v37 = vpop.f32.mrb[23].mxu0  ;;  %v8176_v52 = vpop.f32.mrb[23].mxu1  ;;  %67 = vst [vmem:[#allocation2 + $0x3c] sm:$0x8] %v66_v6 }
 0x122   :  { %v10310_v42 = vadd.f32 %v8120_v37, %v8119_v8  ;;  %v10319_v0 = vadd.f32 %v8174_v29, %v10209_v63  ;;  %v8177_v38 = vadd.f32 %v8176_v52, %v8175_v58  ;;  %v10335_v63 = vld [vmem:[%s11554_s4 + $0x80] sm:$0xff]   ;;  %v138_v52 = vsel %vm10220_vm2, 0, %v137_v31 }
 0x123   :  { %8694 = vmatprep.subr.bf16.mxu1 %v10335_v63  ;;  %139 = vst [vmem:[#allocation2 + $0xb0] sm:$0x1] %v138_v52 }
 0x124   :  { %v10328_v47 = vadd.f32 %v8177_v38, %v10214_v15 }
 0x126   :  { %v8122_v55 = vpop.f32.mrb[24].mxu0  ;;  %v8178_v30 = vpop.f32.mrb[24].mxu1 }
 0x127   :  { %v8123_v54 = vpop.f32.mrb[25].mxu0  ;;  %v8179_v22 = vpop.f32.mrb[25].mxu1 }
 0x128   :  { %v10321_v39 = vadd.f32 %v8123_v54, %v8122_v55  ;;  %v8125_v41 = vpop.f32.mrb[26].mxu0  ;;  %v8180_v14 = vadd.f32 %v8179_v22, %v8178_v30  ;;  %v8181_v53 = vpop.f32.mrb[26].mxu1  ;;  %v129_v55 = vsel %vm10220_vm2, 0, %v128_v17  ;;  %v72_v22 = vsel %vm10275_vm5, 0, %v71_v21 }
 0x129   :  { %v8126_v45 = vpop.f32.mrb[27].mxu0  ;;  %v8182_v57 = vpop.f32.mrb[27].mxu1  ;;  %130 = vst [vmem:[#allocation2 + $0x8c] sm:$0x1] %v129_v55  ;;  %73 = vst [vmem:[#allocation2 + $0x54] sm:$0x8] %v72_v22 }
 0x12a   :  { %v10330_v48 = vadd.f32 %v8126_v45, %v8125_v41  ;;  %v10339_v15 = vadd.f32 %v8180_v14, %v10226_v23  ;;  %v8183_v60 = vadd.f32 %v8182_v57, %v8181_v53  ;;  %v9149_v23 = vld [vmem:[%s11554_s4 + $0x40] sm:$0xff]   ;;  %v9315_v14 = vmov 0  }
 0x12b   :  { %8390 = vmatprep.subr.bf16.mxu0 %v9149_v23  ;;  %37 = vst [vmem:[#allocation2 + $0x4] sm:$0xf] %v9315_v14  ;;  %38 = vst [vmem:[#allocation2 + $0x8] sm:$0xf] %v9315_v14  ;;  %v149_v22 = vld [vmem:[#allocation2 + $0xe0] sm:$0x1] }
 0x12c   :  { %v10344_v27 = vadd.f32 %v8183_v60, %v10239_v51  ;;  %36 = vst [vmem:[#allocation2] sm:$0xf] %v9315_v14  ;;  %39 = vst [vmem:[#allocation2 + $0x78] sm:$0xf] %v9315_v14 }
 0x12d   :  { %40 = vst [vmem:[#allocation2 + $0x7c] sm:$0xf] %v9315_v14  ;;  %41 = vst [vmem:[#allocation2 + $0x80] sm:$0xf] %v9315_v14 }
 0x12e   :  { %v8128_v56 = vpop.f32.mrb[28].mxu0  ;;  %v8184_v12 = vpop.f32.mrb[28].mxu1  ;;  %43 = vst [vmem:[#allocation2 + $0x6c] sm:$0xf] %v9315_v14  ;;  %44 = vst [vmem:[#allocation2 + $0x70] sm:$0xf] %v9315_v14 }
 0x12f   :  { %v8129_v36 = vpop.f32.mrb[29].mxu0  ;;  %v8185_v24 = vpop.f32.mrb[29].mxu1  ;;  %45 = vst [vmem:[#allocation2 + $0x74] sm:$0xf] %v9315_v14  ;;  %46 = vst [vmem:[#allocation2 + $0xe4] sm:$0xf] %v9315_v14 }
 0x130   :  { %v10341_v2 = vadd.f32 %v8129_v36, %v8128_v56  ;;  %v8131_v5 = vpop.f32.mrb[30].mxu0  ;;  %v8186_v28 = vadd.f32 %v8185_v24, %v8184_v12  ;;  %v8187_v3 = vpop.f32.mrb[30].mxu1  ;;  %47 = vst [vmem:[#allocation2 + $0xe8] sm:$0xf] %v9315_v14  ;;  %48 = vst [vmem:[#allocation2 + $0xec] sm:$0xf] %v9315_v14 }
 0x131   :  { %v8132_v7 = vpop.f32.mrb[31].mxu0  ;;  %v8188_v9 = vpop.f32.mrb[31].mxu1  ;;  %v74_v56 = vld [vmem:[#allocation2 + $0x60] sm:$0x8] }
 0x132   :  { %v10346_v11 = vadd.f32 %v8132_v7, %v8131_v5  ;;  %v10354_v51 = vadd.f32 %v8186_v28, %v10248_v35  ;;  %v8189_v1 = vadd.f32 %v8188_v9, %v8187_v3  ;;  %v135_v35 = vsel %vm10220_vm2, 0, %v134_v50 }
 0x133   :  { %136 = vst [vmem:[#allocation2 + $0xa4] sm:$0x1] %v135_v35  ;;  %v75_v36 = vsel %vm10275_vm5, 0, %v74_v56 }
 0x134   :  { %v10359_v37 = vadd.f32 %v8189_v1, %v10259_v46  ;;  %76 = vst [vmem:[#allocation2 + $0x60] sm:$0x8] %v75_v36 }
 0x136   :  { %v8246_v8 = vpop.f32.mrb[32].mxu0  ;;  %v8190_v26 = vpop.f32.mrb[32].mxu1 }
 0x137   :  { %v8247_v4 = vpop.f32.mrb[33].mxu0  ;;  %v8191_v46 = vpop.f32.mrb[33].mxu1 }
 0x138   :  { %v8248_v16 = vadd.f32 %v8247_v4, %v8246_v8  ;;  %v8249_v49 = vpop.f32.mrb[34].mxu0  ;;  %v8192_v54 = vadd.f32 %v8191_v46, %v8190_v26  ;;  %v8193_v33 = vpop.f32.mrb[34].mxu1 }
 0x139   :  { %v8250_v19 = vpop.f32.mrb[35].mxu0  ;;  %v8194_v38 = vpop.f32.mrb[35].mxu1 }
 0x13a   :  { %v8251_v29 = vadd.f32 %v8250_v19, %v8249_v49  ;;  %v10364_v58 = vadd.f32 %v10298_v62, %v8248_v16  ;;  %v132_v62 = vsel %vm10220_vm2, 0, %v131_v13  ;;  %v10376_v41 = vadd.f32 %v8192_v54, %v10267_v32 }
 0x13b   :  { %133 = vst [vmem:[#allocation2 + $0x98] sm:$0x1] %v132_v62  ;;  %v8195_v44 = vadd.f32 %v8194_v38, %v8193_v33 }
 0x13c   :  { %v10371_v34 = vadd.f32 %v10308_v20, %v8251_v29 }
 0x13d   :  { %v10381_v32 = vadd.f32 %v8195_v44, %v10279_v59  ;;  %v140_v44 = vld [vmem:[#allocation2 + $0xbc] sm:$0x1] }
 0x13e   :  { %v8252_v45 = vpop.f32.mrb[36].mxu0  ;;  %v8196_v60 = vpop.f32.mrb[36].mxu1 }
 0x13f   :  { %v8253_v30 = vpop.f32.mrb[37].mxu0  ;;  %v8197_v12 = vpop.f32.mrb[37].mxu1 }
 0x140   :  { %v8254_v20 = vadd.f32 %v8253_v30, %v8252_v45  ;;  %v8255_v53 = vpop.f32.mrb[38].mxu0  ;;  %v8198_v24 = vadd.f32 %v8197_v12, %v8196_v60  ;;  %v8199_v25 = vpop.f32.mrb[38].mxu1 }
 0x141   :  { %v8256_v57 = vpop.f32.mrb[39].mxu0  ;;  %v8200_v28 = vpop.f32.mrb[39].mxu1 }
 0x142   :  { %v8257_v5 = vadd.f32 %v8256_v57, %v8255_v53  ;;  %v10386_v7 = vadd.f32 %v10319_v0, %v8254_v20  ;;  %v8814_v3 = vadd.f32 %v8198_v24, %v10300_v43  ;;  %v8201_v23 = vadd.f32 %v8200_v28, %v8199_v25  ;;  %v143_v20 = vld [vmem:[#allocation2 + $0xc8] sm:$0x1] }
 0x144   :  { %v10389_v59 = vadd.f32 %v10328_v47, %v8257_v5  ;;  %v8820_v61 = vadd.f32 %v8201_v23, %v10310_v42 }
 0x146   :  { %v8258_v6 = vpop.f32.mrb[40].mxu0  ;;  %v8202_v0 = vpop.f32.mrb[40].mxu1 }
 0x147   :  { %v8259_v9 = vpop.f32.mrb[41].mxu0  ;;  %v8203_v49 = vpop.f32.mrb[41].mxu1 }
 0x148   :  { %v8260_v1 = vadd.f32 %v8259_v9, %v8258_v6  ;;  %v8261_v8 = vpop.f32.mrb[42].mxu0  ;;  %v8204_v50 = vadd.f32 %v8203_v49, %v8202_v0  ;;  %v8205_v47 = vpop.f32.mrb[42].mxu1 }
 0x149   :  { %v8262_v18 = vpop.f32.mrb[43].mxu0  ;;  %v8206_v43 = vpop.f32.mrb[43].mxu1 }
 0x14a   :  { %v8263_v4 = vadd.f32 %v8262_v18, %v8261_v8  ;;  %v10394_v16 = vadd.f32 %v10339_v15, %v8260_v1  ;;  %v8829_v17 = vadd.f32 %v8204_v50, %v10321_v39  ;;  %v8207_v35 = vadd.f32 %v8206_v43, %v8205_v47  ;;  %v146_v39 = vld [vmem:[#allocation2 + $0xd4] sm:$0x1]  ;;  %v77_v50 = vld [vmem:[#allocation2 + $0x84] sm:$0x8] }
 0x14b   :  { %v78_v43 = vsel %vm10275_vm5, 0, %v77_v50 }
 0x14c   :  { %v10397_v19 = vadd.f32 %v10344_v27, %v8263_v4  ;;  %v8835_v29 = vadd.f32 %v8207_v35, %v10330_v48  ;;  %v147_v48 = vsel %vm10220_vm2, 0, %v146_v39  ;;  %v80_v35 = vld [vmem:[#allocation2 + $0x90] sm:$0x8]  ;;  %79 = vst [vmem:[#allocation2 + $0x84] sm:$0x8] %v78_v43 }
 0x14d   :  { %148 = vst [vmem:[#allocation2 + $0xd4] sm:$0x1] %v147_v48  ;;  %v10448_v48 = vld [vmem:[%s11556_s3] ss:$0 sm:$0xff] }
 0x14e   :  { %v8264_v26 = vpop.f32.mrb[44].mxu0  ;;  %v8208_v13 = vpop.f32.mrb[44].mxu1 }
 0x14f   :  { %v8265_v42 = vpop.f32.mrb[45].mxu0  ;;  %v8209_v54 = vpop.f32.mrb[45].mxu1 }
 0x150   :  { %v8266_v55 = vadd.f32 %v8265_v42, %v8264_v26  ;;  %v8267_v31 = vpop.f32.mrb[46].mxu0  ;;  %v8210_v33 = vadd.f32 %v8209_v54, %v8208_v13  ;;  %v8211_v27 = vpop.f32.mrb[46].mxu1  ;;  %v2447_v26 = vld [vmem:[#allocation2 + $0x4] sm:$0xf]  ;;  %v81_v42 = vsel %vm10275_vm5, 0, %v80_v35 }
 0x151   :  { %v8268_v46 = vpop.f32.mrb[47].mxu0  ;;  %v8212_v38 = vpop.f32.mrb[47].mxu1  ;;  %82 = vst [vmem:[#allocation2 + $0x90] sm:$0x8] %v81_v42 }
 0x152   :  { %v8269_v15 = vadd.f32 %v8268_v46, %v8267_v31  ;;  %v10402_v52 = vadd.f32 %v10354_v51, %v8266_v55  ;;  %v8826_v45 = vadd.f32 %v8210_v33, %v10341_v2  ;;  %v8213_v21 = vadd.f32 %v8212_v38, %v8211_v27  ;;  %v10442_v33 = vld [vmem:[%s11555_s2] ss:$0 sm:$0xff] }
 0x153   :  { %v141_v51 = vsel %vm10220_vm2, 0, %v140_v44  ;;  %v144_v2 = vsel %vm10220_vm2, 0, %v143_v20  ;;  %v83_v20 = vld [vmem:[#allocation2 + $0x9c] sm:$0x8] }
 0x154   :  { %v10405_v62 = vadd.f32 %v10359_v37, %v8269_v15  ;;  %142 = vst [vmem:[#allocation2 + $0xbc] sm:$0x1] %v141_v51  ;;  %v150_v37 = vsel %vm10220_vm2, 0, %v149_v22  ;;  %v8832_v53 = vadd.f32 %v8213_v21, %v10346_v11  ;;  %145 = vst [vmem:[#allocation2 + $0xc8] sm:$0x1] %v144_v2 }
 0x155   :  { %151 = vst [vmem:[#allocation2 + $0xe0] sm:$0x1] %v150_v37  ;;  %v86_v2 = vld [vmem:[#allocation2 + $0xa8] sm:$0x8] }
 0x156   :  { %v8270_v30 = vpop.f32.mrb[48].mxu0 }
 0x157   :  { %v8271_v14 = vpop.f32.mrb[49].mxu0 }
 0x158   :  { %v8272_v56 = vadd.f32 %v8271_v14, %v8270_v30  ;;  %v8273_v57 = vpop.f32.mrb[50].mxu0 }
 0x159   :  { %v8274_v36 = vpop.f32.mrb[51].mxu0 }
 0x15a   :  { %v8275_v60 = vadd.f32 %v8274_v36, %v8273_v57  ;;  %v10418_v5 = vadd.f32 %v10376_v41, %v8272_v56  ;;  %v84_v56 = vsel %vm10275_vm5, 0, %v83_v20 }
 0x15b   :  { %85 = vst [vmem:[#allocation2 + $0x9c] sm:$0x8] %v84_v56 }
 0x15c   :  { %v10421_v12 = vadd.f32 %v10381_v32, %v8275_v60  ;;  %v87_v60 = vsel %vm10275_vm5, 0, %v86_v2 }
 0x15d   :  { %88 = vst [vmem:[#allocation2 + $0xa8] sm:$0x8] %v87_v60 }
 0x15e   :  { %v8276_v24 = vpop.f32.mrb[52].mxu0 }
 0x15f   :  { %v8277_v25 = vpop.f32.mrb[53].mxu0 }
 0x160   :  { %v8278_v28 = vadd.f32 %v8277_v25, %v8276_v24  ;;  %v8279_v23 = vpop.f32.mrb[54].mxu0 }
 0x161   :  { %v8280_v11 = vpop.f32.mrb[55].mxu0 }
 0x162   :  { %v8281_v6 = vadd.f32 %v8280_v11, %v8279_v23  ;;  %v10423_v9 = vadd.f32 %v8814_v3, %v8278_v28 }
 0x164   :  { %v10425_v10 = vadd.f32 %v8820_v61, %v8281_v6  ;;  %v2448_v61 = vld [vmem:[#allocation2 + $0x8] sm:$0xf] }
 0x165   :  { %v7315_v13 = vcombine.low %v2447_v26, %v2448_v61 }
 0x166   :  { %v8282_v1 = vpop.f32.mrb[56].mxu0 }
 0x167   :  { %v8283_v8 = vpop.f32.mrb[57].mxu0  ;;  %v2598_v54 = vrot.slane %v7315_v13, 5 }
 0x168   :  { %v8284_v18 = vadd.f32 %v8283_v8, %v8282_v1  ;;  %v8285_v0 = vpop.f32.mrb[58].mxu0 }
 0x169   :  { %v8286_v4 = vpop.f32.mrb[59].mxu0  ;;  %v7327_v39 = vcombine.high %v2598_v54, %v2598_v54  ;;  %v7324_v14 = vcombine.low %v2598_v54, %v2598_v54 }
 0x16a   :  { %v8287_v41 = vadd.f32 %v8286_v4, %v8285_v0  ;;  %v10427_v49 = vadd.f32 %v8829_v17, %v8284_v18 }
 0x16b   :  { %v2686_v11 = vshrl.u32 %v7324_v14, 16  ;;  %v2694_v4 = vshll.u32 %v7327_v39, 16 }
 0x16c   :  { %v10429_v32 = vadd.f32 %v8835_v29, %v8287_v41 }
 0x16e   :  { %v8288_v47 = vpop.f32.mrb[60].mxu0 }
 0x16f   :  { %v8289_v3 = vpop.f32.mrb[61].mxu0 }
 0x170   :  { %v8290_v55 = vadd.f32 %v8289_v3, %v8288_v47  ;;  %v8291_v31 = vpop.f32.mrb[62].mxu0 }
 0x171   :  { %v8292_v17 = vpop.f32.mrb[63].mxu0 }
 0x172   :  { %v8293_v46 = vadd.f32 %v8292_v17, %v8291_v31  ;;  %v10435_v29 = vadd.f32 %v8826_v45, %v8290_v55  ;;  %v7364_v17 = vrot.slane %v2686_v11, 11 }
 0x174   :  { %v10437_v15 = vadd.f32 %v8832_v53, %v8293_v46  ;;  %v2691_v53 = vshrl.u32 %v7327_v39, 16  ;;  %v10481_v39 = vld [vmem:[#allocation2 + $0x7c] sm:$0xf] }
 0x176   :  { %v8648_v27 = vpop.f32.mrb[0].mxu1  ;;  %v2693_v6 = vrot.slane %v2691_v53, 7 }
 0x177   :  { %v8792_v38 = vadd.f32 %v10386_v7, %v8648_v27  ;;  %v2274_v44 = vpop.f32.mrb[1].mxu1 }
 0x178   :  { %v8795_v45 = vadd.f32 %v10364_v58, %v2274_v44  ;;  %v8649_v21 = vpop.f32.mrb[2].mxu1  ;;  %v2696_v46 = vor.u32 %v2694_v4, %v2693_v6 }
 0x179   :  { %v2361_v30 = vmul.f32 %v8792_v38, %v10442_v33  ;;  %v8798_v51 = vadd.f32 %v10389_v59, %v8649_v21  ;;  %v2277_v22 = vpop.f32.mrb[3].mxu1  ;;  %v10483_v38 = vld [vmem:[#allocation2 + $0x80] sm:$0xf] }
 0x17a   :  { %v2359_v37 = vmul.f32 %v8795_v45, %v10442_v33  ;;  %v8801_v7 = vadd.f32 %v10371_v34, %v2277_v22 }
 0x17b   :  { %v2383_v57 = vadd.f32 %v10448_v48, %v2361_v30  ;;  %v2362_v58 = vmul.f32 %v8798_v51, %v10442_v33  ;;  %v3465_v30 = vld [vmem:[#allocation2 + $0x2c] sm:$0xf] }
 0x17c   :  { %v2381_v36 = vadd.f32 %v10448_v48, %v2359_v37  ;;  %v2360_v59 = vmul.f32 %v8801_v7, %v10442_v33  ;;  %v3459_v37 = vld [vmem:[#allocation2 + $0x14] sm:$0xf]  ;;  %v10489_v7 = vsel %vm10476_vm7, %v7364_v17, %v2696_v46 }
 0x17d   :  { %v2399_v24 = vmax.f32 %v2383_v57, 0.0  ;;  %v2384_v34 = vadd.f32 %v10448_v48, %v2362_v58 }
 0x17e   :  { %v2397_v25 = vmax.f32 %v2381_v36, 0.0  ;;  %v2382_v28 = vadd.f32 %v10448_v48, %v2360_v59  ;;  %v8652_v23 = vpop.f32.mrb[4].mxu1  ;;  %v3468_v36 = vld [vmem:[#allocation2 + $0x38] sm:$0xf]  ;;  %v7387_v59 = vcombine.low %v10481_v39, %v10483_v38 }
 0x17f   :  { %v2415_v1 = vpack.c.bf16 %v2399_v24, %v2399_v24  ;;  %v2400_v8 = vmax.f32 %v2384_v34, 0.0  ;;  %v8804_v18 = vadd.f32 %v10402_v52, %v8652_v23  ;;  %v2290_v0 = vpop.f32.mrb[5].mxu1 }
 0x180   :  { %v2413_v41 = vpack.c.bf16 %v2397_v25, %v2397_v25  ;;  %v2398_v50 = vmax.f32 %v2382_v28, 0.0  ;;  %v8807_v47 = vadd.f32 %v10394_v16, %v2290_v0  ;;  %v8653_v43 = vpop.f32.mrb[6].mxu1  ;;  %v3462_v28 = vld [vmem:[#allocation2 + $0x20] sm:$0xf] }
 0x181   :  { %2423 = vst [vmem:[#allocation2 + $0x28] sm:$0xf] %v2415_v1  ;;  %v2416_v35 = vpack.c.bf16 %v2400_v8, %v2400_v8  ;;  %v2365_v3 = vmul.f32 %v8804_v18, %v10442_v33  ;;  %v8810_v26 = vadd.f32 %v10405_v62, %v8653_v43  ;;  %v2293_v61 = vpop.f32.mrb[7].mxu1 }
 0x182   :  { %2421 = vst [vmem:[#allocation2 + $0x10] sm:$0xf] %v2413_v41  ;;  %v2414_v42 = vpack.c.bf16 %v2398_v50, %v2398_v50  ;;  %v2363_v55 = vmul.f32 %v8807_v47, %v10442_v33  ;;  %v8813_v52 = vadd.f32 %v10397_v19, %v2293_v61 }
 0x183   :  { %2424 = vst [vmem:[#allocation2 + $0x34] sm:$0xf] %v2416_v35  ;;  %v2387_v31 = vadd.f32 %v10448_v48, %v2365_v3  ;;  %v2366_v16 = vmul.f32 %v8810_v26, %v10442_v33 }
 0x184   :  { %2422 = vst [vmem:[#allocation2 + $0x1c] sm:$0xf] %v2414_v42  ;;  %v2385_v13 = vadd.f32 %v10448_v48, %v2363_v55  ;;  %v2364_v62 = vmul.f32 %v8813_v52, %v10442_v33 }
 0x185   :  { %v2403_v27 = vmax.f32 %v2387_v31, 0.0  ;;  %v2388_v19 = vadd.f32 %v10448_v48, %v2366_v16 }
 0x186   :  { %v2401_v44 = vmax.f32 %v2385_v13, 0.0  ;;  %v2386_v45 = vadd.f32 %v10448_v48, %v2364_v62  ;;  %v8656_v21 = vpop.f32.mrb[8].mxu1 }
 0x187   :  { %v2419_v51 = vpack.c.bf16 %v2403_v27, %v2403_v27  ;;  %v2404_v22 = vmax.f32 %v2388_v19, 0.0  ;;  %v8816_v14 = vadd.f32 %v10423_v9, %v8656_v21  ;;  %v2306_v20 = vpop.f32.mrb[9].mxu1 }
 0x188   :  { %v2417_v53 = vpack.c.bf16 %v2401_v44, %v2401_v44  ;;  %v2402_v56 = vmax.f32 %v2386_v45, 0.0  ;;  %v8819_v57 = vadd.f32 %v10418_v5, %v2306_v20  ;;  %v8657_v58 = vpop.f32.mrb[10].mxu1  ;;  %v10492_v2 = vld [vmem:[#allocation2 + $0x28] sm:$0xf] }
 0x189   :  { %2427 = vst [vmem:[#allocation2 + $0x58] sm:$0xf] %v2419_v51  ;;  %v2420_v60 = vpack.c.bf16 %v2404_v22, %v2404_v22  ;;  %v2369_v9 = vmul.f32 %v8816_v14, %v10442_v33  ;;  %v8822_v24 = vadd.f32 %v10425_v10, %v8657_v58  ;;  %v2309_v34 = vpop.f32.mrb[11].mxu1  ;;  %v10498_v25 = vld [vmem:[#allocation2 + $0x10] sm:$0xf]  ;;  %v7485_v23 = vcombine.low %v10492_v2, %v3465_v30 }
 0x18a   :  { %2425 = vst [vmem:[#allocation2 + $0x40] sm:$0xf] %v2417_v53  ;;  %v2418_v5 = vpack.c.bf16 %v2402_v56, %v2402_v56  ;;  %v2367_v11 = vmul.f32 %v8819_v57, %v10442_v33  ;;  %v8825_v6 = vadd.f32 %v10421_v12, %v2309_v34  ;;  %v7483_v1 = vcombine.low %v10498_v25, %v3459_v37  ;;  %v10504_v8 = vld [vmem:[#allocation2 + $0x34] sm:$0xf] }
 0x18b   :  { %2428 = vst [vmem:[#allocation2 + $0x64] sm:$0xf] %v2420_v60  ;;  %v2391_v18 = vadd.f32 %v10448_v48, %v2369_v9  ;;  %v2370_v10 = vmul.f32 %v8822_v24, %v10442_v33  ;;  %v10508_v0 = vld [vmem:[#allocation2 + $0x1c] sm:$0xf]  ;;  %v7486_v4 = vcombine.low %v10504_v8, %v3468_v36  ;;  %v10511_v41 = vrot.slane %v7485_v23, 5 }
 0x18c   :  { %2426 = vst [vmem:[#allocation2 + $0x4c] sm:$0xf] %v2418_v5  ;;  %v2389_v50 = vadd.f32 %v10448_v48, %v2367_v11  ;;  %v2368_v12 = vmul.f32 %v8825_v6, %v10442_v33  ;;  %v7484_v47 = vcombine.low %v10508_v0, %v3462_v28  ;;  %v3609_v43 = vrot.slane %v7483_v1, 5 }
 0x18d   :  { %v2407_v35 = vmax.f32 %v2391_v18, 0.0  ;;  %v2392_v3 = vadd.f32 %v10448_v48, %v2370_v10  ;;  %v10517_v26 = vrot.slane %v7486_v4, 5  ;;  %v7502_v61 = vcombine.low %v10511_v41, %v10511_v41 }
 0x18e   :  { %v2405_v42 = vmax.f32 %v2389_v50, 0.0  ;;  %v2390_v55 = vadd.f32 %v10448_v48, %v2368_v12  ;;  %v8660_v52 = vpop.f32.mrb[12].mxu1  ;;  %v3610_v31 = vrot.slane %v7484_v47, 5  ;;  %v7492_v16 = vcombine.low %v3609_v43, %v3609_v43 }
 0x18f   :  { %v2431_v17 = vpack.c.bf16 %v2407_v35, %v2407_v35  ;;  %v2408_v46 = vmax.f32 %v2392_v3, 0.0  ;;  %v8828_v13 = vadd.f32 %v10435_v29, %v8660_v52  ;;  %v2322_v62 = vpop.f32.mrb[13].mxu1  ;;  %v7495_v27 = vcombine.high %v3609_v43, %v3609_v43 }
 0x190   :  { %v2429_v19 = vpack.c.bf16 %v2405_v42, %v2405_v42  ;;  %v2406_v44 = vmax.f32 %v2390_v55, 0.0  ;;  %v8831_v45 = vadd.f32 %v10427_v49, %v2322_v62  ;;  %v8661_v21 = vpop.f32.mrb[14].mxu1  ;;  %v7497_v30 = vcombine.low %v3610_v31, %v3610_v31 }
 0x191   :  { %2440 = vst [vmem:[#allocation2 + $0xa0] sm:$0xf] %v2431_v17  ;;  %v2432_v51 = vpack.c.bf16 %v2408_v46, %v2408_v46  ;;  %v2373_v22 = vmul.f32 %v8828_v13, %v10442_v33  ;;  %v8834_v14 = vadd.f32 %v10437_v15, %v8661_v21  ;;  %v2325_v20 = vpop.f32.mrb[15].mxu1  ;;  %v7500_v37 = vcombine.high %v3610_v31, %v3610_v31 }
 0x192   :  { %2438 = vst [vmem:[#allocation2 + $0x88] sm:$0xf] %v2429_v19  ;;  %v2430_v53 = vpack.c.bf16 %v2406_v44, %v2406_v44  ;;  %v2371_v29 = vmul.f32 %v8831_v45, %v10442_v33  ;;  %v8837_v56 = vadd.f32 %v10429_v32, %v2325_v20  ;;  %v3695_v57 = vshrl.u32 %v7492_v16, 16 }
 0x193   :  { %2441 = vst [vmem:[#allocation2 + $0xac] sm:$0xf] %v2432_v51  ;;  %v2395_v49 = vadd.f32 %v10448_v48, %v2373_v22  ;;  %v2374_v58 = vmul.f32 %v8834_v14, %v10442_v33  ;;  %v3700_v36 = vshrl.u32 %v7495_v27, 16  ;;  %v3703_v60 = vshll.u32 %v7495_v27, 16 }
 0x194   :  { %2439 = vst [vmem:[#allocation2 + $0x94] sm:$0xf] %v2430_v53  ;;  %v2393_v9 = vadd.f32 %v10448_v48, %v2371_v29  ;;  %v2372_v15 = vmul.f32 %v8837_v56, %v10442_v33  ;;  %v7532_v24 = vrot.slane %v3695_v57, 11  ;;  %v3721_v34 = vshrl.u32 %v7497_v30, 16  ;;  %v10554_v53 = vld [vmem:[#allocation2 + $0x50] sm:$0xf] }
 0x195   :  { %v2411_v28 = vmax.f32 %v2395_v49, 0.0  ;;  %v2396_v23 = vadd.f32 %v10448_v48, %v2374_v58  ;;  %v3702_v5 = vrot.slane %v3700_v36, 7  ;;  %v3726_v32 = vshrl.u32 %v7500_v37, 16  ;;  %v10556_v58 = vld [vmem:[#allocation2 + $0x40] sm:$0xf] }
 0x196   :  { %v2409_v11 = vmax.f32 %v2393_v9, 0.0  ;;  %v2394_v6 = vadd.f32 %v10448_v48, %v2372_v15  ;;  %v7534_v1 = vrot.slane %v3721_v34, 11  ;;  %v3729_v18 = vshll.u32 %v7500_v37, 16  ;;  %v10552_v37 = vld [vmem:[#allocation2 + $0x44] sm:$0xf] }
 0x197   :  { %v2435_v10 = vpack.c.bf16 %v2411_v28, %v2411_v28  ;;  %v2412_v4 = vmax.f32 %v2396_v23, 0.0  ;;  %v3705_v50 = vor.u32 %v3703_v60, %v3702_v5  ;;  %v3728_v12 = vrot.slane %v3726_v32, 7  ;;  %v3457_v28 = vld [vmem:[#allocation2 + $0xc] sm:$0xf] }
 0x198   :  { %v2433_v47 = vpack.c.bf16 %v2409_v11, %v2409_v11  ;;  %v2410_v43 = vmax.f32 %v2394_v6, 0.0  ;;  %v7505_v33 = vcombine.high %v10511_v41, %v10511_v41  ;;  %v7507_v35 = vcombine.low %v10517_v26, %v10517_v26  ;;  %v3460_v6 = vld [vmem:[#allocation2 + $0x18] sm:$0xf] }
 0x199   :  { %2444 = vst [vmem:[#allocation2 + $0xd0] sm:$0xf] %v2435_v10  ;;  %v2436_v3 = vpack.c.bf16 %v2412_v4, %v2412_v4  ;;  %v3706_v42 = vsel %vm10476_vm7, %v7532_v24, %v3705_v50  ;;  %v3731_v48 = vor.u32 %v3729_v18, %v3728_v12  ;;  %v7510_v55 = vcombine.high %v10517_v26, %v10517_v26  ;;  %v10560_v24 = vld [vmem:[#allocation2 + $0x4c] sm:$0xf] }
 0x19a   :  { %2442 = vst [vmem:[#allocation2 + $0xb8] sm:$0xf] %v2433_v47  ;;  %v2434_v52 = vpack.c.bf16 %v2410_v43, %v2410_v43  ;;  %v3747_v31 = vshrl.u32 %v7502_v61, 16  ;;  %v3752_v16 = vshrl.u32 %v7505_v33, 16  ;;  %v3755_v17 = vshll.u32 %v7505_v33, 16  ;;  %v9152_v4 = vld [vmem:[%s11554_s4 + $0x88] sm:$0xff]  }
 0x19b   :  { %2445 = vst [vmem:[#allocation2 + $0xdc] sm:$0xf] %v2436_v3  ;;  %v3732_v41 = vsel %vm10476_vm7, %v7534_v1, %v3731_v48  ;;  %v3773_v46 = vshrl.u32 %v7507_v35, 16  ;;  %v3778_v13 = vshrl.u32 %v7510_v55, 16  ;;  %v3781_v62 = vshll.u32 %v7510_v55, 16 }
 0x19c   :  { %2443 = vst [vmem:[#allocation2 + $0xc4] sm:$0xf] %v2434_v52  ;;  %v7621_v27 = vcombine.low %v3706_v42, %v3732_v41  ;;  %v7536_v19 = vrot.slane %v3747_v31, 11  ;;  %v3754_v44 = vrot.slane %v3752_v16, 7  ;;  %v7475_v26 = vcombine.low %v10498_v25, %v10498_v25  ;;  %v3463_v3 = vld [vmem:[#allocation2 + $0x24] sm:$0xf] }
 0x19d   :  { %v7538_v45 = vrot.slane %v3773_v46, 11  ;;  %v3780_v21 = vrot.slane %v3778_v13, 7  ;;  %v7476_v61 = vcombine.low %v10508_v0, %v10508_v0  ;;  %v7477_v30 = vcombine.low %v10492_v2, %v10492_v2 }
 0x19e   :  { %8678 = vmatprep.mubr.bf16.mxu1 %v7621_v27  ;;  %v3757_v51 = vor.u32 %v3755_v17, %v3754_v44  ;;  %v3522_v22 = vshrl.u32 %v7475_v26, 16  ;;  %v3525_v14 = vshll.u32 %v7475_v26, 16  ;;  %v7478_v20 = vcombine.low %v10504_v8, %v10504_v8 }
 0x19f   :  { %v3783_v29 = vor.u32 %v3781_v62, %v3780_v21  ;;  %v3530_v56 = vshrl.u32 %v7476_v61, 16  ;;  %v3533_v57 = vshll.u32 %v7476_v61, 16  ;;  %v3538_v49 = vshrl.u32 %v7477_v30, 16 }
 0x1a0   :  { %v3758_v36 = vsel %vm10476_vm7, %v7536_v19, %v3757_v51  ;;  %v3524_v60 = vrot.slane %v3522_v22, 4  ;;  %v3527_v9 = vrot.slane %v3525_v14, 5  ;;  %v3541_v15 = vshll.u32 %v7477_v30, 16  ;;  %v3466_v19 = vld [vmem:[#allocation2 + $0x30] sm:$0xf] }
 0x1a1   :  { %v3784_v34 = vsel %vm10476_vm7, %v7538_v45, %v3783_v29  ;;  %v3532_v23 = vrot.slane %v3530_v56, 4  ;;  %v3535_v5 = vrot.slane %v3533_v57, 5  ;;  %v3540_v32 = vrot.slane %v3538_v49, 4 }
 0x1a2   :  { %v7624_v11 = vcombine.low %v3758_v36, %v3784_v34  ;;  %v3528_v1 = vor.u32 %v3527_v9, %v3524_v60  ;;  %v3543_v18 = vrot.slane %v3541_v15, 5  ;;  %v3546_v10 = vshrl.u32 %v7478_v20, 16  ;;  %v3477_v36 = vld [vmem:[#allocation2 + $0x5c] sm:$0xf] }
 0x1a3   :  { %v3536_v50 = vor.u32 %v3535_v5, %v3532_v23  ;;  %v3549_v12 = vshll.u32 %v7478_v20, 16  ;;  %v7487_v47 = vcombine.low %v10556_v58, %v10552_v37  ;;  %v7488_v43 = vcombine.low %v10560_v24, %v10554_v53 }
 0x1a4   :  { %8679 = vmatmul.mubr.bf16.vlgmr.msra.gmra.mrb[48].mxu1 %v7624_v11  ;;  %v7491_v33 = vcombine.low %v3457_v28, %v3528_v1  ;;  %v7494_v35 = vsel %vm7325_vm8, %v10498_v25, %v3528_v1  ;;  %v3544_v42 = vor.u32 %v3543_v18, %v3540_v32  ;;  %v3548_v48 = vrot.slane %v3546_v10, 4  ;;  %v9157_v25 = vld [vmem:[%s11554_s4 + $0x90] sm:$0xff]   ;;  %v3480_v28 = vld [vmem:[#allocation2 + $0x68] sm:$0xf]  ;;  %v9151_v11 = vld [vmem:[%s11554_s4] sm:$0xff]  }
 0x1a5   :  { %8695 = vmatpush3.bf16.msra.mxu1 %v10335_v63  ;;  %v7496_v55 = vcombine.low %v3460_v6, %v3536_v50  ;;  %v7499_v52 = vsel %vm7325_vm8, %v10508_v0, %v3536_v50  ;;  %v3687_v31 = vshrl.u32 %v7494_v35, 16  ;;  %v3690_v16 = vshll.u32 %v7494_v35, 16  ;;  %v10595_v1 = vld [vmem:[#allocation2 + $0x64] sm:$0xf] }
 0x1a6   :  { %v3682_v17 = vshrl.u32 %v7491_v33, 16  ;;  %v3713_v41 = vshrl.u32 %v7499_v52, 16  ;;  %v3716_v46 = vshll.u32 %v7499_v52, 16  ;;  %v3551_v13 = vrot.slane %v3549_v12, 5  ;;  %8696 = vmatprep.subr.bf16.mxu1 %v9152_v4  ;;  %v9158_v12 = vld [vmem:[%s11554_s4 + $0x48] sm:$0xff]  }
 0x1a7   :  { %v3689_v62 = vrot.slane %v3687_v31, 7  ;;  %v3708_v27 = vshrl.u32 %v7496_v55, 16  ;;  %v7501_v44 = vcombine.low %v3463_v3, %v3544_v42  ;;  %v7504_v63 = vsel %vm7325_vm8, %v10492_v2, %v3544_v42  ;;  %v9161_v2 = vld [vmem:[%s11554_s4 + $0x98] sm:$0xff]  }
 0x1a8   :  { %v7531_v26 = vrot.slane %v3682_v17, 11  ;;  %v3715_v0 = vrot.slane %v3713_v41, 7  ;;  %v3552_v45 = vor.u32 %v3551_v13, %v3548_v48  ;;  %v3739_v21 = vshrl.u32 %v7504_v63, 16 }
 0x1a9   :  { %v3692_v61 = vor.u32 %v3690_v16, %v3689_v62  ;;  %v7533_v30 = vrot.slane %v3708_v27, 11  ;;  %v3734_v51 = vshrl.u32 %v7501_v44, 16  ;;  %v3742_v22 = vshll.u32 %v7504_v63, 16  ;;  %8697 = vmatpush3.bf16.msra.mxu1 %v9152_v4 }
 0x1aa   :  { %v3718_v14 = vor.u32 %v3716_v46, %v3715_v0  ;;  %v7506_v20 = vcombine.low %v3466_v19, %v3552_v45  ;;  %v7509_v37 = vsel %vm7325_vm8, %v10504_v8, %v3552_v45  ;;  %v3741_v53 = vrot.slane %v3739_v21, 7  ;;  %8698 = vmatprep.subr.bf16.mxu1 %v9157_v25  ;;  %v10590_v8 = vld [vmem:[#allocation2 + $0x58] sm:$0xf]  ;;  %v9160_v46 = vld [vmem:[%s11554_s4 + $0x8] sm:$0xff]   ;;  %v9167_v19 = vld [vmem:[%s11554_s4 + $0x50] sm:$0xff]  }
 0x1ab   :  { %v3693_v29 = vsel %vm10476_vm7, %v7531_v26, %v3692_v61  ;;  %v7535_v56 = vrot.slane %v3734_v51, 11  ;;  %v3765_v57 = vshrl.u32 %v7509_v37, 16  ;;  %v3768_v49 = vshll.u32 %v7509_v37, 16  ;;  %v9170_v45 = vld [vmem:[%s11554_s4 + $0xa8] sm:$0xff]  }
 0x1ac   :  { %v3719_v60 = vsel %vm10476_vm7, %v7533_v30, %v3718_v14  ;;  %v3744_v9 = vor.u32 %v3742_v22, %v3741_v53  ;;  %v3760_v15 = vshrl.u32 %v7506_v20, 16  ;;  %v3613_v34 = vrot.slane %v7487_v47, 5  ;;  %v9166_v47 = vld [vmem:[%s11554_s4 + $0xa0] sm:$0xff]   ;;  %v3891_v53 = vld [vmem:[#allocation2 + $0x8c] sm:$0xf] }
 0x1ad   :  { %v7619_v23 = vcombine.low %v3693_v29, %v3719_v60  ;;  %v7620_v5 = vcombine.high %v3693_v29, %v3719_v60  ;;  %v3767_v32 = vrot.slane %v3765_v57, 7  ;;  %v3614_v6 = vrot.slane %v7488_v43, 5  ;;  %8699 = vmatpush3.bf16.msra.mxu1 %v9157_v25  ;;  %v9175_v60 = vld [vmem:[%s11554_s4 + $0xb0] sm:$0xff]  }
 0x1ae   :  { %v10599_v18 = vsel %vm10476_vm7, %v7535_v56, %v3744_v9  ;;  %v7537_v10 = vrot.slane %v3760_v15, 11  ;;  %v7512_v4 = vcombine.low %v3613_v34, %v3613_v34  ;;  %v7515_v50 = vcombine.high %v3613_v34, %v3613_v34  ;;  %8700 = vmatprep.subr.bf16.mxu1 %v9161_v2 }
 0x1af   :  { %4642 = vmatprep.mubr.bf16.mxu0 %v7620_v5  ;;  %v3770_v43 = vor.u32 %v3768_v49, %v3767_v32  ;;  %v7517_v33 = vcombine.low %v3614_v6, %v3614_v6  ;;  %v7520_v35 = vcombine.high %v3614_v6, %v3614_v6  ;;  %v7489_v3 = vcombine.low %v10590_v8, %v3477_v36  ;;  %v3894_v36 = vld [vmem:[#allocation2 + $0x98] sm:$0xf]  ;;  %v10638_v5 = vld [vmem:[#allocation2 + $0xa4] sm:$0xf] }
 0x1b0   :  { %4643 = vmatmul.mubr.bf16.vlgmr.msra.gmra.mrb[64].mxu0 %v7619_v23  ;;  %v3799_v42 = vshrl.u32 %v7512_v4, 16  ;;  %v3804_v48 = vshrl.u32 %v7515_v50, 16  ;;  %v3807_v55 = vshll.u32 %v7515_v50, 16  ;;  %v7490_v52 = vcombine.low %v10595_v1, %v3480_v28  ;;  %v10636_v23 = vld [vmem:[#allocation2 + $0x88] sm:$0xf]  ;;  %v9178_v32 = vld [vmem:[%s11554_s4 + $0x58] sm:$0xff]  }
 0x1b1   :  { %v3771_v31 = vsel %vm10476_vm7, %v7537_v10, %v3770_v43  ;;  %8391 = vmatpush3.bf16.msra.mxu0 %v9151_v11  ;;  %v3825_v16 = vshrl.u32 %v7517_v33, 16  ;;  %v3830_v17 = vshrl.u32 %v7520_v35, 16  ;;  %v3833_v41 = vshll.u32 %v7520_v35, 16  ;;  %8701 = vmatpush3.bf16.msra.mxu1 %v9161_v2  ;;  %v9169_v2 = vld [vmem:[%s11554_s4 + $0x10] sm:$0xff]   ;;  %v9180_v50 = vld [vmem:[%s11554_s4 + $0x18] sm:$0xff]  }
 0x1b2   :  { %v7623_v13 = vcombine.high %v10599_v18, %v3771_v31  ;;  %v7540_v25 = vrot.slane %v3799_v42, 11  ;;  %v3806_v62 = vrot.slane %v3804_v48, 7  ;;  %v3615_v27 = vrot.slane %v7489_v3, 5  ;;  %8392 = vmatprep.subr.bf16.mxu0 %v9158_v12  ;;  %8702 = vmatprep.subr.bf16.mxu1 %v9166_v47  ;;  %v10643_v4 = vld [vmem:[#allocation2 + $0x94] sm:$0xf] }
 0x1b3   :  { %v7542_v44 = vrot.slane %v3825_v16, 11  ;;  %v3832_v63 = vrot.slane %v3830_v17, 7  ;;  %v3616_v26 = vrot.slane %v7490_v52, 5  ;;  %v7622_v0 = vcombine.low %v10599_v18, %v3771_v31  ;;  %v10648_v35 = vld [vmem:[#allocation2 + $0xa0] sm:$0xf] }
 0x1b4   :  { %4650 = vmatprep.mubr.bf16.mxu0 %v7623_v13  ;;  %v3809_v21 = vor.u32 %v3807_v55, %v3806_v62  ;;  %v7522_v61 = vcombine.low %v3615_v27, %v3615_v27  ;;  %v7525_v30 = vcombine.high %v3615_v27, %v3615_v27  ;;  %v7479_v51 = vcombine.low %v10556_v58, %v10556_v58  ;;  %v10651_v52 = vld [vmem:[#allocation2 + $0xac] sm:$0xf]  ;;  %v10653_v31 = vld [vmem:[#allocation2 + $0xb0] sm:$0xf]  ;;  %v9181_v13 = vld [vmem:[%s11554_s4 + $0xb8] sm:$0xff]  }
 0x1b5   :  { %v3835_v22 = vor.u32 %v3833_v41, %v3832_v63  ;;  %v7527_v14 = vcombine.low %v3616_v26, %v3616_v26  ;;  %v7530_v20 = vcombine.high %v3616_v26, %v3616_v26  ;;  %v7480_v37 = vcombine.low %v10560_v24, %v10560_v24  ;;  %8393 = vmatpush3.bf16.msra.mxu0 %v9160_v46  ;;  %v3469_v62 = vld [vmem:[#allocation2 + $0x3c] sm:$0xf]  ;;  %v9188_v63 = vld [vmem:[%s11554_s4 + $0x60] sm:$0xff]  }
 0x1b6   :  { %v3810_v29 = vsel %vm10476_vm7, %v7540_v25, %v3809_v21  ;;  %v3851_v56 = vshrl.u32 %v7522_v61, 16  ;;  %v3856_v57 = vshrl.u32 %v7525_v30, 16  ;;  %v3859_v49 = vshll.u32 %v7525_v30, 16  ;;  %8703 = vmatpush3.bf16.msra.mxu1 %v9166_v47  ;;  %8394 = vmatprep.subr.bf16.mxu0 %v9167_v19  ;;  %v9190_v30 = vld [vmem:[%s11554_s4 + $0x20] sm:$0xff]  }
 0x1b7   :  { %v3836_v9 = vsel %vm10476_vm7, %v7542_v44, %v3835_v22  ;;  %v3877_v15 = vshrl.u32 %v7527_v14, 16  ;;  %v3882_v34 = vshrl.u32 %v7530_v20, 16  ;;  %v3885_v28 = vshll.u32 %v7530_v20, 16  ;;  %8704 = vmatprep.subr.bf16.mxu1 %v9170_v45 }
 0x1b8   :  { %v7627_v11 = vcombine.low %v3810_v29, %v3836_v9  ;;  %v7544_v6 = vrot.slane %v3851_v56, 11  ;;  %v3858_v18 = vrot.slane %v3856_v57, 7  ;;  %4651 = vmatmul.mubr.bf16.gmra.mrb[68].mxu0 %v7622_v0  ;;  %v3554_v10 = vshrl.u32 %v7479_v51, 16  ;;  %v3472_v0 = vld [vmem:[#allocation2 + $0x48] sm:$0xf]  ;;  %v9184_v57 = vld [vmem:[%s11554_s4 + $0x1c0] sm:$0xff]  }
 0x1b9   :  { %v7546_v12 = vrot.slane %v3877_v15, 11  ;;  %v3884_v47 = vrot.slane %v3882_v34, 7  ;;  %v3557_v43 = vshll.u32 %v7479_v51, 16  ;;  %v3562_v33 = vshrl.u32 %v7480_v37, 16  ;;  %8395 = vmatpush3.bf16.msra.mxu0 %v9169_v2 }
 0x1ba   :  { %8682 = vmatprep.mubr.bf16.mxu1 %v7627_v11  ;;  %v3861_v3 = vor.u32 %v3859_v49, %v3858_v18  ;;  %v3556_v42 = vrot.slane %v3554_v10, 4  ;;  %v3565_v48 = vshll.u32 %v7480_v37, 16  ;;  %v7555_v55 = vcombine.low %v10636_v23, %v3891_v53  ;;  %8705 = vmatpush3.bf16.msra.mxu1 %v9170_v45  ;;  %v9199_v37 = vld [vmem:[%s11554_s4 + $0x68] sm:$0xff]  }
 0x1bb   :  { %v3887_v16 = vor.u32 %v3885_v28, %v3884_v47  ;;  %v3559_v17 = vrot.slane %v3557_v43, 5  ;;  %v3564_v41 = vrot.slane %v3562_v33, 4  ;;  %v7556_v46 = vcombine.low %v10643_v4, %v3894_v36  ;;  %8706 = vmatprep.subr.bf16.mxu1 %v9175_v60  ;;  %8396 = vmatprep.subr.bf16.mxu0 %v9178_v32 }
 0x1bc   :  { %v3862_v25 = vsel %vm10476_vm7, %v7544_v6, %v3861_v3  ;;  %v3567_v27 = vrot.slane %v3565_v48, 5  ;;  %v4041_v19 = vrot.slane %v7555_v55, 5  ;;  %v7557_v44 = vcombine.low %v10648_v35, %v10638_v5 }
 0x1bd   :  { %v3888_v26 = vsel %vm10476_vm7, %v7546_v12, %v3887_v16  ;;  %v3560_v45 = vor.u32 %v3559_v17, %v3556_v42  ;;  %v4042_v21 = vrot.slane %v7556_v46, 5  ;;  %v7558_v61 = vcombine.low %v10651_v52, %v10653_v31  ;;  %8397 = vmatpush3.bf16.msra.mxu0 %v9180_v50  ;;  %v9212_v17 = vld [vmem:[%s11554_s4 + $0x30] sm:$0xff]  }
 0x1be   :  { %v7630_v51 = vcombine.low %v3862_v25, %v3888_v26  ;;  %v3568_v22 = vor.u32 %v3567_v27, %v3564_v41  ;;  %v7564_v14 = vcombine.low %v4041_v19, %v4041_v19  ;;  %v7567_v20 = vcombine.high %v4041_v19, %v4041_v19  ;;  %8707 = vmatpush3.bf16.msra.mxu1 %v9175_v60 }
 0x1bf   :  { %v7511_v53 = vcombine.low %v3469_v62, %v3560_v45  ;;  %v7514_v2 = vsel %vm7325_vm8, %v10556_v58, %v3560_v45  ;;  %v7569_v29 = vcombine.low %v4042_v21, %v4042_v21  ;;  %v7572_v56 = vcombine.high %v4042_v21, %v4042_v21  ;;  %8708 = vmatprep.subr.bf16.mxu1 %v9181_v13  ;;  %v9201_v58 = vld [vmem:[%s11554_s4 + $0x28] sm:$0xff]   ;;  %v9221_v62 = vld [vmem:[%s11554_s4 + $0x78] sm:$0xff]  }
 0x1c0   :  { %8683 = vmatmul.mubr.bf16.gmra.mrb[52].mxu1 %v7630_v51  ;;  %v7516_v49 = vcombine.low %v3472_v0, %v3568_v22  ;;  %v7519_v36 = vsel %vm7325_vm8, %v10560_v24, %v3568_v22  ;;  %v3791_v60 = vshrl.u32 %v7514_v2, 16  ;;  %v3794_v9 = vshll.u32 %v7514_v2, 16  ;;  %8398 = vmatprep.subr.bf16.mxu0 %v9188_v63  ;;  %v9210_v24 = vld [vmem:[%s11554_s4 + $0x70] sm:$0xff]  }
 0x1c1   :  { %v3786_v15 = vshrl.u32 %v7511_v53, 16  ;;  %v3817_v34 = vshrl.u32 %v7519_v36, 16  ;;  %v3820_v28 = vshll.u32 %v7519_v36, 16  ;;  %v4127_v5 = vshrl.u32 %v7564_v14, 16  ;;  %8399 = vmatpush3.bf16.msra.mxu0 %v9190_v30  ;;  %v3903_v14 = vld [vmem:[#allocation2 + $0xbc] sm:$0xf] }
 0x1c2   :  { %v3793_v32 = vrot.slane %v3791_v60, 7  ;;  %v3812_v11 = vshrl.u32 %v7516_v49, 16  ;;  %v4132_v6 = vshrl.u32 %v7567_v20, 16  ;;  %v4135_v18 = vshll.u32 %v7567_v20, 16  ;;  %8709 = vmatpush3.bf16.msra.mxu1 %v9181_v13  ;;  %8400 = vmatprep.subr.bf16.mxu0 %v9199_v37  ;;  %v9222_v20 = vld [vmem:[%s11554_s4 + $0x38] sm:$0xff]  }
 0x1c3   :  { %v7539_v10 = vrot.slane %v3786_v15, 11  ;;  %v3819_v50 = vrot.slane %v3817_v34, 7  ;;  %v7604_v12 = vrot.slane %v4127_v5, 11  ;;  %v4153_v47 = vshrl.u32 %v7569_v29, 16  ;;  %8470 = vmatprep.subr.bf16.mxu1 %v9184_v57  ;;  %v3906_v57 = vld [vmem:[#allocation2 + $0xc8] sm:$0xf] }
 0x1c4   :  { %v3796_v43 = vor.u32 %v3794_v9, %v3793_v32  ;;  %v7541_v33 = vrot.slane %v3812_v11, 11  ;;  %v4134_v3 = vrot.slane %v4132_v6, 7  ;;  %v4158_v42 = vshrl.u32 %v7572_v56, 16  ;;  %v10712_v15 = vld [vmem:[#allocation2 + $0xc4] sm:$0xf] }
 0x1c5   :  { %v3822_v48 = vor.u32 %v3820_v28, %v3819_v50  ;;  %v7606_v55 = vrot.slane %v4153_v47, 11  ;;  %v4161_v31 = vshll.u32 %v7572_v56, 16  ;;  %v4043_v16 = vrot.slane %v7557_v44, 5  ;;  %8401 = vmatpush3.bf16.msra.mxu0 %v9201_v58  ;;  %v10710_v56 = vld [vmem:[#allocation2 + $0xb8] sm:$0xf] }
 0x1c6   :  { %v3797_v41 = vsel %vm10476_vm7, %v7539_v10, %v3796_v43  ;;  %v4137_v46 = vor.u32 %v4135_v18, %v4134_v3  ;;  %v4160_v13 = vrot.slane %v4158_v42, 7  ;;  %v4044_v25 = vrot.slane %v7558_v61, 5  ;;  %8402 = vmatprep.subr.bf16.mxu0 %v9210_v24  ;;  %v10714_v34 = vld [vmem:[#allocation2 + $0xd4] sm:$0xf]  ;;  %v10716_v11 = vld [vmem:[#allocation2 + $0xd0] sm:$0xf] }
 0x1c7   :  { %v3823_v27 = vsel %vm10476_vm7, %v7541_v33, %v3822_v48  ;;  %v7574_v19 = vcombine.low %v4043_v16, %v4043_v16  ;;  %v7577_v44 = vcombine.high %v4043_v16, %v4043_v16  ;;  %v7481_v63 = vcombine.low %v10590_v8, %v10590_v8  ;;  %v10718_v6 = vld [vmem:[#allocation2 + $0xe0] sm:$0xf]  ;;  %v10720_v18 = vld [vmem:[#allocation2 + $0x10] sm:$0xf]  ;;  %v10722_v24 = vld [vmem:[#allocation2 + $0x14] sm:$0xf] }
 0x1c8   :  { %v7626_v26 = vcombine.high %v3797_v41, %v3823_v27  ;;  %v4138_v0 = vsel %vm10476_vm7, %v7604_v12, %v4137_v46  ;;  %v4163_v45 = vor.u32 %v4161_v31, %v4160_v13  ;;  %v7579_v21 = vcombine.low %v4044_v25, %v4044_v25  ;;  %v3475_v12 = vld [vmem:[#allocation2 + $0x54] sm:$0xf]  ;;  %v10724_v33 = vld [vmem:[#allocation2 + $0xdc] sm:$0xf]  ;;  %v9231_v13 = vld [vmem:[%s11557_s7] sm:$0xff]  }
 0x1c9   :  { %v7582_v61 = vcombine.high %v4044_v25, %v4044_v25  ;;  %v4179_v30 = vshrl.u32 %v7574_v19, 16  ;;  %v4184_v51 = vshrl.u32 %v7577_v44, 16  ;;  %v4187_v22 = vshll.u32 %v7577_v44, 16  ;;  %8403 = vmatpush3.bf16.msra.mxu0 %v9212_v17  ;;  %v3478_v17 = vld [vmem:[#allocation2 + $0x60] sm:$0xf] }
 0x1ca   :  { %4658 = vmatprep.mubr.bf16.mxu0 %v7626_v26  ;;  %v4164_v37 = vsel %vm10476_vm7, %v7606_v55, %v4163_v45  ;;  %v4205_v53 = vshrl.u32 %v7579_v21, 16  ;;  %v7625_v2 = vcombine.low %v3797_v41, %v3823_v27  ;;  %v7482_v29 = vcombine.low %v10595_v1, %v10595_v1  ;;  %8404 = vmatprep.subr.bf16.mxu0 %v9221_v62 }
 0x1cb   :  { %v7633_v49 = vcombine.low %v4138_v0, %v4164_v37  ;;  %v7608_v36 = vrot.slane %v4179_v30, 11  ;;  %v4186_v60 = vrot.slane %v4184_v51, 7  ;;  %v4210_v9 = vshrl.u32 %v7582_v61, 16 }
 0x1cc   :  { %v7610_v28 = vrot.slane %v4205_v53, 11  ;;  %v4213_v5 = vshll.u32 %v7582_v61, 16  ;;  %4659 = vmatmul.mubr.bf16.gmra.mrb[72].mxu0 %v7625_v2  ;;  %v3570_v58 = vshrl.u32 %v7481_v63, 16  ;;  %v3573_v32 = vshll.u32 %v7481_v63, 16 }
 0x1cd   :  { %8686 = vmatprep.mubr.bf16.mxu1 %v7633_v49  ;;  %v4189_v10 = vor.u32 %v4187_v22, %v4186_v60  ;;  %v4212_v50 = vrot.slane %v4210_v9, 7  ;;  %v3578_v47 = vshrl.u32 %v7482_v29, 16  ;;  %v3581_v43 = vshll.u32 %v7482_v29, 16  ;;  %8405 = vmatpush3.bf16.msra.mxu0 %v9222_v20 }
 0x1ce   :  { %v3572_v3 = vrot.slane %v3570_v58, 4  ;;  %v3575_v42 = vrot.slane %v3573_v32, 5  ;;  %v7559_v48 = vcombine.low %v10710_v56, %v3903_v14  ;;  %v7560_v55 = vcombine.low %v10712_v15, %v3906_v57  ;;  %8758 = vmatprep.subr.bf16.mxu0 %v9231_v13 }
 0x1cf   :  { %v4190_v31 = vsel %vm10476_vm7, %v7608_v36, %v4189_v10  ;;  %v4215_v16 = vor.u32 %v4213_v5, %v4212_v50  ;;  %v3580_v41 = vrot.slane %v3578_v47, 4  ;;  %v3583_v46 = vrot.slane %v3581_v43, 5 }
 0x1d0   :  { %v3576_v25 = vor.u32 %v3575_v42, %v3572_v3  ;;  %v4045_v62 = vrot.slane %v7559_v48, 5  ;;  %v4046_v27 = vrot.slane %v7560_v55, 5  ;;  %v7561_v19 = vcombine.low %v10716_v11, %v10714_v34 }
 0x1d1   :  { %v4216_v44 = vsel %vm10476_vm7, %v7610_v28, %v4215_v16  ;;  %v3584_v63 = vor.u32 %v3583_v46, %v3580_v41  ;;  %v7562_v26 = vcombine.low %v10724_v33, %v10718_v6  ;;  %v7316_v0 = vcombine.low %v10720_v18, %v10722_v24 }
 0x1d2   :  { %v7636_v45 = vcombine.low %v4190_v31, %v4216_v44  ;;  %v7521_v21 = vcombine.low %v3475_v12, %v3576_v25  ;;  %v7524_v61 = vsel %vm7325_vm8, %v10590_v8, %v3576_v25  ;;  %v7584_v30 = vcombine.low %v4045_v62, %v4045_v62 }
 0x1d3   :  { %v7526_v51 = vcombine.low %v3478_v17, %v3584_v63  ;;  %v7529_v22 = vsel %vm7325_vm8, %v10595_v1, %v3584_v63  ;;  %v3843_v14 = vshrl.u32 %v7524_v61, 16  ;;  %v3846_v20 = vshll.u32 %v7524_v61, 16 }
 0x1d4   :  { %8687 = vmatmul.mubr.bf16.gmra.mrb[56].mxu1 %v7636_v45  ;;  %v3838_v37 = vshrl.u32 %v7521_v21, 16  ;;  %v3869_v53 = vshrl.u32 %v7529_v22, 16  ;;  %v3872_v2 = vshll.u32 %v7529_v22, 16  ;;  %v7587_v29 = vcombine.high %v4045_v62, %v4045_v62 }
 0x1d5   :  { %v3845_v57 = vrot.slane %v3843_v14, 7  ;;  %v3864_v49 = vshrl.u32 %v7526_v51, 16  ;;  %v7589_v36 = vcombine.low %v4046_v27, %v4046_v27  ;;  %v7592_v60 = vcombine.high %v4046_v27, %v4046_v27  ;;  %v10753_v14 = vld [vmem:[#allocation2 + $0x1c] sm:$0xf] }
 0x1d6   :  { %v7543_v9 = vrot.slane %v3838_v37, 11  ;;  %v3871_v34 = vrot.slane %v3869_v53, 7  ;;  %v4231_v28 = vshrl.u32 %v7584_v30, 16  ;;  %v4236_v8 = vshrl.u32 %v7587_v29, 16 }
 0x1d7   :  { %v3848_v5 = vor.u32 %v3846_v20, %v3845_v57  ;;  %v7545_v58 = vrot.slane %v3864_v49, 11  ;;  %v4239_v32 = vshll.u32 %v7587_v29, 16  ;;  %v4257_v6 = vshrl.u32 %v7589_v36, 16  ;;  %v2454_v20 = vld [vmem:[#allocation2 + $0x20] sm:$0xf] }
 0x1d8   :  { %v3874_v1 = vor.u32 %v3872_v2, %v3871_v34  ;;  %v7612_v18 = vrot.slane %v4231_v28, 11  ;;  %v4238_v24 = vrot.slane %v4236_v8, 7  ;;  %v4262_v10 = vshrl.u32 %v7592_v60, 16  ;;  %v2457_v34 = vld [vmem:[#allocation2 + $0x2c] sm:$0xf] }
 0x1d9   :  { %v3849_v50 = vsel %vm10476_vm7, %v7543_v9, %v3848_v5  ;;  %v7614_v12 = vrot.slane %v4257_v6, 11  ;;  %v4265_v47 = vshll.u32 %v7592_v60, 16  ;;  %v4047_v43 = vrot.slane %v7561_v19, 5  ;;  %v10757_v9 = vld [vmem:[#allocation2 + $0x28] sm:$0xf] }
 0x1da   :  { %v3875_v3 = vsel %vm10476_vm7, %v7545_v58, %v3874_v1  ;;  %v4241_v42 = vor.u32 %v4239_v32, %v4238_v24  ;;  %v4264_v48 = vrot.slane %v4262_v10, 7  ;;  %v4048_v55 = vrot.slane %v7562_v26, 5  ;;  %v2460_v32 = vld [vmem:[#allocation2 + $0x38] sm:$0xf]  ;;  %v2463_v10 = vld [vmem:[#allocation2 + $0x44] sm:$0xf] }
 0x1db   :  { %v7629_v31 = vcombine.high %v3849_v50, %v3875_v3  ;;  %v7594_v16 = vcombine.low %v4047_v43, %v4047_v43  ;;  %v7597_v17 = vcombine.high %v4047_v43, %v4047_v43  ;;  %v2599_v41 = vrot.slane %v7316_v0, 5 }
 0x1dc   :  { %v4242_v46 = vsel %vm10476_vm7, %v7612_v18, %v4241_v42  ;;  %v4267_v13 = vor.u32 %v4265_v47, %v4264_v48  ;;  %v7599_v25 = vcombine.low %v4048_v55, %v4048_v55  ;;  %v7602_v62 = vcombine.high %v4048_v55, %v4048_v55  ;;  %v2462_v42 = vld [vmem:[#allocation2 + $0x40] sm:$0xf] }
 0x1dd   :  { %4666 = vmatprep.mubr.bf16.mxu0 %v7629_v31  ;;  %v4283_v27 = vshrl.u32 %v7594_v16, 16  ;;  %v4288_v44 = vshrl.u32 %v7597_v17, 16  ;;  %v4291_v19 = vshll.u32 %v7597_v17, 16  ;;  %v7329_v63 = vcombine.low %v2599_v41, %v2599_v41  ;;  %v3889_v17 = vld [vmem:[#allocation2 + $0x84] sm:$0xf] }
 0x1de   :  { %v4268_v45 = vsel %vm10476_vm7, %v7614_v12, %v4267_v13  ;;  %v4309_v21 = vshrl.u32 %v7599_v25, 16  ;;  %v4314_v26 = vshrl.u32 %v7602_v62, 16  ;;  %v4317_v61 = vshll.u32 %v7602_v62, 16 }
 0x1df   :  { %v7639_v30 = vcombine.low %v4242_v46, %v4268_v45  ;;  %v7616_v51 = vrot.slane %v4283_v27, 11  ;;  %v4290_v0 = vrot.slane %v4288_v44, 7  ;;  %v7332_v22 = vcombine.high %v2599_v41, %v2599_v41  ;;  %v3892_v27 = vld [vmem:[#allocation2 + $0x90] sm:$0xf] }
 0x1e0   :  { %v7618_v37 = vrot.slane %v4309_v21, 11  ;;  %v4316_v53 = vrot.slane %v4314_v26, 7  ;;  %v2712_v2 = vshrl.u32 %v7329_v63, 16  ;;  %v7628_v29 = vcombine.low %v3849_v50, %v3875_v3  ;;  %v2459_v3 = vld [vmem:[#allocation2 + $0x34] sm:$0xf] }
 0x1e1   :  { %8690 = vmatprep.mubr.bf16.mxu1 %v7639_v30  ;;  %v4293_v57 = vor.u32 %v4291_v19, %v4290_v0  ;;  %v2717_v49 = vshrl.u32 %v7332_v22, 16  ;;  %v2720_v36 = vshll.u32 %v7332_v22, 16  ;;  %v7547_v60 = vcombine.low %v10636_v23, %v10636_v23 }
 0x1e2   :  { %v4319_v28 = vor.u32 %v4317_v61, %v4316_v53  ;;  %v7366_v8 = vrot.slane %v2712_v2, 11  ;;  %4667 = vmatmul.mubr.bf16.gmra.mrb[76].mxu0 %v7628_v29  ;;  %v7548_v5 = vcombine.low %v10643_v4, %v10643_v4  ;;  %v7317_v58 = vcombine.low %v10753_v14, %v2454_v20 }
 0x1e3   :  { %v4294_v6 = vsel %vm10476_vm7, %v7616_v51, %v4293_v57  ;;  %v2719_v1 = vrot.slane %v2717_v49, 7  ;;  %v3954_v18 = vshrl.u32 %v7547_v60, 16  ;;  %v3957_v24 = vshll.u32 %v7547_v60, 16 }
 0x1e4   :  { %v4320_v50 = vsel %vm10476_vm7, %v7618_v37, %v4319_v28  ;;  %v3962_v12 = vshrl.u32 %v7548_v5, 16  ;;  %v3965_v47 = vshll.u32 %v7548_v5, 16  ;;  %v7318_v43 = vcombine.low %v10757_v9, %v2457_v34 }
 0x1e5   :  { %v7642_v48 = vcombine.low %v4294_v6, %v4320_v50  ;;  %v2722_v55 = vor.u32 %v2720_v36, %v2719_v1  ;;  %v3956_v31 = vrot.slane %v3954_v18, 4  ;;  %v3959_v16 = vrot.slane %v3957_v24, 5 }
 0x1e6   :  { %v3964_v41 = vrot.slane %v3962_v12, 4  ;;  %v3967_v46 = vrot.slane %v3965_v47, 5  ;;  %v2600_v13 = vrot.slane %v7317_v58, 5  ;;  %v2601_v25 = vrot.slane %v7318_v43, 5 }
 0x1e7   :  { %8691 = vmatmul.mubr.bf16.gmra.mrb[60].mxu1 %v7642_v48  ;;  %v2723_v62 = vsel %vm10476_vm7, %v7366_v8, %v2722_v55  ;;  %v3960_v44 = vor.u32 %v3959_v16, %v3956_v31  ;;  %v7319_v19 = vcombine.low %v2459_v3, %v2460_v32  ;;  %v7320_v63 = vcombine.low %v2462_v42, %v2463_v10 }
 0x1e8   :  { %v7453_v45 = vcombine.low %v10489_v7, %v2723_v62  ;;  %v3968_v21 = vor.u32 %v3967_v46, %v3964_v41  ;;  %v7334_v26 = vcombine.low %v2600_v13, %v2600_v13  ;;  %v7337_v61 = vcombine.high %v2600_v13, %v2600_v13 }
 0x1e9   :  { %v7563_v30 = vcombine.low %v3889_v17, %v3960_v44  ;;  %v7566_v51 = vsel %vm7325_vm8, %v10636_v23, %v3960_v44  ;;  %v7339_v0 = vcombine.low %v2601_v25, %v2601_v25  ;;  %v7342_v22 = vcombine.high %v2601_v25, %v2601_v25  ;;  %v2469_v44 = vld [vmem:[#allocation2 + $0x5c] sm:$0xf] }
 0x1ea   :  { %8710 = vmatprep.mubr.bf16.mxu1 %v7453_v45  ;;  %v7568_v20 = vcombine.low %v3892_v27, %v3968_v21  ;;  %v7571_v37 = vsel %vm7325_vm8, %v10643_v4, %v3968_v21  ;;  %v4119_v53 = vshrl.u32 %v7566_v51, 16  ;;  %v4122_v2 = vshll.u32 %v7566_v51, 16  ;;  %v9187_v45 = vld [vmem:[%s11554_s4 + $0x180] sm:$0xff]  }
 0x1eb   :  { %v4114_v29 = vshrl.u32 %v7563_v30, 16  ;;  %v4145_v57 = vshrl.u32 %v7571_v37, 16  ;;  %v4148_v49 = vshll.u32 %v7571_v37, 16  ;;  %v2738_v7 = vshrl.u32 %v7334_v26, 16  ;;  %v2468_v30 = vld [vmem:[#allocation2 + $0x58] sm:$0xf] }
 0x1ec   :  { %v4121_v36 = vrot.slane %v4119_v53, 7  ;;  %v4140_v60 = vshrl.u32 %v7568_v20, 16  ;;  %v2743_v34 = vshrl.u32 %v7337_v61, 16  ;;  %v2746_v28 = vshll.u32 %v7337_v61, 16  ;;  %v2466_v61 = vld [vmem:[#allocation2 + $0x50] sm:$0xf] }
 0x1ed   :  { %v7603_v8 = vrot.slane %v4114_v29, 11  ;;  %v4147_v5 = vrot.slane %v4145_v57, 7  ;;  %v7368_v23 = vrot.slane %v2738_v7, 11  ;;  %v2764_v58 = vshrl.u32 %v7339_v0, 16  ;;  %v9191_v37 = vld [vmem:[%s11554_s4 + $0x1c8] sm:$0xff]  }
 0x1ee   :  { %v4124_v32 = vor.u32 %v4122_v2, %v4121_v36  ;;  %v7605_v6 = vrot.slane %v4140_v60, 11  ;;  %v2745_v1 = vrot.slane %v2743_v34, 7  ;;  %v2769_v18 = vshrl.u32 %v7342_v22, 16  ;;  %v2465_v53 = vld [vmem:[#allocation2 + $0x4c] sm:$0xf] }
 0x1ef   :  { %v4150_v24 = vor.u32 %v4148_v49, %v4147_v5  ;;  %v7370_v4 = vrot.slane %v2764_v58, 11  ;;  %v2772_v10 = vshll.u32 %v7342_v22, 16  ;;  %v2602_v50 = vrot.slane %v7319_v19, 5  ;;  %v10792_v7 = vld [vmem:[#allocation2 + $0x8c] sm:$0xf] }
 0x1f0   :  { %v4125_v12 = vsel %vm10476_vm7, %v7603_v8, %v4124_v32  ;;  %v2748_v47 = vor.u32 %v2746_v28, %v2745_v1  ;;  %v2771_v43 = vrot.slane %v2769_v18, 7  ;;  %v2603_v3 = vrot.slane %v7320_v63, 5  ;;  %v10794_v8 = vld [vmem:[#allocation2 + $0x88] sm:$0xf]  ;;  %v89_v1 = vld [vmem:[#allocation2 + $0xb4] sm:$0x8] }
 0x1f1   :  { %v4151_v42 = vsel %vm10476_vm7, %v7605_v6, %v4150_v24  ;;  %v7344_v48 = vcombine.low %v2602_v50, %v2602_v50  ;;  %v7347_v55 = vcombine.high %v2602_v50, %v2602_v50  ;;  %v7549_v31 = vcombine.low %v10648_v35, %v10648_v35  ;;  %v9192_v58 = vld [vmem:[%s11554_s4 + $0x188] sm:$0xff]  }
 0x1f2   :  { %v7632_v16 = vcombine.high %v4125_v12, %v4151_v42  ;;  %v2749_v17 = vsel %vm10476_vm7, %v7368_v23, %v2748_v47  ;;  %v2774_v41 = vor.u32 %v2772_v10, %v2771_v43  ;;  %v7349_v46 = vcombine.low %v2603_v3, %v2603_v3  ;;  %v3898_v47 = vld [vmem:[#allocation2 + $0xa8] sm:$0xf] }
 0x1f3   :  { %v7352_v13 = vcombine.high %v2603_v3, %v2603_v3  ;;  %v2790_v25 = vshrl.u32 %v7344_v48, 16  ;;  %v2795_v62 = vshrl.u32 %v7347_v55, 16  ;;  %v2798_v27 = vshll.u32 %v7347_v55, 16 }
 0x1f4   :  { %4674 = vmatprep.mubr.bf16.mxu0 %v7632_v16  ;;  %v2775_v19 = vsel %vm10476_vm7, %v7370_v4, %v2774_v41  ;;  %v2816_v63 = vshrl.u32 %v7349_v46, 16  ;;  %v7631_v21 = vcombine.low %v4125_v12, %v4151_v42  ;;  %v7550_v26 = vcombine.low %v10651_v52, %v10651_v52  ;;  %v3895_v4 = vld [vmem:[#allocation2 + $0x9c] sm:$0xf]  ;;  %v9195_v12 = vld [vmem:[%s11554_s4 + $0x1d0] sm:$0xff]  }
 0x1f5   :  { %v7456_v51 = vcombine.low %v2749_v17, %v2775_v19  ;;  %v7372_v0 = vrot.slane %v2790_v25, 11  ;;  %v2797_v22 = vrot.slane %v2795_v62, 7  ;;  %v2821_v20 = vshrl.u32 %v7352_v13, 16  ;;  %v9198_v62 = vld [vmem:[%s11554_s4 + $0x190] sm:$0xff]  }
 0x1f6   :  { %v7374_v2 = vrot.slane %v2816_v63, 11  ;;  %v2824_v29 = vshll.u32 %v7352_v13, 16  ;;  %4675 = vmatmul.mubr.bf16.gmra.mrb[80].mxu0 %v7631_v21  ;;  %v3970_v57 = vshrl.u32 %v7549_v31, 16  ;;  %v3973_v49 = vshll.u32 %v7549_v31, 16 }
 0x1f7   :  { %8711 = vmatmul.mubr.bf16.vlgmr.msra.gmra.mrb[48].mxu1 %v7456_v51  ;;  %v2800_v36 = vor.u32 %v2798_v27, %v2797_v22  ;;  %v2823_v60 = vrot.slane %v2821_v20, 7  ;;  %v3978_v34 = vshrl.u32 %v7550_v26, 16  ;;  %v3981_v28 = vshll.u32 %v7550_v26, 16  ;;  %v9203_v20 = vld [vmem:[%s11554_s4 + $0x198] sm:$0xff]  }
 0x1f8   :  { %8471 = vmatpush3.bf16.msra.mxu1 %v9187_v45  ;;  %v3972_v5 = vrot.slane %v3970_v57, 4  ;;  %v3975_v23 = vrot.slane %v3973_v49, 5  ;;  %v7321_v32 = vcombine.low %v2465_v53, %v2466_v61  ;;  %v7322_v6 = vcombine.low %v2468_v30, %v2469_v44  ;;  %v9202_v44 = vld [vmem:[%s11554_s4 + $0x1d8] sm:$0xff]   ;;  %v9206_v57 = vld [vmem:[%s11554_s4 + $0x1e0] sm:$0xff]  }
 0x1f9   :  { %v2801_v18 = vsel %vm10476_vm7, %v7372_v0, %v2800_v36  ;;  %v2826_v24 = vor.u32 %v2824_v29, %v2823_v60  ;;  %v3980_v10 = vrot.slane %v3978_v34, 4  ;;  %v3983_v50 = vrot.slane %v3981_v28, 5  ;;  %8472 = vmatprep.subr.bf16.mxu1 %v9191_v37 }
 0x1fa   :  { %v3976_v43 = vor.u32 %v3975_v23, %v3972_v5  ;;  %v2604_v3 = vrot.slane %v7321_v32, 5  ;;  %v2605_v42 = vrot.slane %v7322_v6, 5  ;;  %v7388_v48 = vcombine.low %v10794_v8, %v10792_v7 }
 0x1fb   :  { %v2827_v55 = vsel %vm10476_vm7, %v7374_v2, %v2826_v24  ;;  %v3984_v31 = vor.u32 %v3983_v50, %v3980_v10  ;;  %v3033_v16 = vrot.slane %v7387_v59, 5  ;;  %v90_v17 = vsel %vm10275_vm5, 0, %v89_v1  ;;  %v9209_v1 = vld [vmem:[%s11554_s4 + $0x1a0] sm:$0xff]  }
 0x1fc   :  { %v7459_v41 = vcombine.low %v2801_v18, %v2827_v55  ;;  %v7573_v46 = vcombine.low %v3895_v4, %v3976_v43  ;;  %v7576_v13 = vsel %vm7325_vm8, %v10648_v35, %v3976_v43  ;;  %8473 = vmatpush3.bf16.msra.mxu1 %v9192_v58  ;;  %v7354_v25 = vcombine.low %v2604_v3, %v2604_v3  ;;  %v92_v50 = vld [vmem:[#allocation2 + $0xc0] sm:$0x8]  ;;  %v2892_v43 = vld [vmem:[#allocation2 + $0xa4] sm:$0xf] }
 0x1fd   :  { %91 = vst [vmem:[#allocation2 + $0xb4] sm:$0x8] %v90_v17  ;;  %v7578_v27 = vcombine.low %v3898_v47, %v3984_v31  ;;  %v7581_v39 = vsel %vm7325_vm8, %v10651_v52, %v3984_v31  ;;  %v4171_v38 = vshrl.u32 %v7576_v13, 16  ;;  %v4174_v59 = vshll.u32 %v7576_v13, 16  ;;  %8474 = vmatprep.subr.bf16.mxu1 %v9195_v12  ;;  %v2889_v12 = vld [vmem:[#allocation2 + $0x98] sm:$0xf] }
 0x1fe   :  { %8714 = vmatprep.mubr.bf16.mxu1 %v7459_v41  ;;  %v4166_v35 = vshrl.u32 %v7573_v46, 16  ;;  %v4197_v19 = vshrl.u32 %v7581_v39, 16  ;;  %v4200_v63 = vshll.u32 %v7581_v39, 16  ;;  %v7357_v45 = vcombine.high %v2604_v3, %v2604_v3  ;;  %v2891_v47 = vld [vmem:[#allocation2 + $0xa0] sm:$0xf]  ;;  %v9213_v3 = vld [vmem:[%s11554_s4 + $0x1e8] sm:$0xff]  }
 0x1ff   :  { %v4173_v21 = vrot.slane %v4171_v38, 7  ;;  %v4192_v26 = vshrl.u32 %v7578_v27, 16  ;;  %v7359_v61 = vcombine.low %v2605_v42, %v2605_v42  ;;  %v7362_v30 = vcombine.high %v2605_v42, %v2605_v42  ;;  %v2888_v17 = vld [vmem:[#allocation2 + $0x94] sm:$0xf]  ;;  %v2895_v41 = vld [vmem:[#allocation2 + $0xb0] sm:$0xf] }
 0x200   :  { %v7607_v51 = vrot.slane %v4166_v35, 11  ;;  %v4199_v0 = vrot.slane %v4197_v19, 7  ;;  %v2842_v22 = vshrl.u32 %v7354_v25, 16  ;;  %v2847_v52 = vshrl.u32 %v7357_v45, 16  ;;  %8475 = vmatpush3.bf16.msra.mxu1 %v9198_v62  ;;  %v2894_v27 = vld [vmem:[#allocation2 + $0xac] sm:$0xf] }
 0x201   :  { %v4176_v37 = vor.u32 %v4174_v59, %v4173_v21  ;;  %v7609_v53 = vrot.slane %v4192_v26, 11  ;;  %v2850_v2 = vshll.u32 %v7357_v45, 16  ;;  %v2868_v29 = vshrl.u32 %v7359_v61, 16  ;;  %8476 = vmatprep.subr.bf16.mxu1 %v9202_v44  ;;  %v2897_v35 = vld [vmem:[#allocation2 + $0xb8] sm:$0xf]  ;;  %v9214_v19 = vld [vmem:[%s11554_s4 + $0x1a8] sm:$0xff]  }
 0x202   :  { %v4202_v49 = vor.u32 %v4200_v63, %v4199_v0  ;;  %v7376_v7 = vrot.slane %v2842_v22, 11  ;;  %v2849_v36 = vrot.slane %v2847_v52, 7  ;;  %v2873_v60 = vshrl.u32 %v7362_v30, 16  ;;  %v9217_v61 = vld [vmem:[%s11554_s4 + $0x1f0] sm:$0xff]  }
 0x203   :  { %v4177_v34 = vsel %vm10476_vm7, %v7607_v51, %v4176_v37  ;;  %v7378_v28 = vrot.slane %v2868_v29, 11  ;;  %v2876_v8 = vshll.u32 %v7362_v30, 16  ;;  %v3034_v5 = vrot.slane %v7388_v48, 5 }
 0x204   :  { %v4203_v23 = vsel %vm10476_vm7, %v7609_v53, %v4202_v49  ;;  %v2852_v58 = vor.u32 %v2850_v2, %v2849_v36  ;;  %v2875_v32 = vrot.slane %v2873_v60, 7  ;;  %v7396_v6 = vcombine.low %v3033_v16, %v3033_v16  ;;  %8477 = vmatpush3.bf16.msra.mxu1 %v9203_v20 }
 0x205   :  { %v7635_v18 = vcombine.high %v4177_v34, %v4203_v23  ;;  %v7399_v24 = vcombine.high %v3033_v16, %v3033_v16  ;;  %v7401_v4 = vcombine.low %v3034_v5, %v3034_v5  ;;  %v7404_v10 = vcombine.high %v3034_v5, %v3034_v5  ;;  %8478 = vmatprep.subr.bf16.mxu1 %v9206_v57  ;;  %v2898_v16 = vld [vmem:[#allocation2 + $0xbc] sm:$0xf] }
 0x206   :  { %v2853_v42 = vsel %vm10476_vm7, %v7376_v7, %v2852_v58  ;;  %v2878_v48 = vor.u32 %v2876_v8, %v2875_v32  ;;  %v3119_v55 = vshrl.u32 %v7396_v6, 16  ;;  %v7634_v31 = vcombine.low %v4177_v34, %v4203_v23  ;;  %v9218_v7 = vld [vmem:[%s11554_s4 + $0x1b0] sm:$0xff]   ;;  %v9224_v8 = vld [vmem:[%s11554_s4 + $0x1f8] sm:$0xff]  }
 0x207   :  { %4682 = vmatprep.mubr.bf16.mxu0 %v7635_v18  ;;  %v3124_v46 = vshrl.u32 %v7399_v24, 16  ;;  %v3127_v13 = vshll.u32 %v7399_v24, 16  ;;  %v3145_v25 = vshrl.u32 %v7401_v4, 16  ;;  %v3150_v62 = vshrl.u32 %v7404_v10, 16  ;;  %v3901_v6 = vld [vmem:[#allocation2 + $0xb4] sm:$0xf] }
 0x208   :  { %v2879_v39 = vsel %vm10476_vm7, %v7378_v28, %v2878_v48  ;;  %v7436_v38 = vrot.slane %v3119_v55, 11  ;;  %v3153_v59 = vshll.u32 %v7404_v10, 16  ;;  %4683 = vmatmul.mubr.bf16.gmra.mrb[84].mxu0 %v7634_v31  ;;  %v93_v44 = vsel %vm10275_vm5, 0, %v92_v50  ;;  %8479 = vmatpush3.bf16.msra.mxu1 %v9209_v1 }
 0x209   :  { %v7462_v63 = vcombine.low %v2853_v42, %v2879_v39  ;;  %v3126_v45 = vrot.slane %v3124_v46, 7  ;;  %v7438_v21 = vrot.slane %v3145_v25, 11  ;;  %v3152_v26 = vrot.slane %v3150_v62, 7  ;;  %94 = vst [vmem:[#allocation2 + $0xc0] sm:$0x8] %v93_v44  ;;  %8480 = vmatprep.subr.bf16.mxu1 %v9213_v3  ;;  %v9225_v3 = vld [vmem:[%s11554_s4 + $0x1b8] sm:$0xff]  }
 0x20a   :  { %v7551_v30 = vcombine.low %v10710_v56, %v10710_v56  ;;  %v7552_v51 = vcombine.low %v10712_v15, %v10712_v15  ;;  %v7389_v0 = vcombine.low %v2888_v17, %v2889_v12  ;;  %v7390_v22 = vcombine.low %v2891_v47, %v2892_v43  ;;  %v10871_v17 = vld [vmem:[%s11554_s4 + $0x200] sm:$0xff]  }
 0x20b   :  { %8715 = vmatmul.mubr.bf16.gmra.mrb[52].mxu1 %v7462_v63  ;;  %v3129_v52 = vor.u32 %v3127_v13, %v3126_v45  ;;  %v3155_v20 = vor.u32 %v3153_v59, %v3152_v26  ;;  %v7391_v37 = vcombine.low %v2894_v27, %v2895_v41  ;;  %v7392_v53 = vcombine.low %v2897_v35, %v2898_v16 }
 0x20c   :  { %v3986_v2 = vshrl.u32 %v7551_v30, 16  ;;  %v3989_v29 = vshll.u32 %v7551_v30, 16  ;;  %v3994_v57 = vshrl.u32 %v7552_v51, 16  ;;  %v3997_v49 = vshll.u32 %v7552_v51, 16  ;;  %8481 = vmatpush3.bf16.msra.mxu1 %v9214_v19 }
 0x20d   :  { %v3130_v36 = vsel %vm10476_vm7, %v7436_v38, %v3129_v52  ;;  %v3156_v60 = vsel %vm10476_vm7, %v7438_v21, %v3155_v20  ;;  %v3035_v34 = vrot.slane %v7389_v0, 5  ;;  %v3036_v28 = vrot.slane %v7390_v22, 5  ;;  %8482 = vmatprep.subr.bf16.mxu1 %v9217_v61 }
 0x20e   :  { %v7465_v5 = vcombine.low %v3130_v36, %v3156_v60  ;;  %v3988_v23 = vrot.slane %v3986_v2, 4  ;;  %v3991_v58 = vrot.slane %v3989_v29, 5  ;;  %v3996_v32 = vrot.slane %v3994_v57, 4 }
 0x20f   :  { %v3999_v1 = vrot.slane %v3997_v49, 5  ;;  %v7406_v18 = vcombine.low %v3035_v34, %v3035_v34  ;;  %v7409_v24 = vcombine.high %v3035_v34, %v3035_v34  ;;  %v7411_v4 = vcombine.low %v3036_v28, %v3036_v28 }
 0x210   :  { %8718 = vmatprep.mubr.bf16.mxu1 %v7465_v5  ;;  %v3904_v10 = vld [vmem:[#allocation2 + $0xc0] sm:$0xf]  ;;  %v3992_v50 = vor.u32 %v3991_v58, %v3988_v23  ;;  %v7414_v12 = vcombine.high %v3036_v28, %v3036_v28  ;;  %v3037_v47 = vrot.slane %v7391_v37, 5  ;;  %v3038_v43 = vrot.slane %v7392_v53, 5  ;;  %8483 = vmatpush3.bf16.msra.mxu1 %v9218_v7  ;;  %v95_v7 = vld [vmem:[#allocation2 + $0xcc] sm:$0x8] }
 0x211   :  { %v4000_v42 = vor.u32 %v3999_v1, %v3996_v32  ;;  %v3171_v48 = vshrl.u32 %v7406_v18, 16  ;;  %v3176_v55 = vshrl.u32 %v7409_v24, 16  ;;  %v3179_v31 = vshll.u32 %v7409_v24, 16  ;;  %8484 = vmatprep.subr.bf16.mxu1 %v9224_v8  ;;  %v98_v8 = vld [vmem:[#allocation2 + $0xd8] sm:$0x8] }
 0x212   :  { %v7583_v41 = vcombine.low %v3901_v6, %v3992_v50  ;;  %v7586_v16 = vsel %vm7325_vm8, %v10710_v56, %v3992_v50  ;;  %v3197_v46 = vshrl.u32 %v7411_v4, 16  ;;  %v3202_v13 = vshrl.u32 %v7414_v12, 16  ;;  %v2900_v5 = vld [vmem:[#allocation2 + $0xc4] sm:$0xf]  ;;  %v10886_v23 = vld [vmem:[#allocation2 + $0x1c] sm:$0xf] }
 0x213   :  { %v7588_v25 = vcombine.low %v3904_v10, %v4000_v42  ;;  %v7591_v62 = vsel %vm7325_vm8, %v10712_v15, %v4000_v42  ;;  %v4223_v27 = vshrl.u32 %v7586_v16, 16  ;;  %v4226_v39 = vshll.u32 %v7586_v16, 16  ;;  %v2901_v18 = vld [vmem:[#allocation2 + $0xc8] sm:$0xf]  ;;  %v2903_v24 = vld [vmem:[#allocation2 + $0xd0] sm:$0xf] }
 0x214   :  { %v4218_v38 = vshrl.u32 %v7583_v41, 16  ;;  %v4249_v59 = vshrl.u32 %v7591_v62, 16  ;;  %v4252_v44 = vshll.u32 %v7591_v62, 16  ;;  %v7440_v35 = vrot.slane %v3171_v48, 11  ;;  %8485 = vmatpush3.bf16.msra.mxu1 %v9225_v3  ;;  %v10896_v62 = vld [vmem:[#allocation2 + $0x28] sm:$0xf] }
 0x215   :  { %v4225_v19 = vrot.slane %v4223_v27, 7  ;;  %v4244_v63 = vshrl.u32 %v7588_v25, 16  ;;  %v3178_v45 = vrot.slane %v3176_v55, 7  ;;  %v7442_v21 = vrot.slane %v3197_v46, 11  ;;  %8726 = vmatprep.subr.bf16.mxu1 %v10871_v17 }
 0x216   :  { %v7611_v56 = vrot.slane %v4218_v38, 11  ;;  %v4251_v26 = vrot.slane %v4249_v59, 7  ;;  %v3204_v61 = vrot.slane %v3202_v13, 7  ;;  %v3205_v30 = vshll.u32 %v7414_v12, 16 }
 0x217   :  { %v4228_v51 = vor.u32 %v4226_v39, %v4225_v19  ;;  %v7613_v0 = vrot.slane %v4244_v63, 11  ;;  %v3181_v15 = vor.u32 %v3179_v31, %v3178_v45  ;;  %v7416_v22 = vcombine.low %v3037_v47, %v3037_v47 }
 0x218   :  { %v4254_v52 = vor.u32 %v4252_v44, %v4251_v26  ;;  %v3207_v20 = vor.u32 %v3205_v30, %v3204_v61  ;;  %v7419_v37 = vcombine.high %v3037_v47, %v3037_v47  ;;  %v7421_v53 = vcombine.low %v3038_v43, %v3038_v43  ;;  %v2904_v47 = vld [vmem:[#allocation2 + $0xd4] sm:$0xf] }
 0x219   :  { %v4229_v2 = vsel %vm10476_vm7, %v7611_v56, %v4228_v51  ;;  %v3182_v29 = vsel %vm10476_vm7, %v7440_v35, %v3181_v15  ;;  %v7424_v57 = vcombine.high %v3038_v43, %v3038_v43  ;;  %v3223_v49 = vshrl.u32 %v7416_v22, 16 }
 0x21a   :  { %v4255_v36 = vsel %vm10476_vm7, %v7613_v0, %v4254_v52  ;;  %v3208_v60 = vsel %vm10476_vm7, %v7442_v21, %v3207_v20  ;;  %v3228_v34 = vshrl.u32 %v7419_v37, 16  ;;  %v3231_v28 = vshll.u32 %v7419_v37, 16 }
 0x21b   :  { %v7638_v58 = vcombine.high %v4229_v2, %v4255_v36  ;;  %v7468_v32 = vcombine.low %v3182_v29, %v3208_v60  ;;  %v7444_v6 = vrot.slane %v3223_v49, 11  ;;  %v3249_v1 = vshrl.u32 %v7421_v53, 16  ;;  %v10911_v49 = vld [vmem:[#allocation2 + $0x4] sm:$0xf] }
 0x21c   :  { %v3230_v4 = vrot.slane %v3228_v34, 7  ;;  %v3254_v10 = vshrl.u32 %v7424_v57, 16  ;;  %v3257_v50 = vshll.u32 %v7424_v57, 16  ;;  %v7637_v12 = vcombine.low %v4229_v2, %v4255_v36 }
 0x21d   :  { %4690 = vmatprep.mubr.bf16.mxu0 %v7638_v58  ;;  %8719 = vmatmul.mubr.bf16.gmra.mrb[56].mxu1 %v7468_v32  ;;  %v7446_v43 = vrot.slane %v3249_v1, 11  ;;  %v96_v3 = vsel %vm10275_vm5, 0, %v95_v7  ;;  %v99_v42 = vsel %vm10275_vm5, 0, %v98_v8  ;;  %v7553_v48 = vcombine.low %v10716_v11, %v10716_v11 }
 0x21e   :  { %v3233_v55 = vor.u32 %v3231_v28, %v3230_v4  ;;  %v3256_v31 = vrot.slane %v3254_v10, 7  ;;  %4691 = vmatmul.mubr.bf16.gmra.mrb[88].mxu0 %v7637_v12  ;;  %97 = vst [vmem:[#allocation2 + $0xcc] sm:$0x8] %v96_v3  ;;  %100 = vst [vmem:[#allocation2 + $0xd8] sm:$0x8] %v99_v42  ;;  %v7554_v41 = vcombine.low %v10724_v33, %v10724_v33 }
 0x21f   :  { %v7393_v16 = vcombine.low %v2900_v5, %v2901_v18  ;;  %v4002_v46 = vshrl.u32 %v7553_v48, 16  ;;  %v4005_v13 = vshll.u32 %v7553_v48, 16  ;;  %v7394_v25 = vcombine.low %v2903_v24, %v2904_v47 }
 0x220   :  { %v10900_v40 = vcombine.low %v10886_v23, %v10886_v23  ;;  %v3234_v27 = vsel %vm10476_vm7, %v7444_v6, %v3233_v55  ;;  %v3259_v39 = vor.u32 %v3257_v50, %v3256_v31  ;;  %v4010_v38 = vshrl.u32 %v7554_v41, 16 }
 0x221   :  { %v4013_v59 = vshll.u32 %v7554_v41, 16  ;;  %v4004_v44 = vrot.slane %v4002_v46, 4  ;;  %v4007_v35 = vrot.slane %v4005_v13, 5  ;;  %v3039_v19 = vrot.slane %v7393_v16, 5 }
 0x222   :  { %v3040_v63 = vrot.slane %v7394_v25, 5  ;;  %v3260_v45 = vsel %vm10476_vm7, %v7446_v43, %v3259_v39  ;;  %v4012_v21 = vrot.slane %v4010_v38, 4  ;;  %v7740_v26 = vcombine.low %v10896_v62, %v10896_v62  ;;  %v10924_v38 = vld [vmem:[#allocation2 + $0x34] sm:$0xf] }
 0x223   :  { %v4015_v56 = vrot.slane %v4013_v59, 5  ;;  %v7471_v61 = vcombine.low %v3234_v27, %v3260_v45  ;;  %v4008_v30 = vor.u32 %v4007_v35, %v4004_v44  ;;  %v7426_v51 = vcombine.low %v3039_v19, %v3039_v19  ;;  %v5143_v45 = vld [vmem:[#allocation2 + $0x18] sm:$0xf] }
 0x224   :  { %v7429_v0 = vcombine.high %v3039_v19, %v3039_v19  ;;  %v7431_v22 = vcombine.low %v3040_v63, %v3040_v63  ;;  %v7434_v52 = vcombine.high %v3040_v63, %v3040_v63  ;;  %v5208_v20 = vshrl.u32 %v10900_v40, 16 }
 0x225   :  { %v4016_v15 = vor.u32 %v4015_v56, %v4012_v21  ;;  %8722 = vmatprep.mubr.bf16.mxu1 %v7471_v61  ;;  %v3907_v37 = vld [vmem:[#allocation2 + $0xcc] sm:$0xf]  ;;  %v3910_v53 = vld [vmem:[#allocation2 + $0xd8] sm:$0xf]  ;;  %v7596_v2 = vsel %vm7325_vm8, %v10716_v11, %v4008_v30  ;;  %v3275_v29 = vshrl.u32 %v7426_v51, 16  ;;  %v7307_v7 = vcombine.low %v10911_v49, %v10911_v49 }
 0x226   :  { %v3280_v57 = vshrl.u32 %v7429_v0, 16  ;;  %v7593_v36 = vcombine.low %v3907_v37, %v4008_v30  ;;  %v4275_v28 = vshrl.u32 %v7596_v2, 16  ;;  %v4278_v8 = vshll.u32 %v7596_v2, 16  ;;  %v9295_v21 = vld [vmem:[#allocation2 + $0x10] sm:$0xf] }
 0x227   :  { %v7598_v60 = vcombine.low %v3910_v53, %v4016_v15  ;;  %v7601_v34 = vsel %vm7325_vm8, %v10724_v33, %v4016_v15  ;;  %v7448_v32 = vrot.slane %v3275_v29, 11  ;;  %v3283_v4 = vshll.u32 %v7429_v0, 16  ;;  %v10928_v30 = vld [vmem:[#allocation2 + $0x40] sm:$0xf]  ;;  %v5146_v0 = vld [vmem:[#allocation2 + $0x24] sm:$0xf] }
 0x228   :  { %v4301_v5 = vshrl.u32 %v7601_v34, 16  ;;  %v4304_v58 = vshll.u32 %v7601_v34, 16  ;;  %v4270_v6 = vshrl.u32 %v7593_v36, 16  ;;  %v4277_v1 = vrot.slane %v4275_v28, 7 }
 0x229   :  { %v4296_v11 = vshrl.u32 %v7598_v60, 16  ;;  %v3282_v18 = vrot.slane %v3280_v57, 7  ;;  %v3301_v10 = vshrl.u32 %v7431_v22, 16  ;;  %v3306_v50 = vshrl.u32 %v7434_v52, 16 }
 0x22a   :  { %v4303_v24 = vrot.slane %v4301_v5, 7  ;;  %v7615_v12 = vrot.slane %v4270_v6, 11  ;;  %v4280_v47 = vor.u32 %v4278_v8, %v4277_v1  ;;  %v3309_v3 = vshll.u32 %v7434_v52, 16  ;;  %v2446_v8 = vld [vmem:[#allocation2] sm:$0xf] }
 0x22b   :  { %v7617_v43 = vrot.slane %v4296_v11, 11  ;;  %v3285_v48 = vor.u32 %v3283_v4, %v3282_v18  ;;  %v7450_v33 = vrot.slane %v3301_v10, 11  ;;  %v3308_v55 = vrot.slane %v3306_v50, 7  ;;  %v2449_v10 = vld [vmem:[#allocation2 + $0xc] sm:$0xf] }
 0x22c   :  { %v4306_v42 = vor.u32 %v4304_v58, %v4303_v24  ;;  %v4281_v31 = vsel %vm10476_vm7, %v7615_v12, %v4280_v47  ;;  %v5210_v41 = vrot.slane %v5208_v20, 4  ;;  %v5211_v16 = vshll.u32 %v10900_v40, 16 }
 0x22d   :  { %v5216_v46 = vshrl.u32 %v7740_v26, 16  ;;  %v3286_v25 = vsel %vm10476_vm7, %v7448_v32, %v3285_v48  ;;  %v3311_v27 = vor.u32 %v3309_v3, %v3308_v55  ;;  %v5219_v39 = vshll.u32 %v7740_v26, 16 }
 0x22e   :  { %v4307_v13 = vsel %vm10476_vm7, %v7617_v43, %v4306_v42  ;;  %v5213_v44 = vrot.slane %v5211_v16, 5  ;;  %v7308_v56 = vcombine.low %v9295_v21, %v9295_v21  ;;  %v2511_v61 = vshrl.u32 %v7307_v7, 16 }
 0x22f   :  { %v7641_v59 = vcombine.high %v4281_v31, %v4307_v13  ;;  %v5218_v35 = vrot.slane %v5216_v46, 4  ;;  %v7640_v19 = vcombine.low %v4281_v31, %v4307_v13  ;;  %v3312_v63 = vsel %vm10476_vm7, %v7450_v33, %v3311_v27 }
 0x230   :  { %v5221_v40 = vrot.slane %v5219_v39, 5  ;;  %v7474_v51 = vcombine.low %v3286_v25, %v3312_v63  ;;  %v5214_v26 = vor.u32 %v5213_v44, %v5210_v41  ;;  %v2514_v15 = vshll.u32 %v7307_v7, 16  ;;  %v5151_v39 = vld [vmem:[#allocation2 + $0x38] sm:$0xf]  ;;  %v5154_v63 = vld [vmem:[#allocation2 + $0x44] sm:$0xf] }
 0x231   :  { %4698 = vmatprep.mubr.bf16.mxu0 %v7641_v59  ;;  %v10932_v22 = vcombine.low %v10924_v38, %v10924_v38  ;;  %v2513_v20 = vrot.slane %v2511_v61, 4  ;;  %v2519_v37 = vshrl.u32 %v7308_v56, 16  ;;  %v2522_v53 = vshll.u32 %v7308_v56, 16 }
 0x232   :  { %v5222_v52 = vor.u32 %v5221_v40, %v5218_v35  ;;  %4699 = vmatmul.mubr.bf16.gmra.mrb[92].mxu0 %v7640_v19  ;;  %8723 = vmatmul.mubr.bf16.gmra.mrb[60].mxu1 %v7474_v51  ;;  %v7755_v2 = vcombine.low %v5143_v45, %v5214_v26  ;;  %v7758_v29 = vsel %vm7325_vm8, %v10886_v23, %v5214_v26  ;;  %v2516_v57 = vrot.slane %v2514_v15, 5 }
 0x233   :  { %v7742_v36 = vcombine.low %v10928_v30, %v10928_v30  ;;  %v5373_v34 = vshrl.u32 %v7758_v29, 16  ;;  %v5376_v28 = vshll.u32 %v7758_v29, 16  ;;  %v2521_v18 = vrot.slane %v2519_v37, 4 }
 0x234   :  { %v7760_v60 = vcombine.low %v5146_v0, %v5222_v52  ;;  %v7763_v7 = vsel %vm7325_vm8, %v10896_v62, %v5222_v52  ;;  %v5368_v5 = vshrl.u32 %v7755_v2, 16  ;;  %v2517_v6 = vor.u32 %v2516_v57, %v2513_v20  ;;  %v10955_v52 = vld [vmem:[#allocation2 + $0x4c] sm:$0xf]  ;;  %v5149_v2 = vld [vmem:[#allocation2 + $0x30] sm:$0xf] }
 0x235   :  { %v5399_v58 = vshrl.u32 %v7763_v7, 16  ;;  %v5402_v32 = vshll.u32 %v7763_v7, 16  ;;  %v5375_v1 = vrot.slane %v5373_v34, 7  ;;  %v2524_v24 = vrot.slane %v2522_v53, 5  ;;  %v5152_v34 = vld [vmem:[#allocation2 + $0x3c] sm:$0xf] }
 0x236   :  { %v5394_v11 = vshrl.u32 %v7760_v60, 16  ;;  %v7795_v23 = vrot.slane %v5368_v5, 11  ;;  %v7323_v50 = vcombine.low %v2446_v8, %v2517_v6  ;;  %v7326_v12 = vsel %vm7325_vm8, %v10911_v49, %v2517_v6 }
 0x237   :  { %v5401_v4 = vrot.slane %v5399_v58, 7  ;;  %v5378_v47 = vor.u32 %v5376_v28, %v5375_v1  ;;  %v2525_v43 = vor.u32 %v2524_v24, %v2521_v18  ;;  %v2678_v3 = vshrl.u32 %v7326_v12, 16  ;;  %v9237_v24 = vld [vmem:[%s11557_s7 + $0x8] sm:$0xff]  }
 0x238   :  { %v7797_v62 = vrot.slane %v5394_v11, 11  ;;  %v2673_v48 = vshrl.u32 %v7323_v50, 16  ;;  %v2681_v33 = vshll.u32 %v7326_v12, 16  ;;  %v5224_v55 = vshrl.u32 %v10932_v22, 16  ;;  %v10989_v12 = vld [vmem:[#allocation2 + $0x58] sm:$0xf] }
 0x239   :  { %v5404_v42 = vor.u32 %v5402_v32, %v5401_v4  ;;  %v5379_v31 = vsel %vm10476_vm7, %v7795_v23, %v5378_v47  ;;  %v7328_v41 = vcombine.low %v2449_v10, %v2525_v43  ;;  %v7331_v16 = vsel %vm7325_vm8, %v9295_v21, %v2525_v43  ;;  %v9236_v21 = vld [vmem:[%s11554_s4 + $0x208] sm:$0xff]  }
 0x23a   :  { %v2680_v46 = vrot.slane %v2678_v3, 7  ;;  %v7363_v49 = vrot.slane %v2673_v48, 11  ;;  %v2704_v25 = vshrl.u32 %v7331_v16, 16  ;;  %v2707_v27 = vshll.u32 %v7331_v16, 16  ;;  %v9248_v3 = vld [vmem:[%s11554_s4 + $0x218] sm:$0xff]  }
 0x23b   :  { %v5405_v13 = vsel %vm10476_vm7, %v7797_v62, %v5404_v42  ;;  %v2699_v19 = vshrl.u32 %v7328_v41, 16  ;;  %v5226_v40 = vrot.slane %v5224_v55, 4  ;;  %v5227_v56 = vshll.u32 %v10932_v22, 16 }
 0x23c   :  { %v7883_v59 = vcombine.low %v5379_v31, %v5405_v13  ;;  %v7884_v44 = vcombine.high %v5379_v31, %v5405_v13  ;;  %v2683_v35 = vor.u32 %v2681_v33, %v2680_v46  ;;  %v2706_v45 = vrot.slane %v2704_v25, 7  ;;  %v9243_v13 = vld [vmem:[%s11557_s7 + $0x10] sm:$0xff]  }
 0x23d   :  { %v5232_v61 = vshrl.u32 %v7742_v36, 16  ;;  %v7365_v0 = vrot.slane %v2699_v19, 11  ;;  %v5235_v26 = vshll.u32 %v7742_v36, 16  ;;  %v7749_v15 = vcombine.low %v10924_v38, %v5151_v39 }
 0x23e   :  { %6329 = vmatprep.mubr.bf16.mxu1 %v7884_v44  ;;  %v2684_v51 = vsel %vm10476_vm7, %v7363_v49, %v2683_v35  ;;  %v2709_v20 = vor.u32 %v2707_v27, %v2706_v45  ;;  %v5229_v37 = vrot.slane %v5227_v56, 5  ;;  %v7750_v22 = vcombine.low %v10928_v30, %v5154_v63  ;;  %v2452_v44 = vld [vmem:[#allocation2 + $0x18] sm:$0xf]  ;;  %v9254_v45 = vld [vmem:[%s11554_s4 + $0x220] sm:$0xff]  }
 0x23f   :  { %6330 = vmatmul.mubr.bf16.vlgmr.msra.gmra.mrb[64].mxu1 %v7883_v59  ;;  %v5234_v53 = vrot.slane %v5232_v61, 4  ;;  %v5237_v29 = vrot.slane %v5235_v26, 5  ;;  %v10958_v57 = vrot.slane %v7749_v15, 5  ;;  %v7309_v60 = vcombine.low %v10753_v14, %v10753_v14  ;;  %v2455_v56 = vld [vmem:[#allocation2 + $0x24] sm:$0xf] }
 0x240   :  { %8727 = vmatpush3.bf16.msra.mxu1 %v10871_v17  ;;  %v7310_v36 = vcombine.low %v10757_v9, %v10757_v9  ;;  %v2710_v7 = vsel %vm10476_vm7, %v7365_v0, %v2709_v20  ;;  %v5230_v28 = vor.u32 %v5229_v37, %v5226_v40  ;;  %v10967_v8 = vrot.slane %v7750_v22, 5  ;;  %v9242_v17 = vld [vmem:[%s11554_s4 + $0x210] sm:$0xff]   ;;  %v9249_v37 = vld [vmem:[%s11557_s7 + $0x18] sm:$0xff]  }
 0x241   :  { %v7743_v5 = vcombine.low %v10955_v52, %v10955_v52  ;;  %8728 = vmatprep.subr.bf16.mxu1 %v9236_v21  ;;  %v7451_v58 = vcombine.low %v2684_v51, %v2710_v7  ;;  %v7452_v14 = vcombine.high %v2684_v51, %v2710_v7  ;;  %v5238_v32 = vor.u32 %v5237_v29, %v5234_v53  ;;  %v9298_v7 = vld [vmem:[#allocation2 + $0x28] sm:$0xf] }
 0x242   :  { %v10976_v9 = vcombine.high %v10958_v57, %v10958_v57  ;;  %v7765_v6 = vcombine.low %v5149_v2, %v5230_v28  ;;  %v7768_v1 = vsel %vm7325_vm8, %v10924_v38, %v5230_v28  ;;  %v10982_v11 = vcombine.high %v10967_v8, %v10967_v8  ;;  %v9297_v2 = vld [vmem:[#allocation2 + $0x1c] sm:$0xf] }
 0x243   :  { %v2527_v18 = vshrl.u32 %v7309_v60, 16  ;;  %4980 = vmatprep.mubr.bf16.mxu0 %v7452_v14  ;;  %v7770_v23 = vcombine.low %v5152_v34, %v5238_v32  ;;  %v7773_v4 = vsel %vm7325_vm8, %v10928_v30, %v5238_v32  ;;  %v5425_v10 = vshrl.u32 %v7768_v1, 16  ;;  %v9296_v30 = vld [vmem:[%s11557_s7] sm:$0xff]  }
 0x244   :  { %v5428_v50 = vshll.u32 %v7768_v1, 16  ;;  %8729 = vmatpush3.bf16.msra.mxu1 %v9236_v21  ;;  %v5420_v38 = vshrl.u32 %v7765_v6, 16  ;;  %v5451_v47 = vshrl.u32 %v7773_v4, 16  ;;  %v5454_v62 = vshll.u32 %v7773_v4, 16  ;;  %4981 = vmatmul.mubr.bf16.vlgmr.msra.gmra.mrb[96].mxu0 %v7451_v58  ;;  %v9260_v58 = vld [vmem:[%s11554_s4 + $0x228] sm:$0xff]  }
 0x245   :  { %v2529_v43 = vrot.slane %v2527_v18, 4  ;;  %8730 = vmatprep.subr.bf16.mxu1 %v9242_v17  ;;  %v5427_v42 = vrot.slane %v5425_v10, 7  ;;  %v5446_v48 = vshrl.u32 %v7770_v23, 16  ;;  %v2530_v33 = vshll.u32 %v7309_v60, 16  ;;  %8759 = vmatpush3.bf16.msra.mxu0 %v9296_v30  ;;  %v9255_v10 = vld [vmem:[%s11557_s7 + $0x20] sm:$0xff]  }
 0x246   :  { %v2535_v55 = vshrl.u32 %v7310_v36, 16  ;;  %v7799_v31 = vrot.slane %v5420_v38, 11  ;;  %v5453_v41 = vrot.slane %v5451_v47, 7  ;;  %v2538_v16 = vshll.u32 %v7310_v36, 16  ;;  %8760 = vmatprep.subr.bf16.mxu0 %v9237_v24  ;;  %v5158_v47 = vld [vmem:[#allocation2 + $0x54] sm:$0xf] }
 0x247   :  { %v7744_v46 = vcombine.low %v10989_v12, %v10989_v12  ;;  %v5430_v49 = vor.u32 %v5428_v50, %v5427_v42  ;;  %v7801_v25 = vrot.slane %v5446_v48, 11  ;;  %v2532_v27 = vrot.slane %v2530_v33, 5 }
 0x248   :  { %v2537_v39 = vrot.slane %v2535_v55, 4  ;;  %8731 = vmatpush3.bf16.msra.mxu1 %v9242_v17  ;;  %v5456_v59 = vor.u32 %v5454_v62, %v5453_v41  ;;  %v2540_v35 = vrot.slane %v2538_v16, 5  ;;  %v5240_v19 = vshrl.u32 %v7743_v5, 16  ;;  %v5155_v17 = vld [vmem:[#allocation2 + $0x48] sm:$0xf]  ;;  %v9266_v55 = vld [vmem:[%s11554_s4 + $0x230] sm:$0xff]  }
 0x249   :  { %v5243_v63 = vshll.u32 %v7743_v5, 16  ;;  %8732 = vmatprep.subr.bf16.mxu1 %v9248_v3  ;;  %v5431_v40 = vsel %vm10476_vm7, %v7799_v31, %v5430_v49  ;;  %v2533_v61 = vor.u32 %v2532_v27, %v2529_v43  ;;  %v5248_v21 = vshrl.u32 %v7744_v46, 16  ;;  %8761 = vmatpush3.bf16.msra.mxu0 %v9237_v24  ;;  %v9299_v16 = vld [vmem:[#allocation2 + $0x34] sm:$0xf]  ;;  %v11029_v27 = vld [vmem:[#allocation2 + $0x64] sm:$0xf] }
 0x24a   :  { %v5251_v51 = vshll.u32 %v7744_v46, 16  ;;  %v5457_v0 = vsel %vm10476_vm7, %v7801_v25, %v5456_v59  ;;  %v2541_v26 = vor.u32 %v2540_v35, %v2537_v39  ;;  %v5242_v15 = vrot.slane %v5240_v19, 4  ;;  %8762 = vmatprep.subr.bf16.mxu0 %v9243_v13  ;;  %v9261_v39 = vld [vmem:[%s11557_s7 + $0x28] sm:$0xff]  }
 0x24b   :  { %v5245_v20 = vrot.slane %v5243_v63, 5  ;;  %v7887_v53 = vcombine.high %v5431_v40, %v5457_v0  ;;  %v7333_v22 = vcombine.low %v2452_v44, %v2533_v61  ;;  %v7336_v29 = vsel %vm7325_vm8, %v9297_v2, %v2533_v61  ;;  %v11036_v63 = vld [vmem:[#allocation2 + $0x70] sm:$0xf]  ;;  %v9270_v61 = vld [vmem:[%s11554_s4 + $0x238] sm:$0xff]  }
 0x24c   :  { %v7886_v60 = vcombine.low %v5431_v40, %v5457_v0  ;;  %8733 = vmatpush3.bf16.msra.mxu1 %v9248_v3  ;;  %v7338_v36 = vcombine.low %v2455_v56, %v2541_v26  ;;  %v7341_v34 = vsel %vm7325_vm8, %v9298_v7, %v2541_v26  ;;  %v2730_v28 = vshrl.u32 %v7336_v29, 16  ;;  %v9267_v2 = vld [vmem:[%s11557_s7 + $0x30] sm:$0xff]  }
 0x24d   :  { %v2733_v5 = vshll.u32 %v7336_v29, 16  ;;  %8734 = vmatprep.subr.bf16.mxu1 %v9254_v45  ;;  %6337 = vmatprep.mubr.bf16.mxu1 %v7887_v53  ;;  %v2725_v14 = vshrl.u32 %v7333_v22, 16  ;;  %v2756_v32 = vshrl.u32 %v7341_v34, 16  ;;  %v2759_v6 = vshll.u32 %v7341_v34, 16  ;;  %v2458_v34 = vld [vmem:[#allocation2 + $0x30] sm:$0xf] }
 0x24e   :  { %v5246_v1 = vor.u32 %v5245_v20, %v5242_v15  ;;  %8763 = vmatpush3.bf16.msra.mxu0 %v9243_v13  ;;  %v2732_v18 = vrot.slane %v2730_v28, 7  ;;  %v2751_v24 = vshrl.u32 %v7338_v36, 16  ;;  %6338 = vmatmul.mubr.bf16.gmra.mrb[68].mxu1 %v7886_v60  ;;  %v5250_v23 = vrot.slane %v5248_v21, 4 }
 0x24f   :  { %v5253_v4 = vrot.slane %v5251_v51, 5  ;;  %8764 = vmatprep.subr.bf16.mxu0 %v9249_v37  ;;  %v7367_v50 = vrot.slane %v2725_v14, 11  ;;  %v2758_v38 = vrot.slane %v2756_v32, 7  ;;  %v7311_v46 = vcombine.low %v9299_v16, %v9299_v16  ;;  %v9300_v51 = vld [vmem:[#allocation2 + $0x40] sm:$0xf] }
 0x250   :  { %v7775_v62 = vcombine.low %v5155_v17, %v5246_v1  ;;  %v7778_v43 = vsel %vm7325_vm8, %v10955_v52, %v5246_v1  ;;  %8735 = vmatpush3.bf16.msra.mxu1 %v9254_v45  ;;  %v2735_v3 = vor.u32 %v2733_v5, %v2732_v18  ;;  %v7369_v42 = vrot.slane %v2751_v24, 11 }
 0x251   :  { %v5254_v48 = vor.u32 %v5253_v4, %v5250_v23  ;;  %v5477_v33 = vshrl.u32 %v7778_v43, 16  ;;  %8736 = vmatprep.subr.bf16.mxu1 %v9260_v58  ;;  %v2761_v30 = vor.u32 %v2759_v6, %v2758_v38  ;;  %v5480_v41 = vshll.u32 %v7778_v43, 16 }
 0x252   :  { %v5472_v31 = vshrl.u32 %v7775_v62, 16  ;;  %8765 = vmatpush3.bf16.msra.mxu0 %v9249_v37  ;;  %v2736_v13 = vsel %vm10476_vm7, %v7367_v50, %v2735_v3  ;;  %v7312_v0 = vcombine.low %v9300_v51, %v9300_v51  ;;  %v2543_v26 = vshrl.u32 %v7311_v46, 16  ;;  %v2461_v50 = vld [vmem:[#allocation2 + $0x3c] sm:$0xf] }
 0x253   :  { %v7780_v52 = vcombine.low %v5158_v47, %v5254_v48  ;;  %v7783_v49 = vsel %vm7325_vm8, %v10989_v12, %v5254_v48  ;;  %v5479_v25 = vrot.slane %v5477_v33, 7  ;;  %8766 = vmatprep.subr.bf16.mxu0 %v9255_v10  ;;  %v2762_v59 = vsel %vm10476_vm7, %v7369_v42, %v2761_v30  ;;  %v5161_v33 = vld [vmem:[#allocation2 + $0x60] sm:$0xf] }
 0x254   :  { %v7803_v44 = vrot.slane %v5472_v31, 11  ;;  %v5503_v35 = vshrl.u32 %v7783_v49, 16  ;;  %v5506_v19 = vshll.u32 %v7783_v49, 16  ;;  %8737 = vmatpush3.bf16.msra.mxu1 %v9260_v58  ;;  %v7455_v45 = vcombine.high %v2736_v13, %v2762_v59  ;;  %v5164_v31 = vld [vmem:[#allocation2 + $0x6c] sm:$0xf] }
 0x255   :  { %v5482_v40 = vor.u32 %v5480_v41, %v5479_v25  ;;  %v5498_v12 = vshrl.u32 %v7780_v52, 16  ;;  %v7454_v56 = vcombine.low %v2736_v13, %v2762_v59  ;;  %8738 = vmatprep.subr.bf16.mxu1 %v9266_v55  ;;  %v2546_v15 = vshll.u32 %v7311_v46, 16  ;;  %v11056_v46 = vld [vmem:[#allocation2 + $0x4c] sm:$0xf]  ;;  %v11060_v52 = vld [vmem:[#allocation2 + $0x58] sm:$0xf] }
 0x256   :  { %v5505_v21 = vrot.slane %v5503_v35, 7  ;;  %8767 = vmatpush3.bf16.msra.mxu0 %v9255_v10  ;;  %4988 = vmatprep.mubr.bf16.mxu0 %v7455_v45  ;;  %v7745_v53 = vcombine.low %v11029_v27, %v11029_v27  ;;  %v7746_v22 = vcombine.low %v11036_v63, %v11036_v63  ;;  %v2545_v60 = vrot.slane %v2543_v26, 4  ;;  %v9273_v10 = vld [vmem:[%s11557_s7 + $0x38] sm:$0xff]  }
 0x257   :  { %v5483_v20 = vsel %vm10476_vm7, %v7803_v44, %v5482_v40  ;;  %v7805_v37 = vrot.slane %v5498_v12, 11  ;;  %8768 = vmatprep.subr.bf16.mxu0 %v9261_v39  ;;  %4989 = vmatmul.mubr.bf16.gmra.mrb[100].mxu0 %v7454_v56  ;;  %v2548_v36 = vrot.slane %v2546_v15, 5  ;;  %v2551_v7 = vshrl.u32 %v7312_v0, 16 }
 0x258   :  { %v5508_v29 = vor.u32 %v5506_v19, %v5505_v21  ;;  %8739 = vmatpush3.bf16.msra.mxu1 %v9266_v55  ;;  %v2554_v28 = vshll.u32 %v7312_v0, 16  ;;  %v5256_v5 = vshrl.u32 %v7745_v53, 16  ;;  %v5259_v17 = vshll.u32 %v7745_v53, 16 }
 0x259   :  { %v5264_v58 = vshrl.u32 %v7746_v22, 16  ;;  %8740 = vmatprep.subr.bf16.mxu1 %v9270_v61  ;;  %v2549_v32 = vor.u32 %v2548_v36, %v2545_v60  ;;  %v2553_v6 = vrot.slane %v2551_v7, 4  ;;  %v5267_v1 = vshll.u32 %v7746_v22, 16 }
 0x25a   :  { %v5509_v14 = vsel %vm10476_vm7, %v7805_v37, %v5508_v29  ;;  %8769 = vmatpush3.bf16.msra.mxu0 %v9261_v39  ;;  %v2556_v24 = vrot.slane %v2554_v28, 5  ;;  %v5258_v4 = vrot.slane %v5256_v5, 4  ;;  %v5261_v62 = vrot.slane %v5259_v17, 5 }
 0x25b   :  { %v7890_v18 = vcombine.high %v5483_v20, %v5509_v14  ;;  %v7889_v23 = vcombine.low %v5483_v20, %v5509_v14  ;;  %8770 = vmatprep.subr.bf16.mxu0 %v9267_v2  ;;  %v7343_v38 = vcombine.low %v2458_v34, %v2549_v32  ;;  %v7346_v47 = vsel %vm7325_vm8, %v9299_v16, %v2549_v32  ;;  %v11073_v32 = vld [vmem:[#allocation2 + $0x94] sm:$0xf] }
 0x25c   :  { %v5266_v43 = vrot.slane %v5264_v58, 4  ;;  %8741 = vmatpush3.bf16.msra.mxu1 %v9270_v61  ;;  %v2557_v3 = vor.u32 %v2556_v24, %v2553_v6  ;;  %v2782_v42 = vshrl.u32 %v7346_v47, 16  ;;  %v2785_v48 = vshll.u32 %v7346_v47, 16  ;;  %v11075_v6 = vld [vmem:[#allocation2 + $0xa0] sm:$0xf] }
 0x25d   :  { %6345 = vmatprep.mubr.bf16.mxu1 %v7890_v18  ;;  %v5269_v55 = vrot.slane %v5267_v1, 5  ;;  %v2777_v30 = vshrl.u32 %v7343_v38, 16  ;;  %v5262_v41 = vor.u32 %v5261_v62, %v5258_v4  ;;  %v7313_v13 = vcombine.low %v11056_v46, %v11056_v46  ;;  %v11077_v4 = vld [vmem:[#allocation2 + $0xac] sm:$0xf]  ;;  %v2464_v38 = vld [vmem:[#allocation2 + $0x48] sm:$0xf] }
 0x25e   :  { %6346 = vmatmul.mubr.bf16.gmra.mrb[72].mxu1 %v7889_v23  ;;  %v7314_v16 = vcombine.low %v11060_v52, %v11060_v52  ;;  %8771 = vmatpush3.bf16.msra.mxu0 %v9267_v2  ;;  %v7348_v49 = vcombine.low %v2461_v50, %v2557_v3  ;;  %v7351_v25 = vsel %vm7325_vm8, %v9300_v51, %v2557_v3  ;;  %v2784_v39 = vrot.slane %v2782_v42, 7 }
 0x25f   :  { %v5270_v59 = vor.u32 %v5269_v55, %v5266_v43  ;;  %8772 = vmatprep.subr.bf16.mxu0 %v9273_v10  ;;  %v7371_v44 = vrot.slane %v2777_v30, 11  ;;  %v2808_v35 = vshrl.u32 %v7351_v25, 16  ;;  %v2811_v19 = vshll.u32 %v7351_v25, 16 }
 0x260   :  { %v7785_v45 = vcombine.low %v5161_v33, %v5262_v41  ;;  %v2787_v40 = vor.u32 %v2785_v48, %v2784_v39  ;;  %v2803_v12 = vshrl.u32 %v7348_v49, 16  ;;  %v7788_v56 = vsel %vm7325_vm8, %v11029_v27, %v5262_v41  ;;  %v11085_v48 = vld [vmem:[#allocation2 + $0x7c] sm:$0xf]  ;;  %v2467_v49 = vld [vmem:[#allocation2 + $0x54] sm:$0xf] }
 0x261   :  { %v7790_v61 = vcombine.low %v5164_v31, %v5270_v59  ;;  %v2810_v21 = vrot.slane %v2808_v35, 7  ;;  %v7793_v0 = vsel %vm7325_vm8, %v11036_v63, %v5270_v59  ;;  %v5529_v15 = vshrl.u32 %v7788_v56, 16  ;;  %v11093_v31 = vld [vmem:[#allocation2 + $0x88] sm:$0xf] }
 0x262   :  { %v5524_v26 = vshrl.u32 %v7785_v45, 16  ;;  %8773 = vmatpush3.bf16.msra.mxu0 %v9273_v10  ;;  %v2788_v51 = vsel %vm10476_vm7, %v7371_v44, %v2787_v40  ;;  %v7373_v20 = vrot.slane %v2803_v12, 11  ;;  %v5532_v37 = vshll.u32 %v7788_v56, 16 }
 0x263   :  { %v5550_v53 = vshrl.u32 %v7790_v61, 16  ;;  %v2813_v22 = vor.u32 %v2811_v19, %v2810_v21  ;;  %v5531_v29 = vrot.slane %v5529_v15, 7  ;;  %v5555_v60 = vshrl.u32 %v7793_v0, 16 }
 0x264   :  { %v7807_v2 = vrot.slane %v5524_v26, 11  ;;  %v5558_v7 = vshll.u32 %v7793_v0, 16  ;;  %v2559_v34 = vshrl.u32 %v7313_v13, 16  ;;  %v2562_v28 = vshll.u32 %v7313_v13, 16 }
 0x265   :  { %v7809_v36 = vrot.slane %v5550_v53, 11  ;;  %v2814_v5 = vsel %vm10476_vm7, %v7373_v20, %v2813_v22  ;;  %v5534_v17 = vor.u32 %v5532_v37, %v5531_v29  ;;  %v5557_v58 = vrot.slane %v5555_v60, 7 }
 0x266   :  { %v2567_v14 = vshrl.u32 %v7314_v16, 16  ;;  %v7458_v1 = vcombine.high %v2788_v51, %v2814_v5  ;;  %v7457_v18 = vcombine.low %v2788_v51, %v2814_v5  ;;  %v2561_v24 = vrot.slane %v2559_v34, 4 }
 0x267   :  { %v2564_v23 = vrot.slane %v2562_v28, 5  ;;  %v5535_v10 = vsel %vm10476_vm7, %v7807_v2, %v5534_v17  ;;  %v5560_v50 = vor.u32 %v5558_v7, %v5557_v58  ;;  %v2570_v62 = vshll.u32 %v7314_v16, 16  ;;  %v5576_v2 = vld [vmem:[#allocation2 + $0x90] sm:$0xf]  ;;  %v5579_v7 = vld [vmem:[#allocation2 + $0x9c] sm:$0xf] }
 0x268   :  { %v2569_v47 = vrot.slane %v2567_v14, 4  ;;  %4996 = vmatprep.mubr.bf16.mxu0 %v7458_v1  ;;  %v7811_v3 = vcombine.low %v11073_v32, %v11073_v32  ;;  %v7812_v42 = vcombine.low %v11075_v6, %v11075_v6  ;;  %v11089_v33 = vcombine.low %v11085_v48, %v11085_v48 }
 0x269   :  { %v2565_v43 = vor.u32 %v2564_v23, %v2561_v24  ;;  %v5561_v55 = vsel %vm10476_vm7, %v7809_v36, %v5560_v50  ;;  %4997 = vmatmul.mubr.bf16.gmra.mrb[104].mxu0 %v7457_v18  ;;  %v2572_v30 = vrot.slane %v2570_v62, 5  ;;  %v11097_v41 = vcombine.low %v11093_v31, %v11093_v31 }
 0x26a   :  { %v11101_v13 = vcombine.low %v11077_v4, %v11077_v4  ;;  %v7893_v16 = vcombine.high %v5535_v10, %v5561_v55  ;;  %v7892_v59 = vcombine.low %v5535_v10, %v5561_v55  ;;  %v5641_v45 = vshrl.u32 %v7811_v3, 16 }
 0x26b   :  { %v7353_v25 = vcombine.low %v2464_v38, %v2565_v43  ;;  %v7356_v39 = vsel %vm7325_vm8, %v11056_v46, %v2565_v43  ;;  %v2573_v44 = vor.u32 %v2572_v30, %v2569_v47  ;;  %v5644_v12 = vshll.u32 %v7811_v3, 16 }
 0x26c   :  { %v2834_v35 = vshrl.u32 %v7356_v39, 16  ;;  %v2837_v19 = vshll.u32 %v7356_v39, 16  ;;  %6353 = vmatprep.mubr.bf16.mxu1 %v7893_v16  ;;  %v5649_v56 = vshrl.u32 %v7812_v42, 16  ;;  %v5652_v61 = vshll.u32 %v7812_v42, 16 }
 0x26d   :  { %v2829_v40 = vshrl.u32 %v7353_v25, 16  ;;  %v7358_v21 = vcombine.low %v2467_v49, %v2573_v44  ;;  %v7361_v0 = vsel %vm7325_vm8, %v11060_v52, %v2573_v44  ;;  %6354 = vmatmul.mubr.bf16.gmra.mrb[76].mxu1 %v7892_v59  ;;  %v5643_v15 = vrot.slane %v5641_v45, 4  ;;  %v2881_v45 = vld [vmem:[#allocation2 + $0x78] sm:$0xf] }
 0x26e   :  { %v2836_v26 = vrot.slane %v2834_v35, 7  ;;  %v2860_v20 = vshrl.u32 %v7361_v0, 16  ;;  %v2863_v46 = vshll.u32 %v7361_v0, 16  ;;  %v5646_v37 = vrot.slane %v5644_v12, 5 }
 0x26f   :  { %v7375_v51 = vrot.slane %v2829_v40, 11  ;;  %v2855_v22 = vshrl.u32 %v7358_v21, 16  ;;  %v5651_v29 = vrot.slane %v5649_v56, 4  ;;  %v5654_v60 = vrot.slane %v5652_v61, 5 }
 0x270   :  { %v2839_v53 = vor.u32 %v2837_v19, %v2836_v26  ;;  %v2862_v36 = vrot.slane %v2860_v20, 7  ;;  %v5647_v34 = vor.u32 %v5646_v37, %v5643_v15  ;;  %v2946_v28 = vshrl.u32 %v11089_v33, 16 }
 0x271   :  { %v2949_v5 = vshll.u32 %v11089_v33, 16  ;;  %v7377_v17 = vrot.slane %v2855_v22, 11  ;;  %v5655_v58 = vor.u32 %v5654_v60, %v5651_v29  ;;  %v2954_v14 = vshrl.u32 %v11097_v41, 16  ;;  %v11118_v33 = vld [vmem:[#allocation2 + $0xb8] sm:$0xf] }
 0x272   :  { %v2840_v52 = vsel %vm10476_vm7, %v7375_v51, %v2839_v53  ;;  %v2865_v1 = vor.u32 %v2863_v46, %v2862_v36  ;;  %v7827_v18 = vcombine.low %v5576_v2, %v5647_v34  ;;  %v7830_v24 = vsel %vm7325_vm8, %v11073_v32, %v5647_v34 }
 0x273   :  { %v2948_v23 = vrot.slane %v2946_v28, 4  ;;  %v7832_v10 = vcombine.low %v5579_v7, %v5655_v58  ;;  %v7835_v50 = vsel %vm7325_vm8, %v11075_v6, %v5655_v58  ;;  %v5806_v38 = vshrl.u32 %v7830_v24, 16  ;;  %v5582_v58 = vld [vmem:[#allocation2 + $0xa8] sm:$0xf] }
 0x274   :  { %v5809_v47 = vshll.u32 %v7830_v24, 16  ;;  %v2866_v62 = vsel %vm10476_vm7, %v7377_v17, %v2865_v1  ;;  %v5801_v43 = vshrl.u32 %v7827_v18, 16  ;;  %v5832_v3 = vshrl.u32 %v7835_v50, 16  ;;  %v5585_v24 = vld [vmem:[#allocation2 + $0xb4] sm:$0xf] }
 0x275   :  { %v5835_v42 = vshll.u32 %v7835_v50, 16  ;;  %v7461_v55 = vcombine.high %v2840_v52, %v2866_v62  ;;  %v5808_v30 = vrot.slane %v5806_v38, 7  ;;  %v5827_v16 = vshrl.u32 %v7832_v10, 16 }
 0x276   :  { %v7460_v49 = vcombine.low %v2840_v52, %v2866_v62  ;;  %v7867_v25 = vrot.slane %v5801_v43, 11  ;;  %v5834_v39 = vrot.slane %v5832_v3, 7  ;;  %v2951_v59 = vrot.slane %v2949_v5, 5 }
 0x277   :  { %v2956_v44 = vrot.slane %v2954_v14, 4  ;;  %5004 = vmatprep.mubr.bf16.mxu0 %v7461_v55  ;;  %v5811_v35 = vor.u32 %v5809_v47, %v5808_v30  ;;  %v7869_v19 = vrot.slane %v5827_v16, 11  ;;  %v2957_v40 = vshll.u32 %v11097_v41, 16  ;;  %v2884_v41 = vld [vmem:[#allocation2 + $0x84] sm:$0xf] }
 0x278   :  { %v7814_v12 = vcombine.low %v11118_v33, %v11118_v33  ;;  %v5837_v56 = vor.u32 %v5835_v42, %v5834_v39  ;;  %5005 = vmatmul.mubr.bf16.gmra.mrb[108].mxu0 %v7460_v49  ;;  %v2952_v61 = vor.u32 %v2951_v59, %v2948_v23  ;;  %v5657_v21 = vshrl.u32 %v11101_v13, 16  ;;  %v9305_v47 = vld [vmem:[#allocation2 + $0x94] sm:$0xf] }
 0x279   :  { %v5660_v0 = vshll.u32 %v11101_v13, 16  ;;  %v5812_v26 = vsel %vm10476_vm7, %v7867_v25, %v5811_v35  ;;  %v2959_v15 = vrot.slane %v2957_v40, 5  ;;  %v7381_v62 = vcombine.low %v9305_v47, %v9305_v47 }
 0x27a   :  { %v5665_v51 = vshrl.u32 %v7814_v12, 16  ;;  %v5668_v20 = vshll.u32 %v7814_v12, 16  ;;  %v5838_v46 = vsel %vm10476_vm7, %v7869_v19, %v5837_v56  ;;  %v7395_v37 = vcombine.low %v2881_v45, %v2952_v61  ;;  %v11143_v19 = vld [vmem:[#allocation2 + $0xd0] sm:$0xf] }
 0x27b   :  { %v7398_v53 = vsel %vm7325_vm8, %v11085_v48, %v2952_v61  ;;  %v5659_v22 = vrot.slane %v5657_v21, 4  ;;  %v7896_v2 = vcombine.high %v5812_v26, %v5838_v46  ;;  %v2960_v29 = vor.u32 %v2959_v15, %v2956_v44 }
 0x27c   :  { %v3111_v60 = vshrl.u32 %v7398_v53, 16  ;;  %v3114_v36 = vshll.u32 %v7398_v53, 16  ;;  %v3106_v13 = vshrl.u32 %v7395_v37, 16  ;;  %v7895_v7 = vcombine.low %v5812_v26, %v5838_v46 }
 0x27d   :  { %v5662_v34 = vrot.slane %v5660_v0, 5  ;;  %v5667_v28 = vrot.slane %v5665_v51, 4  ;;  %6361 = vmatprep.mubr.bf16.mxu1 %v7896_v2  ;;  %v7400_v5 = vcombine.low %v2884_v41, %v2960_v29  ;;  %v7403_v52 = vsel %vm7325_vm8, %v11093_v31, %v2960_v29  ;;  %v11135_v31 = vld [vmem:[#allocation2 + $0xa0] sm:$0xf]  ;;  %v11149_v51 = vld [vmem:[#allocation2 + $0xc4] sm:$0xf] }
 0x27e   :  { %v3113_v17 = vrot.slane %v3111_v60, 7  ;;  %v5670_v14 = vrot.slane %v5668_v20, 5  ;;  %v7435_v1 = vrot.slane %v3106_v13, 11  ;;  %v3137_v18 = vshrl.u32 %v7403_v52, 16  ;;  %6362 = vmatmul.mubr.bf16.gmra.mrb[80].mxu1 %v7895_v7 }
 0x27f   :  { %v3140_v48 = vshll.u32 %v7403_v52, 16  ;;  %v5663_v23 = vor.u32 %v5662_v34, %v5659_v22  ;;  %v3132_v50 = vshrl.u32 %v7400_v5, 16  ;;  %v7382_v55 = vcombine.low %v11135_v31, %v11135_v31  ;;  %v2887_v34 = vld [vmem:[#allocation2 + $0x90] sm:$0xf] }
 0x280   :  { %v3116_v10 = vor.u32 %v3114_v36, %v3113_v17  ;;  %v5671_v38 = vor.u32 %v5670_v14, %v5667_v28  ;;  %v3139_v43 = vrot.slane %v3137_v18, 7  ;;  %v2962_v56 = vshrl.u32 %v7381_v62, 16 }
 0x281   :  { %v7837_v3 = vcombine.low %v5582_v58, %v5663_v23  ;;  %v7840_v42 = vsel %vm7325_vm8, %v11077_v4, %v5663_v23  ;;  %v7437_v16 = vrot.slane %v3132_v50, 11  ;;  %v2965_v15 = vshll.u32 %v7381_v62, 16 }
 0x282   :  { %v3117_v30 = vsel %vm10476_vm7, %v7435_v1, %v3116_v10  ;;  %v7842_v49 = vcombine.low %v5585_v24, %v5671_v38  ;;  %v7845_v25 = vsel %vm7325_vm8, %v11118_v33, %v5671_v38  ;;  %v3142_v39 = vor.u32 %v3140_v48, %v3139_v43  ;;  %v11163_v1 = vld [vmem:[#allocation2 + $0xac] sm:$0xf]  ;;  %v2890_v38 = vld [vmem:[#allocation2 + $0x9c] sm:$0xf] }
 0x283   :  { %v5853_v59 = vshrl.u32 %v7837_v3, 16  ;;  %v5858_v44 = vshrl.u32 %v7840_v42, 16  ;;  %v5861_v35 = vshll.u32 %v7840_v42, 16  ;;  %v5884_v40 = vshrl.u32 %v7845_v25, 16  ;;  %v11145_v61 = vpop.f32.mrb[64].mxu0 }
 0x284   :  { %v5879_v45 = vshrl.u32 %v7842_v49, 16  ;;  %v5887_v12 = vshll.u32 %v7845_v25, 16  ;;  %v3143_v21 = vsel %vm10476_vm7, %v7437_v16, %v3142_v39  ;;  %v11151_v20 = vpop.f32.mrb[65].mxu0  ;;  %v2964_v29 = vrot.slane %v2962_v56, 4  ;;  %v11178_v56 = vld [vmem:[#allocation2 + $0xb8] sm:$0xf] }
 0x285   :  { %v7871_v0 = vrot.slane %v5853_v59, 11  ;;  %v5860_v26 = vrot.slane %v5858_v44, 7  ;;  %v7464_v46 = vcombine.high %v3117_v30, %v3143_v21  ;;  %v5886_v37 = vrot.slane %v5884_v40, 7  ;;  %v11153_v22 = vpop.f32.mrb[66].mxu0 }
 0x286   :  { %v7873_v41 = vrot.slane %v5879_v45, 11  ;;  %v7463_v53 = vcombine.low %v3117_v30, %v3143_v21  ;;  %v2967_v60 = vrot.slane %v2965_v15, 5  ;;  %v2970_v36 = vshrl.u32 %v7382_v55, 16  ;;  %v11155_v13 = vpop.f32.mrb[67].mxu0 }
 0x287   :  { %v5863_v2 = vor.u32 %v5861_v35, %v5860_v26  ;;  %5012 = vmatprep.mubr.bf16.mxu0 %v7464_v46  ;;  %v5889_v7 = vor.u32 %v5887_v12, %v5886_v37  ;;  %v2973_v28 = vshll.u32 %v7382_v55, 16  ;;  %v7815_v5 = vcombine.low %v11149_v51, %v11149_v51 }
 0x288   :  { %v7816_v52 = vcombine.low %v11143_v19, %v11143_v19  ;;  %5013 = vmatmul.mubr.bf16.gmra.mrb[112].mxu0 %v7463_v53  ;;  %v2968_v58 = vor.u32 %v2967_v60, %v2964_v29  ;;  %v2972_v14 = vrot.slane %v2970_v36, 4  ;;  %v11167_v18 = vcombine.low %v11163_v1, %v11163_v1  ;;  %v5591_v36 = vld [vmem:[#allocation2 + $0xcc] sm:$0xf] }
 0x289   :  { %v5864_v17 = vsel %vm10476_vm7, %v7871_v0, %v5863_v2  ;;  %v5890_v48 = vsel %vm10476_vm7, %v7873_v41, %v5889_v7  ;;  %v2975_v24 = vrot.slane %v2973_v28, 5  ;;  %v5673_v23 = vshrl.u32 %v7815_v5, 16 }
 0x28a   :  { %v5676_v10 = vshll.u32 %v7815_v5, 16  ;;  %v7899_v50 = vcombine.high %v5864_v17, %v5890_v48  ;;  %v7405_v62 = vcombine.low %v2887_v34, %v2968_v58  ;;  %v7408_v43 = vsel %vm7325_vm8, %v9305_v47, %v2968_v58  ;;  %v5588_v47 = vld [vmem:[#allocation2 + $0xc0] sm:$0xf] }
 0x28b   :  { %v7898_v3 = vcombine.low %v5864_v17, %v5890_v48  ;;  %v2976_v42 = vor.u32 %v2975_v24, %v2972_v14  ;;  %v3163_v55 = vshrl.u32 %v7408_v43, 16  ;;  %v3166_v30 = vshll.u32 %v7408_v43, 16  ;;  %v11172_v49 = vpop.f32.mrb[68].mxu0  ;;  %v11194_v43 = vld [vmem:[#allocation2 + $0xdc] sm:$0xf] }
 0x28c   :  { %v5675_v16 = vrot.slane %v5673_v23, 4  ;;  %6369 = vmatprep.mubr.bf16.mxu1 %v7899_v50  ;;  %v3158_v25 = vshrl.u32 %v7405_v62, 16  ;;  %v5678_v39 = vrot.slane %v5676_v10, 5  ;;  %v5681_v59 = vshrl.u32 %v7816_v52, 16  ;;  %v11174_v35 = vpop.f32.mrb[69].mxu0 }
 0x28d   :  { %v5684_v44 = vshll.u32 %v7816_v52, 16  ;;  %v7410_v45 = vcombine.low %v2890_v38, %v2976_v42  ;;  %v7413_v40 = vsel %vm7325_vm8, %v11135_v31, %v2976_v42  ;;  %v3165_v12 = vrot.slane %v3163_v55, 7  ;;  %6370 = vmatmul.mubr.bf16.gmra.mrb[84].mxu1 %v7898_v3  ;;  %v11182_v0 = vpop.f32.mrb[70].mxu0 }
 0x28e   :  { %v7384_v21 = vcombine.low %v11178_v56, %v11178_v56  ;;  %v7439_v26 = vrot.slane %v3158_v25, 11  ;;  %v3189_v15 = vshrl.u32 %v7413_v40, 16  ;;  %v3192_v46 = vshll.u32 %v7413_v40, 16  ;;  %v11184_v37 = vpop.f32.mrb[71].mxu0 }
 0x28f   :  { %v5679_v41 = vor.u32 %v5678_v39, %v5675_v16  ;;  %v3168_v53 = vor.u32 %v3166_v30, %v3165_v12  ;;  %v3184_v2 = vshrl.u32 %v7410_v45, 16  ;;  %v5683_v29 = vrot.slane %v5681_v59, 4  ;;  %v11198_v16 = vld [vmem:[#allocation2 + $0xe8] sm:$0xf] }
 0x290   :  { %v5686_v31 = vrot.slane %v5684_v44, 5  ;;  %v3191_v60 = vrot.slane %v3189_v15, 7  ;;  %v2978_v28 = vshrl.u32 %v11167_v18, 16  ;;  %v2981_v62 = vshll.u32 %v11167_v18, 16  ;;  %v2893_v15 = vld [vmem:[#allocation2 + $0xa8] sm:$0xf] }
 0x291   :  { %v7847_v7 = vcombine.low %v5588_v47, %v5679_v41  ;;  %v7850_v34 = vsel %vm7325_vm8, %v11149_v51, %v5679_v41  ;;  %v3169_v5 = vsel %vm10476_vm7, %v7439_v26, %v3168_v53  ;;  %v7441_v52 = vrot.slane %v3184_v2, 11 }
 0x292   :  { %v5687_v17 = vor.u32 %v5686_v31, %v5683_v29  ;;  %v5910_v58 = vshrl.u32 %v7850_v34, 16  ;;  %v3194_v14 = vor.u32 %v3192_v46, %v3191_v60  ;;  %v5913_v24 = vshll.u32 %v7850_v34, 16  ;;  %v2896_v60 = vld [vmem:[#allocation2 + $0xb4] sm:$0xf] }
 0x293   :  { %v5905_v48 = vshrl.u32 %v7847_v7, 16  ;;  %v2980_v23 = vrot.slane %v2978_v28, 4  ;;  %v2983_v40 = vrot.slane %v2981_v62, 5  ;;  %v2986_v12 = vshrl.u32 %v7384_v21, 16 }
 0x294   :  { %v7852_v10 = vcombine.low %v5591_v36, %v5687_v17  ;;  %v7855_v50 = vsel %vm7325_vm8, %v11143_v19, %v5687_v17  ;;  %v5912_v38 = vrot.slane %v5910_v58, 7  ;;  %v3195_v3 = vsel %vm10476_vm7, %v7441_v52, %v3194_v14 }
 0x295   :  { %v7875_v42 = vrot.slane %v5905_v48, 11  ;;  %v5936_v55 = vshrl.u32 %v7855_v50, 16  ;;  %v5939_v30 = vshll.u32 %v7855_v50, 16  ;;  %v7467_v25 = vcombine.high %v3169_v5, %v3195_v3 }
 0x296   :  { %v5915_v39 = vor.u32 %v5913_v24, %v5912_v38  ;;  %v5931_v59 = vshrl.u32 %v7852_v10, 16  ;;  %v7466_v44 = vcombine.low %v3169_v5, %v3195_v3  ;;  %v2989_v47 = vshll.u32 %v7384_v21, 16 }
 0x297   :  { %v5938_v45 = vrot.slane %v5936_v55, 7  ;;  %5020 = vmatprep.mubr.bf16.mxu0 %v7467_v25  ;;  %v7817_v46 = vcombine.low %v11194_v43, %v11194_v43  ;;  %v7818_v41 = vcombine.low %v11198_v16, %v11198_v16  ;;  %v2984_v2 = vor.u32 %v2983_v40, %v2980_v23 }
 0x298   :  { %v5916_v18 = vsel %vm10476_vm7, %v7875_v42, %v5915_v39  ;;  %v7877_v26 = vrot.slane %v5931_v59, 11  ;;  %5021 = vmatmul.mubr.bf16.gmra.mrb[116].mxu0 %v7466_v44  ;;  %v2988_v29 = vrot.slane %v2986_v12, 4  ;;  %v2991_v31 = vrot.slane %v2989_v47, 5  ;;  %v5597_v12 = vld [vmem:[#allocation2 + $0xe4] sm:$0xf] }
 0x299   :  { %v5941_v53 = vor.u32 %v5939_v30, %v5938_v45  ;;  %v5689_v36 = vshrl.u32 %v7817_v46, 16  ;;  %v5692_v21 = vshll.u32 %v7817_v46, 16  ;;  %v5697_v7 = vshrl.u32 %v7818_v41, 16  ;;  %v5145_v30 = vld [vmem:[#allocation2 + $0x20] sm:$0xf] }
 0x29a   :  { %v5700_v34 = vshll.u32 %v7818_v41, 16  ;;  %v2992_v5 = vor.u32 %v2991_v31, %v2988_v29  ;;  %v7415_v52 = vcombine.low %v2893_v15, %v2984_v2  ;;  %v7418_v17 = vsel %vm7325_vm8, %v11163_v1, %v2984_v2  ;;  %v5594_v1 = vld [vmem:[#allocation2 + $0xd8] sm:$0xf]  ;;  %v9310_v41 = vld [vmem:[#allocation2 + $0xd0] sm:$0xf] }
 0x29b   :  { %v5942_v28 = vsel %vm10476_vm7, %v7877_v26, %v5941_v53  ;;  %v3215_v14 = vshrl.u32 %v7418_v17, 16  ;;  %v3218_v48 = vshll.u32 %v7418_v17, 16  ;;  %v5691_v38 = vrot.slane %v5689_v36, 4  ;;  %v9311_v2 = vld [vmem:[#allocation2 + $0x1c] sm:$0xf] }
 0x29c   :  { %v7902_v58 = vcombine.high %v5916_v18, %v5942_v28  ;;  %v7901_v24 = vcombine.low %v5916_v18, %v5942_v28  ;;  %v7420_v23 = vcombine.low %v2896_v60, %v2992_v5  ;;  %v7423_v10 = vsel %vm7325_vm8, %v11178_v56, %v2992_v5  ;;  %v9309_v18 = vld [vmem:[#allocation2 + $0xc4] sm:$0xf] }
 0x29d   :  { %v3210_v50 = vshrl.u32 %v7415_v52, 16  ;;  %v3217_v62 = vrot.slane %v3215_v14, 7  ;;  %v3241_v3 = vshrl.u32 %v7423_v10, 16  ;;  %v3244_v42 = vshll.u32 %v7423_v10, 16 }
 0x29e   :  { %6377 = vmatprep.mubr.bf16.mxu1 %v7902_v58  ;;  %v5694_v55 = vrot.slane %v5692_v21, 5  ;;  %v3236_v39 = vshrl.u32 %v7420_v23, 16  ;;  %v5699_v59 = vrot.slane %v5697_v7, 4  ;;  %v5702_v44 = vrot.slane %v5700_v34, 5 }
 0x29f   :  { %v7443_v25 = vrot.slane %v3210_v50, 11  ;;  %6378 = vmatmul.mubr.bf16.gmra.mrb[88].mxu1 %v7901_v24  ;;  %v3220_v45 = vor.u32 %v3218_v48, %v3217_v62  ;;  %v3243_v40 = vrot.slane %v3241_v3, 7  ;;  %v7385_v56 = vcombine.low %v9309_v18, %v9309_v18  ;;  %v11212_v26 = vpop.f32.mrb[72].mxu0  ;;  %v5148_v3 = vld [vmem:[#allocation2 + $0x2c] sm:$0xf] }
 0x2a0   :  { %v5695_v47 = vor.u32 %v5694_v55, %v5691_v38  ;;  %v7445_v15 = vrot.slane %v3236_v39, 11  ;;  %v5703_v46 = vor.u32 %v5702_v44, %v5699_v59  ;;  %v7386_v53 = vcombine.low %v9310_v41, %v9310_v41  ;;  %v11214_v31 = vpop.f32.mrb[73].mxu0 }
 0x2a1   :  { %v7747_v29 = vcombine.low %v9311_v2, %v5145_v30  ;;  %v3221_v60 = vsel %vm10476_vm7, %v7443_v25, %v3220_v45  ;;  %v3246_v36 = vor.u32 %v3244_v42, %v3243_v40  ;;  %v11220_v34 = vpop.f32.mrb[74].mxu0  ;;  %v2994_v30 = vshrl.u32 %v7385_v56, 16  ;;  %v2899_v2 = vld [vmem:[#allocation2 + $0xc0] sm:$0xf] }
 0x2a2   :  { %v7857_v21 = vcombine.low %v5594_v1, %v5695_v47  ;;  %v7860_v7 = vsel %vm7325_vm8, %v11194_v43, %v5695_v47  ;;  %v7862_v28 = vcombine.low %v5597_v12, %v5703_v46  ;;  %v7865_v5 = vsel %vm7325_vm8, %v11198_v16, %v5703_v46  ;;  %v11224_v58 = vpop.f32.mrb[75].mxu0  ;;  %v9312_v47 = vld [vmem:[#allocation2 + $0x28] sm:$0xf] }
 0x2a3   :  { %v5962_v52 = vshrl.u32 %v7860_v7, 16  ;;  %v5965_v17 = vshll.u32 %v7860_v7, 16  ;;  %v3247_v14 = vsel %vm10476_vm7, %v7445_v15, %v3246_v36  ;;  %v5988_v24 = vshrl.u32 %v7865_v5, 16  ;;  %v2902_v7 = vld [vmem:[#allocation2 + $0xcc] sm:$0xf] }
 0x2a4   :  { %v5957_v48 = vshrl.u32 %v7857_v21, 16  ;;  %v5991_v23 = vshll.u32 %v7865_v5, 16  ;;  %v7470_v10 = vcombine.high %v3221_v60, %v3247_v14  ;;  %v5983_v38 = vshrl.u32 %v7862_v28, 16 }
 0x2a5   :  { %v5964_v50 = vrot.slane %v5962_v52, 7  ;;  %v7469_v62 = vcombine.low %v3221_v60, %v3247_v14  ;;  %v5990_v55 = vrot.slane %v5988_v24, 7  ;;  %v2997_v25 = vshll.u32 %v7385_v56, 16 }
 0x2a6   :  { %v7879_v42 = vrot.slane %v5957_v48, 11  ;;  %5028 = vmatprep.mubr.bf16.mxu0 %v7470_v10  ;;  %v7881_v1 = vrot.slane %v5983_v38, 11  ;;  %v3002_v59 = vshrl.u32 %v7386_v53, 16  ;;  %v3005_v44 = vshll.u32 %v7386_v53, 16 }
 0x2a7   :  { %v5967_v39 = vor.u32 %v5965_v17, %v5964_v50  ;;  %v5993_v45 = vor.u32 %v5991_v23, %v5990_v55  ;;  %5029 = vmatmul.mubr.bf16.gmra.mrb[120].mxu0 %v7469_v62  ;;  %v2996_v40 = vrot.slane %v2994_v30, 4  ;;  %v2999_v12 = vrot.slane %v2997_v25, 5 }
 0x2a8   :  { %v7748_v15 = vcombine.low %v9312_v47, %v5148_v3  ;;  %v3004_v60 = vrot.slane %v3002_v59, 4  ;;  %v3007_v36 = vrot.slane %v3005_v44, 5  ;;  %v5295_v21 = vrot.slane %v7747_v29, 5 }
 0x2a9   :  { %v5968_v46 = vsel %vm10476_vm7, %v7879_v42, %v5967_v39  ;;  %v5994_v56 = vsel %vm10476_vm7, %v7881_v1, %v5993_v45  ;;  %v3000_v28 = vor.u32 %v2999_v12, %v2996_v40  ;;  %v7766_v53 = vcombine.low %v10958_v57, %v10958_v57 }
 0x2aa   :  { %v5296_v5 = vrot.slane %v7748_v15, 5  ;;  %v7905_v52 = vcombine.high %v5968_v46, %v5994_v56  ;;  %v3008_v17 = vor.u32 %v3007_v36, %v3004_v60  ;;  %v7904_v14 = vcombine.low %v5968_v46, %v5994_v56 }
 0x2ab   :  { %v7756_v48 = vcombine.low %v5295_v21, %v5295_v21  ;;  %v7425_v24 = vcombine.low %v2899_v2, %v3000_v28  ;;  %v7428_v23 = vsel %vm7325_vm8, %v9309_v18, %v3000_v28  ;;  %v7759_v10 = vcombine.high %v5295_v21, %v5295_v21 }
 0x2ac   :  { %v7761_v50 = vcombine.low %v5296_v5, %v5296_v5  ;;  %6385 = vmatprep.mubr.bf16.mxu1 %v7905_v52  ;;  %v7430_v29 = vcombine.low %v2902_v7, %v3008_v17  ;;  %v7433_v38 = vsel %vm7325_vm8, %v9310_v41, %v3008_v17  ;;  %v3267_v62 = vshrl.u32 %v7428_v23, 16  ;;  %v5160_v52 = vld [vmem:[#allocation2 + $0x5c] sm:$0xf] }
 0x2ad   :  { %v3270_v3 = vshll.u32 %v7428_v23, 16  ;;  %v3262_v42 = vshrl.u32 %v7425_v24, 16  ;;  %v3293_v55 = vshrl.u32 %v7433_v38, 16  ;;  %v3296_v30 = vshll.u32 %v7433_v38, 16  ;;  %6386 = vmatmul.mubr.bf16.gmra.mrb[92].mxu1 %v7904_v14  ;;  %v5163_v23 = vld [vmem:[#allocation2 + $0x68] sm:$0xf] }
 0x2ae   :  { %v7764_v57 = vcombine.high %v5296_v5, %v5296_v5  ;;  %v3269_v25 = vrot.slane %v3267_v62, 7  ;;  %v3288_v39 = vshrl.u32 %v7430_v29, 16  ;;  %v5381_v1 = vshrl.u32 %v7756_v48, 16  ;;  %v5157_v5 = vld [vmem:[#allocation2 + $0x50] sm:$0xf] }
 0x2af   :  { %v5386_v59 = vshrl.u32 %v7759_v10, 16  ;;  %v7447_v44 = vrot.slane %v3262_v42, 11  ;;  %v3295_v45 = vrot.slane %v3293_v55, 7  ;;  %v5389_v18 = vshll.u32 %v7759_v10, 16  ;;  %v5166_v55 = vld [vmem:[#allocation2 + $0x74] sm:$0xf] }
 0x2b0   :  { %v5407_v40 = vshrl.u32 %v7761_v50, 16  ;;  %v3272_v12 = vor.u32 %v3270_v3, %v3269_v25  ;;  %v7449_v47 = vrot.slane %v3288_v39, 11  ;;  %v7796_v15 = vrot.slane %v5381_v1, 11  ;;  %v9314_v39 = vld [vmem:[#allocation2 + $0x58] sm:$0xf] }
 0x2b1   :  { %v5388_v46 = vrot.slane %v5386_v59, 7  ;;  %v3298_v41 = vor.u32 %v3296_v30, %v3295_v45  ;;  %v5412_v60 = vshrl.u32 %v7764_v57, 16  ;;  %v5415_v36 = vshll.u32 %v7764_v57, 16  ;;  %v9313_v57 = vld [vmem:[#allocation2 + $0x4c] sm:$0xf] }
 0x2b2   :  { %v7798_v2 = vrot.slane %v5407_v40, 11  ;;  %v3273_v21 = vsel %vm10476_vm7, %v7447_v44, %v3272_v12  ;;  %v7771_v7 = vcombine.low %v10967_v8, %v10967_v8  ;;  %v5433_v28 = vshrl.u32 %v7766_v53, 16  ;;  %v9276_v8 = vld [vmem:[%s11553_s0 + $0xd8] ss:$8 sps:$4 sm:$0xff]  }
 0x2b3   :  { %v5391_v56 = vor.u32 %v5389_v18, %v5388_v46  ;;  %v3299_v17 = vsel %vm10476_vm7, %v7449_v47, %v3298_v41  ;;  %v5414_v14 = vrot.slane %v5412_v60, 7  ;;  %v5438_v48 = vshrl.u32 %v10976_v9, 16  ;;  %v5578_v44 = vld [vmem:[#allocation2 + $0x98] sm:$0xf] }
 0x2b4   :  { %v5441_v24 = vshll.u32 %v10976_v9, 16  ;;  %v7473_v10 = vcombine.high %v3273_v21, %v3299_v17  ;;  %v7472_v29 = vcombine.low %v3273_v21, %v3299_v17  ;;  %v7800_v38 = vrot.slane %v5433_v28, 11 }
 0x2b5   :  { %v5392_v50 = vsel %vm10476_vm7, %v7796_v15, %v5391_v56  ;;  %v5417_v53 = vor.u32 %v5415_v36, %v5414_v14  ;;  %v5440_v62 = vrot.slane %v5438_v48, 7  ;;  %v5459_v3 = vshrl.u32 %v7771_v7, 16  ;;  %v11250_v30 = vpop.f32.mrb[76].mxu0 }
 0x2b6   :  { %v5464_v42 = vshrl.u32 %v10982_v11, 16  ;;  %5036 = vmatprep.mubr.bf16.mxu0 %v7473_v10  ;;  %v5467_v9 = vshll.u32 %v10982_v11, 16  ;;  %v7751_v25 = vcombine.low %v9313_v57, %v5157_v5  ;;  %v7752_v1 = vcombine.low %v9314_v39, %v5160_v52  ;;  %v11254_v45 = vpop.f32.mrb[77].mxu0  ;;  %v5581_v57 = vld [vmem:[#allocation2 + $0xa4] sm:$0xf] }
 0x2b7   :  { %v7753_v59 = vcombine.low %v11029_v27, %v5163_v23  ;;  %v5418_v18 = vsel %vm10476_vm7, %v7798_v2, %v5417_v53  ;;  %5037 = vmatmul.mubr.bf16.gmra.mrb[124].mxu0 %v7472_v29  ;;  %v5443_v40 = vor.u32 %v5441_v24, %v5440_v62  ;;  %v7802_v12 = vrot.slane %v5459_v3, 11  ;;  %v11258_v15 = vpop.f32.mrb[78].mxu0 }
 0x2b8   :  { %v5466_v47 = vrot.slane %v5464_v42, 7  ;;  %v7885_v46 = vcombine.low %v5392_v50, %v5418_v18  ;;  %v5299_v11 = vrot.slane %v7751_v25, 5  ;;  %v5300_v41 = vrot.slane %v7752_v1, 5  ;;  %8774 = vmatprep.mubr.bf16.mxu0 %v9276_v8  ;;  %v11261_v36 = vpop.f32.mrb[79].mxu0 }
 0x2b9   :  { %v7754_v60 = vcombine.low %v11036_v63, %v5166_v55  ;;  %v5444_v27 = vsel %vm10476_vm7, %v7800_v38, %v5443_v40  ;;  %v5301_v56 = vrot.slane %v7753_v59, 5  ;;  %v7819_v2 = vcombine.low %v11073_v32, %v5578_v44  ;;  %v9277_v63 = vld [vmem:[%s11553_s0 + $0xe8] ss:$8 sps:$4 sm:$0xff]   ;;  %v9282_v32 = vld [vmem:[%s11553_s0 + $0xf8] ss:$8 sps:$4 sm:$0xff]  }
 0x2ba   :  { %v5469_v21 = vor.u32 %v5467_v9, %v5466_v47  ;;  %8742 = vmatprep.mubr.bf16.mxu1 %v7885_v46  ;;  %v7776_v7 = vcombine.low %v5299_v11, %v5299_v11  ;;  %v7779_v28 = vcombine.high %v5299_v11, %v5299_v11  ;;  %v7781_v5 = vcombine.low %v5300_v41, %v5300_v41  ;;  %v5584_v47 = vld [vmem:[#allocation2 + $0xb0] sm:$0xf] }
 0x2bb   :  { %v7784_v52 = vcombine.high %v5300_v41, %v5300_v41  ;;  %v5302_v14 = vrot.slane %v7754_v60, 5  ;;  %v7786_v48 = vcombine.low %v5301_v56, %v5301_v56  ;;  %v7789_v24 = vcombine.high %v5301_v56, %v5301_v56 }
 0x2bc   :  { %v5470_v17 = vsel %vm10476_vm7, %v7802_v12, %v5469_v21  ;;  %v5485_v10 = vshrl.u32 %v7776_v7, 16  ;;  %v5490_v50 = vshrl.u32 %v7779_v28, 16  ;;  %v5493_v29 = vshll.u32 %v7779_v28, 16  ;;  %v5587_v28 = vld [vmem:[#allocation2 + $0xbc] sm:$0xf] }
 0x2bd   :  { %v7888_v23 = vcombine.low %v5444_v27, %v5470_v17  ;;  %v5511_v38 = vshrl.u32 %v7781_v5, 16  ;;  %v5516_v8 = vshrl.u32 %v7784_v52, 16  ;;  %v5519_v53 = vshll.u32 %v7784_v52, 16 }
 0x2be   :  { %v7791_v62 = vcombine.low %v5302_v14, %v5302_v14  ;;  %v7804_v3 = vrot.slane %v5485_v10, 11  ;;  %v5492_v42 = vrot.slane %v5490_v50, 7  ;;  %v7794_v55 = vcombine.high %v5302_v14, %v5302_v14 }
 0x2bf   :  { %8743 = vmatmul.mubr.bf16.vlgmr.msra.gmra.mrb[48].mxu1 %v7888_v23  ;;  %v5537_v9 = vshrl.u32 %v7786_v48, 16  ;;  %v7806_v25 = vrot.slane %v5511_v38, 11  ;;  %v5518_v39 = vrot.slane %v5516_v8, 7  ;;  %8775 = vmatmul.mubr.bf16.vlgmr.msra.gmra.mrb[128].mxu0 %v9277_v63  ;;  %v5542_v1 = vshrl.u32 %v7789_v24, 16  ;;  %v9283_v63 = vld [vmem:[%s11553_s0 + $0x108] ss:$8 sps:$4 sm:$0xff]  }
 0x2c0   :  { %v5545_v59 = vshll.u32 %v7789_v24, 16  ;;  %v5495_v44 = vor.u32 %v5493_v29, %v5492_v42  ;;  %v5563_v40 = vshrl.u32 %v7791_v62, 16  ;;  %v5568_v12 = vshrl.u32 %v7794_v55, 16  ;;  %8778 = vmatprep.mubr.bf16.mxu0 %v9282_v32  ;;  %v5593_v38 = vld [vmem:[#allocation2 + $0xd4] sm:$0xf] }
 0x2c1   :  { %v7808_v18 = vrot.slane %v5537_v9, 11  ;;  %v5521_v46 = vor.u32 %v5519_v53, %v5518_v39  ;;  %v5544_v11 = vrot.slane %v5542_v1, 7  ;;  %v5571_v41 = vshll.u32 %v7794_v55, 16 }
 0x2c2   :  { %v7820_v60 = vcombine.low %v11075_v6, %v5581_v57  ;;  %v5496_v27 = vsel %vm10476_vm7, %v7804_v3, %v5495_v44  ;;  %v7810_v21 = vrot.slane %v5563_v40, 11  ;;  %v5570_v56 = vrot.slane %v5568_v12, 7  ;;  %v5590_v3 = vld [vmem:[#allocation2 + $0xc8] sm:$0xf] }
 0x2c3   :  { %v5728_v7 = vrot.slane %v7819_v2, 5  ;;  %v5522_v5 = vsel %vm10476_vm7, %v7806_v25, %v5521_v46  ;;  %v5547_v52 = vor.u32 %v5545_v59, %v5544_v11  ;;  %v7821_v14 = vcombine.low %v11077_v4, %v5584_v47  ;;  %v9288_v2 = vld [vmem:[%s11553_s0 + $0x1f8] ss:$8 sps:$4 sm:$0xff]  }
 0x2c4   :  { %v5729_v17 = vrot.slane %v7820_v60, 5  ;;  %v7891_v48 = vcombine.low %v5496_v27, %v5522_v5  ;;  %v5573_v6 = vor.u32 %v5571_v41, %v5570_v56  ;;  %v7822_v32 = vcombine.low %v11118_v33, %v5587_v28  ;;  %v9289_v28 = vld [vmem:[%s11553_s0 + $0x208] ss:$8 sps:$4 sm:$0xff]  }
 0x2c5   :  { %v7828_v24 = vcombine.low %v5728_v7, %v5728_v7  ;;  %v7831_v23 = vcombine.high %v5728_v7, %v5728_v7  ;;  %v5548_v10 = vsel %vm10476_vm7, %v7808_v18, %v5547_v52  ;;  %v5730_v1 = vrot.slane %v7821_v14, 5 }
 0x2c6   :  { %v7833_v50 = vcombine.low %v5729_v17, %v5729_v17  ;;  %v7836_v29 = vcombine.high %v5729_v17, %v5729_v17  ;;  %8746 = vmatprep.mubr.bf16.mxu1 %v7891_v48  ;;  %v5574_v4 = vsel %vm10476_vm7, %v7810_v21, %v5573_v6  ;;  %v5731_v59 = vrot.slane %v7822_v32, 5 }
 0x2c7   :  { %v5814_v8 = vshrl.u32 %v7828_v24, 16  ;;  %v5819_v53 = vshrl.u32 %v7831_v23, 16  ;;  %v5822_v62 = vshll.u32 %v7831_v23, 16  ;;  %v7894_v42 = vcombine.low %v5548_v10, %v5574_v4  ;;  %8779 = vmatmul.mubr.bf16.gmra.mrb[132].mxu0 %v9283_v63  ;;  %v9292_v63 = vld [vmem:[%s11553_s0 + $0x218] ss:$8 sps:$4 sm:$0xff]  }
 0x2c8   :  { %v5840_v55 = vshrl.u32 %v7833_v50, 16  ;;  %v5845_v9 = vshrl.u32 %v7836_v29, 16  ;;  %v5848_v57 = vshll.u32 %v7836_v29, 16  ;;  %8782 = vmatprep.mubr.bf16.mxu0 %v9288_v2  ;;  %v7823_v18 = vcombine.low %v11149_v51, %v5590_v3  ;;  %v5596_v2 = vld [vmem:[#allocation2 + $0xe0] sm:$0xf] }
 0x2c9   :  { %v7868_v25 = vrot.slane %v5814_v8, 11  ;;  %v5821_v39 = vrot.slane %v5819_v53, 7  ;;  %8747 = vmatmul.mubr.bf16.gmra.mrb[52].mxu1 %v7894_v42  ;;  %v7824_v40 = vcombine.low %v11143_v19, %v5593_v38  ;;  %v11293_v12 = vpop.f32.mrb[80].mxu0  ;;  %v7838_v46 = vcombine.low %v5730_v1, %v5730_v1 }
 0x2ca   :  { %v7870_v33 = vrot.slane %v5840_v55, 11  ;;  %v5847_v44 = vrot.slane %v5845_v9, 7  ;;  %v7841_v11 = vcombine.high %v5730_v1, %v5730_v1  ;;  %v7843_v41 = vcombine.low %v5731_v59, %v5731_v59  ;;  %v11295_v60 = vpop.f32.mrb[81].mxu0  ;;  %v5599_v55 = vld [vmem:[#allocation2 + $0xec] sm:$0xf] }
 0x2cb   :  { %v5824_v47 = vor.u32 %v5822_v62, %v5821_v39  ;;  %v7846_v21 = vcombine.high %v5731_v59, %v5731_v59  ;;  %v5732_v56 = vrot.slane %v7823_v18, 5  ;;  %v5733_v7 = vrot.slane %v7824_v40, 5  ;;  %v11300_v5 = vpop.f32.mrb[82].mxu0 }
 0x2cc   :  { %v5850_v27 = vor.u32 %v5848_v57, %v5847_v44  ;;  %v5866_v51 = vshrl.u32 %v7838_v46, 16  ;;  %v5871_v52 = vshrl.u32 %v7841_v11, 16  ;;  %v5874_v17 = vshll.u32 %v7841_v11, 16  ;;  %v11307_v14 = vpop.f32.mrb[83].mxu0 }
 0x2cd   :  { %v5825_v19 = vsel %vm10476_vm7, %v7868_v25, %v5824_v47  ;;  %v5892_v6 = vshrl.u32 %v7843_v41, 16  ;;  %v5897_v24 = vshrl.u32 %v7846_v21, 16  ;;  %v5900_v23 = vshll.u32 %v7846_v21, 16 }
 0x2ce   :  { %v5851_v48 = vsel %vm10476_vm7, %v7870_v33, %v5850_v27  ;;  %v7872_v50 = vrot.slane %v5866_v51, 11  ;;  %v5873_v29 = vrot.slane %v5871_v52, 7  ;;  %v7848_v32 = vcombine.low %v5732_v56, %v5732_v56 }
 0x2cf   :  { %v7897_v10 = vcombine.low %v5825_v19, %v5851_v48  ;;  %v7874_v38 = vrot.slane %v5892_v6, 11  ;;  %v5899_v4 = vrot.slane %v5897_v24, 7  ;;  %v7851_v8 = vcombine.high %v5732_v56, %v5732_v56  ;;  %8783 = vmatmul.mubr.bf16.gmra.mrb[136].mxu0 %v9289_v28 }
 0x2d0   :  { %v7853_v53 = vcombine.low %v5733_v7, %v5733_v7  ;;  %v5876_v62 = vor.u32 %v5874_v17, %v5873_v29  ;;  %v7856_v3 = vcombine.high %v5733_v7, %v5733_v7  ;;  %v5918_v42 = vshrl.u32 %v7848_v32, 16  ;;  %8786 = vmatprep.mubr.bf16.mxu0 %v9292_v63 }
 0x2d1   :  { %8750 = vmatprep.mubr.bf16.mxu1 %v7897_v10  ;;  %v7825_v9 = vcombine.low %v11194_v43, %v5596_v2  ;;  %v5902_v57 = vor.u32 %v5900_v23, %v5899_v4  ;;  %v5923_v25 = vshrl.u32 %v7851_v8, 16  ;;  %v5926_v39 = vshll.u32 %v7851_v8, 16  ;;  %v9293_v43 = vld [vmem:[%s11553_s0 + $0x228] ss:$8 sps:$4 sm:$0xff]  }
 0x2d2   :  { %v5944_v1 = vshrl.u32 %v7853_v53, 16  ;;  %v5877_v59 = vsel %vm10476_vm7, %v7872_v50, %v5876_v62  ;;  %v7876_v33 = vrot.slane %v5918_v42, 11  ;;  %v5949_v44 = vshrl.u32 %v7856_v3, 16 }
 0x2d3   :  { %v5952_v18 = vshll.u32 %v7856_v3, 16  ;;  %v5903_v40 = vsel %vm10476_vm7, %v7874_v38, %v5902_v57  ;;  %v5925_v47 = vrot.slane %v5923_v25, 7  ;;  %v7826_v11 = vcombine.low %v11198_v16, %v5599_v55 }
 0x2d4   :  { %v7878_v46 = vrot.slane %v5944_v1, 11  ;;  %v7900_v41 = vcombine.low %v5877_v59, %v5903_v40  ;;  %v5951_v27 = vrot.slane %v5949_v44, 7  ;;  %v5734_v21 = vrot.slane %v7825_v9, 5 }
 0x2d5   :  { %v11322_v56 = vadd.f32 %v11151_v20, %v11145_v61  ;;  %v5928_v7 = vor.u32 %v5926_v39, %v5925_v47  ;;  %v5735_v28 = vrot.slane %v7826_v11, 5  ;;  %v11326_v19 = vadd.f32 %v11155_v13, %v11153_v22 }
 0x2d6   :  { %v11330_v16 = vadd.f32 %v11174_v35, %v11172_v49  ;;  %8751 = vmatmul.mubr.bf16.gmra.mrb[56].mxu1 %v7900_v41  ;;  %v5954_v51 = vor.u32 %v5952_v18, %v5951_v27  ;;  %v7858_v52 = vcombine.low %v5734_v21, %v5734_v21  ;;  %v7861_v17 = vcombine.high %v5734_v21, %v5734_v21 }
 0x2d7   :  { %v11334_v63 = vadd.f32 %v11184_v37, %v11182_v0  ;;  %v5929_v61 = vsel %vm10476_vm7, %v7876_v33, %v5928_v7  ;;  %v7863_v20 = vcombine.low %v5735_v28, %v5735_v28  ;;  %v7866_v48 = vcombine.high %v5735_v28, %v5735_v28  ;;  %8787 = vmatmul.mubr.bf16.gmra.mrb[140].mxu0 %v9293_v43 }
 0x2d8   :  { %v11340_v22 = vadd.f32 %v11214_v31, %v11212_v26  ;;  %v5955_v13 = vsel %vm10476_vm7, %v7878_v46, %v5954_v51  ;;  %v5970_v49 = vshrl.u32 %v7858_v52, 16  ;;  %v5975_v35 = vshrl.u32 %v7861_v17, 16 }
 0x2d9   :  { %v7903_v6 = vcombine.low %v5929_v61, %v5955_v13  ;;  %v5996_v24 = vshrl.u32 %v7863_v20, 16  ;;  %v6001_v23 = vshrl.u32 %v7866_v48, 16  ;;  %v6004_v0 = vshll.u32 %v7866_v48, 16 }
 0x2da   :  { %v5977_v37 = vrot.slane %v5975_v35, 7  ;;  %v5978_v2 = vshll.u32 %v7861_v17, 16  ;;  %v11346_v10 = vadd.f32 %v11224_v58, %v11220_v34  ;;  %v11350_v50 = vadd.f32 %v11254_v45, %v11250_v30 }
 0x2db   :  { %8754 = vmatprep.mubr.bf16.mxu1 %v7903_v6  ;;  %v7882_v26 = vrot.slane %v5996_v24, 11  ;;  %v6003_v31 = vrot.slane %v6001_v23, 7  ;;  %v11354_v29 = vadd.f32 %v11261_v36, %v11258_v15  ;;  %v11358_v32 = vadd.f32 %v11295_v60, %v11293_v12  ;;  %v8356_v38 = vpop.f32.mrb[84].mxu0 }
 0x2dc   :  { %v7880_v4 = vrot.slane %v5970_v49, 11  ;;  %v5980_v8 = vor.u32 %v5978_v2, %v5977_v37  ;;  %v11362_v34 = vadd.f32 %v11307_v14, %v11300_v5  ;;  %v8357_v58 = vpop.f32.mrb[85].mxu0 }
 0x2dd   :  { %v6006_v30 = vor.u32 %v6004_v0, %v6003_v31  ;;  %v11364_v45 = vadd.f32 %v8357_v58, %v8356_v38  ;;  %v8359_v53 = vpop.f32.mrb[86].mxu0 }
 0x2de   :  { %v5981_v15 = vsel %vm10476_vm7, %v7880_v4, %v5980_v8  ;;  %v8360_v36 = vpop.f32.mrb[87].mxu0 }
 0x2df   :  { %v6007_v12 = vsel %vm10476_vm7, %v7882_v26, %v6006_v30  ;;  %v11370_v60 = vadd.f32 %v8360_v36, %v8359_v53 }
 0x2e0   :  { %v7906_v62 = vcombine.low %v5981_v15, %v6007_v12 }
 0x2e2   :  { %8755 = vmatmul.mubr.bf16.gmra.mrb[60].mxu1 %v7906_v62 }
 0x2f1   :  { %v8362_v3 = vpop.f32.mrb[88].mxu0 }
 0x2f2   :  { %v8363_v42 = vpop.f32.mrb[89].mxu0 }
 0x2f3   :  { %v11372_v5 = vadd.f32 %v8363_v42, %v8362_v3  ;;  %v8365_v14 = vpop.f32.mrb[90].mxu0 }
 0x2f4   :  { %v8366_v55 = vpop.f32.mrb[91].mxu0 }
 0x2f5   :  { %v11374_v9 = vadd.f32 %v8366_v55, %v8365_v14 }
 0x305   :  { %v8368_v57 = vpop.f32.mrb[92].mxu0 }
 0x306   :  { %v8369_v25 = vpop.f32.mrb[93].mxu0 }
 0x307   :  { %v11376_v39 = vadd.f32 %v8369_v25, %v8368_v57  ;;  %v8371_v1 = vpop.f32.mrb[94].mxu0 }
 0x308   :  { %v8372_v59 = vpop.f32.mrb[95].mxu0 }
 0x309   :  { %v11378_v54 = vadd.f32 %v8372_v59, %v8371_v1 }
 0x312   :  { %v8486_v33 = vpop.f32.mrb[64].mxu1 }
 0x313   :  { %v8487_v44 = vpop.f32.mrb[65].mxu1 }
 0x314   :  { %v8488_v18 = vadd.f32 %v8487_v44, %v8486_v33  ;;  %v8489_v40 = vpop.f32.mrb[66].mxu1 }
 0x315   :  { %v8490_v47 = vpop.f32.mrb[67].mxu1 }
 0x316   :  { %v8491_v46 = vadd.f32 %v8490_v47, %v8489_v40 }
 0x317   :  { %v8406_v11 = vpop.f32.mrb[96].mxu0 }
 0x318   :  { %v8407_v43 = vpop.f32.mrb[97].mxu0 }
 0x319   :  { %v8408_v41 = vadd.f32 %v8407_v43, %v8406_v11  ;;  %v8409_v27 = vpop.f32.mrb[98].mxu0 }
 0x31a   :  { %v8410_v21 = vpop.f32.mrb[99].mxu0 }
 0x31b   :  { %v8841_v7 = vadd.f32 %v8408_v41, %v11322_v56  ;;  %v8411_v28 = vadd.f32 %v8410_v21, %v8409_v27 }
 0x31d   :  { %v8847_v51 = vadd.f32 %v8411_v28, %v11326_v19  ;;  %v11382_v52 = vadd.f32 %v8841_v7, %v8488_v18 }
 0x31f   :  { %v11384_v17 = vadd.f32 %v8847_v51, %v8491_v46 }
 0x321   :  { %v8492_v61 = vpop.f32.mrb[68].mxu1 }
 0x322   :  { %v8493_v20 = vpop.f32.mrb[69].mxu1 }
 0x323   :  { %v8494_v48 = vadd.f32 %v8493_v20, %v8492_v61  ;;  %v8495_v13 = vpop.f32.mrb[70].mxu1 }
 0x324   :  { %v8496_v49 = vpop.f32.mrb[71].mxu1 }
 0x325   :  { %v8497_v35 = vadd.f32 %v8496_v49, %v8495_v13 }
 0x32a   :  { %v8412_v6 = vpop.f32.mrb[100].mxu0 }
 0x32b   :  { %v8413_v24 = vpop.f32.mrb[101].mxu0 }
 0x32c   :  { %v8414_v23 = vadd.f32 %v8413_v24, %v8412_v6  ;;  %v8415_v0 = vpop.f32.mrb[102].mxu0 }
 0x32d   :  { %v8416_v37 = vpop.f32.mrb[103].mxu0 }
 0x32e   :  { %v8838_v56 = vadd.f32 %v8414_v23, %v11330_v16  ;;  %v8417_v2 = vadd.f32 %v8416_v37, %v8415_v0 }
 0x330   :  { %v8844_v19 = vadd.f32 %v8417_v2, %v11334_v63  ;;  %v11388_v31 = vadd.f32 %v8838_v56, %v8494_v48 }
 0x331   :  { %v8498_v26 = vpop.f32.mrb[72].mxu1 }
 0x332   :  { %v8499_v38 = vpop.f32.mrb[73].mxu1  ;;  %v11390_v58 = vadd.f32 %v8844_v19, %v8497_v35 }
 0x333   :  { %v8500_v4 = vadd.f32 %v8499_v38, %v8498_v26  ;;  %v8501_v8 = vpop.f32.mrb[74].mxu1 }
 0x334   :  { %v8502_v30 = vpop.f32.mrb[75].mxu1 }
 0x335   :  { %v8503_v53 = vadd.f32 %v8502_v30, %v8501_v8 }
 0x33c   :  { %v8418_v15 = vpop.f32.mrb[104].mxu0 }
 0x33d   :  { %v8419_v36 = vpop.f32.mrb[105].mxu0 }
 0x33e   :  { %v8420_v12 = vadd.f32 %v8419_v36, %v8418_v15  ;;  %v8421_v62 = vpop.f32.mrb[106].mxu0 }
 0x33f   :  { %v8422_v3 = vpop.f32.mrb[107].mxu0 }
 0x340   :  { %v8853_v16 = vadd.f32 %v8420_v12, %v11340_v22  ;;  %v8423_v42 = vadd.f32 %v8422_v3, %v8421_v62  ;;  %v8504_v14 = vpop.f32.mrb[76].mxu1 }
 0x341   :  { %v8505_v63 = vpop.f32.mrb[77].mxu1 }
 0x342   :  { %v8859_v55 = vadd.f32 %v8423_v42, %v11346_v10  ;;  %v8506_v57 = vadd.f32 %v8505_v63, %v8504_v14  ;;  %v8507_v25 = vpop.f32.mrb[78].mxu1  ;;  %v11394_v1 = vadd.f32 %v8853_v16, %v8500_v4 }
 0x343   :  { %v8508_v59 = vpop.f32.mrb[79].mxu1 }
 0x344   :  { %v8509_v33 = vadd.f32 %v8508_v59, %v8507_v25  ;;  %v11396_v44 = vadd.f32 %v8859_v55, %v8503_v53 }
 0x34b   :  { %v8424_v18 = vpop.f32.mrb[108].mxu0 }
 0x34c   :  { %v8425_v40 = vpop.f32.mrb[109].mxu0 }
 0x34d   :  { %v8426_v47 = vadd.f32 %v8425_v40, %v8424_v18  ;;  %v8427_v46 = vpop.f32.mrb[110].mxu0 }
 0x34e   :  { %v8428_v11 = vpop.f32.mrb[111].mxu0 }
 0x34f   :  { %v8850_v22 = vadd.f32 %v8426_v47, %v11350_v50  ;;  %v8429_v43 = vadd.f32 %v8428_v11, %v8427_v46 }
 0x351   :  { %v8856_v41 = vadd.f32 %v8429_v43, %v11354_v29  ;;  %v8510_v27 = vpop.f32.mrb[80].mxu1  ;;  %v11400_v10 = vadd.f32 %v8850_v22, %v8506_v57 }
 0x352   :  { %v8511_v21 = vpop.f32.mrb[81].mxu1 }
 0x353   :  { %v8512_v7 = vadd.f32 %v8511_v21, %v8510_v27  ;;  %v8513_v28 = vpop.f32.mrb[82].mxu1  ;;  %v11402_v51 = vadd.f32 %v8856_v41, %v8509_v33 }
 0x354   :  { %v8514_v61 = vpop.f32.mrb[83].mxu1 }
 0x355   :  { %v8515_v20 = vadd.f32 %v8514_v61, %v8513_v28 }
 0x35b   :  { %v8430_v48 = vpop.f32.mrb[112].mxu0 }
 0x35c   :  { %v8431_v13 = vpop.f32.mrb[113].mxu0 }
 0x35d   :  { %v8432_v49 = vadd.f32 %v8431_v13, %v8430_v48  ;;  %v8433_v35 = vpop.f32.mrb[114].mxu0 }
 0x35e   :  { %v8434_v6 = vpop.f32.mrb[115].mxu0 }
 0x35f   :  { %v8865_v50 = vadd.f32 %v8432_v49, %v11358_v32  ;;  %v8435_v24 = vadd.f32 %v8434_v6, %v8433_v35  ;;  %v11427_v49 = vld [vmem:[%s11558_s8] ss:$0 sm:$0xff] }
 0x360   :  { %v8516_v23 = vpop.f32.mrb[84].mxu1  ;;  %v11434_v6 = vld [vmem:[%s11559_s5] ss:$0 sm:$0xff] }
 0x361   :  { %v8871_v29 = vadd.f32 %v8435_v24, %v11362_v34  ;;  %v8517_v0 = vpop.f32.mrb[85].mxu1  ;;  %v11406_v37 = vadd.f32 %v8865_v50, %v8512_v7 }
 0x362   :  { %v8518_v56 = vadd.f32 %v8517_v0, %v8516_v23  ;;  %v8519_v2 = vpop.f32.mrb[86].mxu1  ;;  %v11447_v0 = vld [vmem:[%s11561_s6] ss:$0 sm:$0xff] }
 0x363   :  { %v8520_v19 = vpop.f32.mrb[87].mxu1  ;;  %v11408_v26 = vadd.f32 %v8871_v29, %v8515_v20 }
 0x364   :  { %v8521_v38 = vadd.f32 %v8520_v19, %v8519_v2 }
 0x36b   :  { %v8436_v4 = vpop.f32.mrb[116].mxu0 }
 0x36c   :  { %v8437_v8 = vpop.f32.mrb[117].mxu0 }
 0x36d   :  { %v8438_v30 = vadd.f32 %v8437_v8, %v8436_v4  ;;  %v8439_v53 = vpop.f32.mrb[118].mxu0 }
 0x36e   :  { %v8440_v15 = vpop.f32.mrb[119].mxu0 }
 0x36f   :  { %v8862_v32 = vadd.f32 %v8438_v30, %v11364_v45  ;;  %v8441_v36 = vadd.f32 %v8440_v15, %v8439_v53 }
 0x371   :  { %v8868_v12 = vadd.f32 %v8441_v36, %v11370_v60  ;;  %v11412_v62 = vadd.f32 %v8862_v32, %v8518_v56 }
 0x372   :  { %v8522_v34 = vpop.f32.mrb[88].mxu1 }
 0x373   :  { %v8523_v3 = vpop.f32.mrb[89].mxu1  ;;  %v11414_v14 = vadd.f32 %v8868_v12, %v8521_v38 }
 0x374   :  { %v8524_v16 = vadd.f32 %v8523_v3, %v8522_v34  ;;  %v8525_v42 = vpop.f32.mrb[90].mxu1 }
 0x375   :  { %v8526_v63 = vpop.f32.mrb[91].mxu1 }
 0x376   :  { %v8527_v55 = vadd.f32 %v8526_v63, %v8525_v42 }
 0x37a   :  { %v8442_v57 = vpop.f32.mrb[120].mxu0 }
 0x37b   :  { %v8443_v25 = vpop.f32.mrb[121].mxu0 }
 0x37c   :  { %v8444_v59 = vadd.f32 %v8443_v25, %v8442_v57  ;;  %v8445_v33 = vpop.f32.mrb[122].mxu0 }
 0x37d   :  { %v8446_v18 = vpop.f32.mrb[123].mxu0 }
 0x37e   :  { %v8877_v45 = vadd.f32 %v8444_v59, %v11372_v5  ;;  %v8447_v40 = vadd.f32 %v8446_v18, %v8445_v33 }
 0x380   :  { %v8883_v60 = vadd.f32 %v8447_v40, %v11374_v9  ;;  %v8528_v47 = vpop.f32.mrb[92].mxu1  ;;  %v11418_v46 = vadd.f32 %v8877_v45, %v8524_v16 }
 0x381   :  { %v8529_v11 = vpop.f32.mrb[93].mxu1 }
 0x382   :  { %v8530_v22 = vadd.f32 %v8529_v11, %v8528_v47  ;;  %v8531_v43 = vpop.f32.mrb[94].mxu1  ;;  %v11420_v41 = vadd.f32 %v8883_v60, %v8527_v55 }
 0x383   :  { %v8532_v27 = vpop.f32.mrb[95].mxu1 }
 0x384   :  { %v8533_v21 = vadd.f32 %v8532_v27, %v8531_v43 }
 0x38a   :  { %v8448_v7 = vpop.f32.mrb[124].mxu0 }
 0x38b   :  { %v8449_v28 = vpop.f32.mrb[125].mxu0 }
 0x38c   :  { %v8450_v61 = vadd.f32 %v8449_v28, %v8448_v7  ;;  %v8451_v20 = vpop.f32.mrb[126].mxu0 }
 0x38d   :  { %v8452_v48 = vpop.f32.mrb[127].mxu0 }
 0x38e   :  { %v8874_v5 = vadd.f32 %v8450_v61, %v11376_v39  ;;  %v8453_v13 = vadd.f32 %v8452_v48, %v8451_v20  ;;  %v11440_v39 = vld [vmem:[%s11560_s9] ss:$0 sm:$0xff] }
 0x390   :  { %v8880_v9 = vadd.f32 %v8453_v13, %v11378_v54  ;;  %v11429_v35 = vadd.f32 %v8874_v5, %v8530_v22 }
 0x392   :  { %v8744_v50 = vpop.f32.mrb[48].mxu1  ;;  %v8776_v54 = vpop.f32.mrb[128].mxu0  ;;  %v11442_v29 = vadd.f32 %v8880_v9, %v8533_v21 }
 0x393   :  { %v8840_v24 = vadd.f32 %v11388_v31, %v8744_v50  ;;  %v6428_v23 = vpop.f32.mrb[49].mxu1  ;;  %v6784_v19 = vmul.f32 %v8776_v54, %v11427_v49  ;;  %v6713_v31 = vpop.f32.mrb[129].mxu0 }
 0x394   :  { %v8843_v56 = vadd.f32 %v11382_v52, %v6428_v23  ;;  %v8745_v2 = vpop.f32.mrb[50].mxu1  ;;  %v6782_v30 = vmul.f32 %v11427_v49, %v6713_v31  ;;  %v8777_v53 = vpop.f32.mrb[130].mxu0 }
 0x395   :  { %v6515_v38 = vmul.f32 %v8840_v24, %v11434_v6  ;;  %v8846_v4 = vadd.f32 %v11390_v58, %v8745_v2  ;;  %v6431_v8 = vpop.f32.mrb[51].mxu1  ;;  %v6806_v36 = vadd.f32 %v11440_v39, %v6784_v19  ;;  %v6785_v52 = vmul.f32 %v8777_v53, %v11427_v49  ;;  %v6716_v12 = vpop.f32.mrb[131].mxu0 }
 0x396   :  { %v6513_v15 = vmul.f32 %v8843_v56, %v11434_v6  ;;  %v8849_v32 = vadd.f32 %v11384_v17, %v6431_v8  ;;  %v6804_v16 = vadd.f32 %v11440_v39, %v6782_v30  ;;  %v6783_v58 = vmul.f32 %v11427_v49, %v6716_v12 }
 0x397   :  { %v6537_v34 = vadd.f32 %v11447_v0, %v6515_v38  ;;  %v6516_v3 = vmul.f32 %v8846_v4, %v11434_v6  ;;  %v6807_v55 = vadd.f32 %v11440_v39, %v6785_v52 }
 0x398   :  { %v6535_v42 = vadd.f32 %v11447_v0, %v6513_v15  ;;  %v6514_v63 = vmul.f32 %v8849_v32, %v11434_v6  ;;  %v6805_v25 = vadd.f32 %v11440_v39, %v6783_v58 }
 0x399   :  { %v6538_v17 = vadd.f32 %v11447_v0, %v6516_v3  ;;  %v6822_v57 = vadd.f32 %v6806_v36, %v6537_v34 }
 0x39a   :  { %v6536_v59 = vadd.f32 %v11447_v0, %v6514_v63  ;;  %v6820_v33 = vadd.f32 %v6804_v16, %v6535_v42  ;;  %v8780_v45 = vpop.f32.mrb[132].mxu0 }
 0x39b   :  { %v6823_v18 = vadd.f32 %v6807_v55, %v6538_v17  ;;  %v6788_v60 = vmul.f32 %v8780_v45, %v11427_v49  ;;  %v6729_v47 = vpop.f32.mrb[133].mxu0  ;;  %v6838_v11 = vmax.f32 %v6822_v57, 0.0 }
 0x39c   :  { %v6821_v40 = vadd.f32 %v6805_v25, %v6536_v59  ;;  %v8748_v43 = vpop.f32.mrb[52].mxu1  ;;  %v6786_v27 = vmul.f32 %v11427_v49, %v6729_v47  ;;  %v8781_v21 = vpop.f32.mrb[134].mxu0  ;;  %v6836_v7 = vmax.f32 %v6820_v33, 0.0 }
 0x39d   :  { %v6839_v22 = vmax.f32 %v6823_v18, 0.0  ;;  %v8852_v61 = vadd.f32 %v11400_v10, %v8748_v43  ;;  %v6444_v20 = vpop.f32.mrb[53].mxu1  ;;  %v6789_v48 = vmul.f32 %v8781_v21, %v11427_v49  ;;  %v6732_v5 = vpop.f32.mrb[135].mxu0  ;;  %v6810_v19 = vadd.f32 %v11440_v39, %v6788_v60 }
 0x39e   :  { %v6837_v28 = vmax.f32 %v6821_v40, 0.0  ;;  %v8855_v9 = vadd.f32 %v11394_v1, %v6444_v20  ;;  %v8749_v50 = vpop.f32.mrb[54].mxu1  ;;  %v6787_v24 = vmul.f32 %v11427_v49, %v6732_v5  ;;  %v6808_v1 = vadd.f32 %v11440_v39, %v6786_v27 }
 0x39f   :  { %v8031_v13 = vpack.c.bf16 %v6839_v22, %v6838_v11  ;;  %v6519_v54 = vmul.f32 %v8852_v61, %v11434_v6  ;;  %v8858_v56 = vadd.f32 %v11402_v51, %v8749_v50  ;;  %v6447_v2 = vpop.f32.mrb[55].mxu1  ;;  %v6811_v4 = vadd.f32 %v11440_v39, %v6789_v48 }
 0x3a0   :  { %v8026_v23 = vpack.c.bf16 %v6837_v28, %v6836_v7  ;;  %v6517_v10 = vmul.f32 %v8855_v9, %v11434_v6  ;;  %v8861_v31 = vadd.f32 %v11396_v44, %v6447_v2  ;;  %v6809_v53 = vadd.f32 %v11440_v39, %v6787_v24 }
 0x3a1   :  { %8063 = vst [vmem:[%s11562_s10 + $0x8] sm:$0xff] %v8031_v13   ;;  %v6541_v38 = vadd.f32 %v11447_v0, %v6519_v54  ;;  %v6520_v51 = vmul.f32 %v8858_v56, %v11434_v6 }
 0x3a2   :  { %8027 = vst [vmem:[%s11562_s10] sm:$0xff] %v8026_v23   ;;  %v6539_v8 = vadd.f32 %v11447_v0, %v6517_v10  ;;  %v6518_v30 = vmul.f32 %v8861_v31, %v11434_v6  ;;  %v8784_v15 = vpop.f32.mrb[136].mxu0 }
 0x3a3   :  { %v6542_v44 = vadd.f32 %v11447_v0, %v6520_v51  ;;  %v6826_v32 = vadd.f32 %v6810_v19, %v6541_v38  ;;  %v6745_v36 = vpop.f32.mrb[137].mxu0  ;;  %v6792_v57 = vmul.f32 %v8784_v15, %v11427_v49 }
 0x3a4   :  { %v6540_v52 = vadd.f32 %v11447_v0, %v6518_v30  ;;  %v6824_v12 = vadd.f32 %v6808_v1, %v6539_v8  ;;  %v8785_v34 = vpop.f32.mrb[138].mxu0  ;;  %v6790_v33 = vmul.f32 %v11427_v49, %v6745_v36 }
 0x3a5   :  { %v6827_v3 = vadd.f32 %v6811_v4, %v6542_v44  ;;  %v6748_v16 = vpop.f32.mrb[139].mxu0  ;;  %v6842_v42 = vmax.f32 %v6826_v32, 0.0  ;;  %v6793_v60 = vmul.f32 %v8785_v34, %v11427_v49  ;;  %v6814_v28 = vadd.f32 %v11440_v39, %v6792_v57 }
 0x3a6   :  { %v6825_v58 = vadd.f32 %v6809_v53, %v6540_v52  ;;  %v6840_v55 = vmax.f32 %v6824_v12, 0.0  ;;  %v6791_v43 = vmul.f32 %v11427_v49, %v6748_v16  ;;  %v6812_v48 = vadd.f32 %v11440_v39, %v6790_v33 }
 0x3a7   :  { %v6843_v63 = vmax.f32 %v6827_v3, 0.0  ;;  %v6815_v50 = vadd.f32 %v11440_v39, %v6793_v60 }
 0x3a8   :  { %v6841_v17 = vmax.f32 %v6825_v58, 0.0  ;;  %v6813_v23 = vadd.f32 %v11440_v39, %v6791_v43 }
 0x3a9   :  { %v8041_v25 = vpack.c.bf16 %v6843_v63, %v6842_v42  ;;  %v8752_v59 = vpop.f32.mrb[56].mxu1 }
 0x3aa   :  { %v8036_v18 = vpack.c.bf16 %v6841_v17, %v6840_v55  ;;  %v8864_v45 = vadd.f32 %v11412_v62, %v8752_v59  ;;  %v6460_v40 = vpop.f32.mrb[57].mxu1  ;;  %v8788_v47 = vpop.f32.mrb[140].mxu0 }
 0x3ab   :  { %8065 = vst [vmem:[%s11562_s10 + $0x18] sm:$0xff] %v8041_v25   ;;  %v8867_v11 = vadd.f32 %v11406_v37, %v6460_v40  ;;  %v8753_v22 = vpop.f32.mrb[58].mxu1  ;;  %v6761_v27 = vpop.f32.mrb[141].mxu0  ;;  %v6796_v38 = vmul.f32 %v8788_v47, %v11427_v49 }
 0x3ac   :  { %8064 = vst [vmem:[%s11562_s10 + $0x10] sm:$0xff] %v8036_v18   ;;  %v6523_v62 = vmul.f32 %v8864_v45, %v11434_v6  ;;  %v8870_v21 = vadd.f32 %v11414_v14, %v8753_v22  ;;  %v6463_v7 = vpop.f32.mrb[59].mxu1  ;;  %v8789_v61 = vpop.f32.mrb[142].mxu0  ;;  %v6794_v30 = vmul.f32 %v11427_v49, %v6761_v27 }
 0x3ad   :  { %v6521_v20 = vmul.f32 %v8867_v11, %v11434_v6  ;;  %v8873_v37 = vadd.f32 %v11408_v26, %v6463_v7  ;;  %v6764_v5 = vpop.f32.mrb[143].mxu0  ;;  %v6797_v32 = vmul.f32 %v8789_v61, %v11427_v49 }
 0x3ae   :  { %v6545_v13 = vadd.f32 %v11447_v0, %v6523_v62  ;;  %v6524_v9 = vmul.f32 %v8870_v21, %v11434_v6  ;;  %v6795_v34 = vmul.f32 %v11427_v49, %v6764_v5  ;;  %v6816_v49 = vadd.f32 %v11440_v39, %v6794_v30 }
 0x3af   :  { %v6543_v24 = vadd.f32 %v11447_v0, %v6521_v20  ;;  %v6522_v14 = vmul.f32 %v8873_v37, %v11434_v6  ;;  %v6819_v17 = vadd.f32 %v11440_v39, %v6797_v32 }
 0x3b0   :  { %v6546_v54 = vadd.f32 %v11447_v0, %v6524_v9  ;;  %v6830_v56 = vadd.f32 %v6814_v28, %v6545_v13  ;;  %v6817_v25 = vadd.f32 %v11440_v39, %v6795_v34 }
 0x3b1   :  { %v6544_v26 = vadd.f32 %v11447_v0, %v6522_v14  ;;  %v6828_v2 = vadd.f32 %v6812_v48, %v6543_v24 }
 0x3b2   :  { %v6831_v19 = vadd.f32 %v6815_v50, %v6546_v54  ;;  %v6846_v31 = vmax.f32 %v6830_v56, 0.0 }
 0x3b3   :  { %v6829_v10 = vadd.f32 %v6813_v23, %v6544_v26  ;;  %v6844_v51 = vmax.f32 %v6828_v2, 0.0 }
 0x3b4   :  { %v6847_v1 = vmax.f32 %v6831_v19, 0.0 }
 0x3b5   :  { %v6845_v4 = vmax.f32 %v6829_v10, 0.0  ;;  %v8756_v8 = vpop.f32.mrb[60].mxu1 }
 0x3b6   :  { %v8051_v53 = vpack.c.bf16 %v6847_v1, %v6846_v31  ;;  %v8876_v15 = vadd.f32 %v11429_v35, %v8756_v8  ;;  %v6476_v44 = vpop.f32.mrb[61].mxu1  ;;  %v6818_v35 = vadd.f32 %v11440_v39, %v6796_v38 }
 0x3b7   :  { %v8046_v36 = vpack.c.bf16 %v6845_v4, %v6844_v51  ;;  %v8879_v52 = vadd.f32 %v11418_v46, %v6476_v44  ;;  %v8757_v12 = vpop.f32.mrb[62].mxu1 }
 0x3b8   :  { %8067 = vst [vmem:[%s11562_s10 + $0x28] sm:$0xff] %v8051_v53   ;;  %v6527_v3 = vmul.f32 %v8876_v15, %v11434_v6  ;;  %v8882_v16 = vadd.f32 %v11442_v29, %v8757_v12  ;;  %v6479_v58 = vpop.f32.mrb[63].mxu1 }
 0x3b9   :  { %8066 = vst [vmem:[%s11562_s10 + $0x20] sm:$0xff] %v8046_v36   ;;  %v6525_v46 = vmul.f32 %v8879_v52, %v11434_v6  ;;  %v8885_v42 = vadd.f32 %v11420_v41, %v6479_v58 }
 0x3ba   :  { %v6549_v63 = vadd.f32 %v11447_v0, %v6527_v3  ;;  %v6528_v55 = vmul.f32 %v8882_v16, %v11434_v6 }
 0x3bb   :  { %v6547_v29 = vadd.f32 %v11447_v0, %v6525_v46  ;;  %v6526_v57 = vmul.f32 %v8885_v42, %v11434_v6 }
 0x3bc   :  { %v6550_v59 = vadd.f32 %v11447_v0, %v6528_v55  ;;  %v6834_v33 = vadd.f32 %v6818_v35, %v6549_v63 }
 0x3bd   :  { %v6548_v18 = vadd.f32 %v11447_v0, %v6526_v57  ;;  %v6832_v41 = vadd.f32 %v6816_v49, %v6547_v29 }
 0x3be   :  { %v6835_v45 = vadd.f32 %v6819_v17, %v6550_v59  ;;  %v6850_v60 = vmax.f32 %v6834_v33, 0.0 }
 0x3bf   :  { %v6833_v40 = vadd.f32 %v6817_v25, %v6548_v18  ;;  %v6848_v11 = vmax.f32 %v6832_v41, 0.0 }
 0x3c0   :  { %v6851_v47 = vmax.f32 %v6835_v45, 0.0 }
 0x3c1   :  { %v6849_v22 = vmax.f32 %v6833_v40, 0.0 }
 0x3c2   :  { %v8061_v43 = vpack.c.bf16 %v6851_v47, %v6850_v60 }
 0x3c3   :  { %v8056_v27 = vpack.c.bf16 %v6849_v22, %v6848_v11 }
 0x3c4   :  { %8069 = vst [vmem:[%s11562_s10 + $0x38] sm:$0xff] %v8061_v43  }
 0x3c5   :  { %8068 = vst [vmem:[%s11562_s10 + $0x30] sm:$0xff] %v8056_v27  }

</bundles_post_ra>
